<compile_context>
chip_gen: v6e
topology: v6e:2x2x1
jax: 0.10.0
libtpu: 0.0.40
codegen_flags: <defaults>
</compile_context>

<pallas_src>
import functools

import jax
import jax.numpy as jnp
from jax.experimental import pallas as pl
from jax.experimental.pallas import tpu as pltpu


# ---------------------------------------------------------------------------
# VMEM budgeting / batch-block selection
# ---------------------------------------------------------------------------
def _vmem_capacity_bytes():
    """Per-generation VMEM capacity; conservative (v7x = 64 MiB) fallback."""
    try:
        cap = getattr(pltpu.get_tpu_info(), "vmem_capacity_bytes", None)
        if cap:
            return int(cap)
    except Exception:
        pass
    return 64 * 1024 * 1024


_VMEM_CAP = _vmem_capacity_bytes()
# Raised scoped-VMEM limit; capped at 96 MiB so a value derived on v5e/v6e
# (128 MiB physical) can never exceed v7x's 64 MiB by much (it is a limit, not
# a reservation, and our working sets stay far below it anyway).
_VMEM_LIMIT = max(32 * 1024 * 1024, min(int(0.85 * _VMEM_CAP), 96 * 1024 * 1024))
_TB_BUDGET = int(0.7 * _VMEM_LIMIT)


def _choose_tb(B, R, per_elem_bytes, weight_bytes, budget=_TB_BUDGET):
    """Batch elements per grid step.

    Prefer a single grid step (v5e/v6e: one TensorCore, the grid is a serial
    loop).  Split in two only when each half still feeds >= 256 MXU rows
    (worthwhile on v7x's two TensorCores, ~free elsewhere) and fits VMEM.
    """
    avail = max(budget - 2 * weight_bytes, per_elem_bytes)
    cap = max(1, avail // per_elem_bytes)
    cands = sorted({B} | {t for t in range(8, B + 1, 8) if B % t == 0})
    fits = [t for t in cands if t <= cap] or [cands[0]]
    tb = max(fits)
    if tb == B and B % 2 == 0 and (B // 2) in fits and (B // 2) * R >= 256:
        tb = B // 2
    return tb


# ---------------------------------------------------------------------------
# Kernel 1: RecordEncoder forward (content-selection gate) + mean init hidden
# ---------------------------------------------------------------------------
def _record_encoder_kernel(x_ref, w1_ref, b1_ref, wlg1_ref, wg2_ref,
                           enc_ref, hid_ref, *, fused_gather):
    TB, R, H = enc_ref.shape
    cdt = w1_ref.dtype                       # compute dtype for MXU operands

    if fused_gather:
        # x_ref : (TB*R, TOK) int32 combined (token-slot, vocab) ids.
        # w1_ref: (Kp, H) embedding table folded into relu_mlp's Linear
        #         (row t*V+v = table[v] @ W1^T[tH:(t+1)H]).  Gather + first
        #         Linear collapse into one one-hot matmul; emb_cat never
        #         touches HBM.
        TBR, TOK = x_ref.shape
        Kp = w1_ref.shape[0]
        lane = jax.lax.broadcasted_iota(jnp.int32, (TBR, Kp), 1)
        onehot = (lane == x_ref[:, 0:1]).astype(cdt)
        for t in range(1, TOK):              # static unroll, TOK is small
            onehot = onehot + (lane == x_ref[:, t:t + 1]).astype(cdt)
        pre = jnp.dot(onehot, w1_ref[...],
                      preferred_element_type=jnp.float32) + b1_ref[...]
    else:
        # Large-vocab fallback: x_ref is pre-gathered emb_cat (TB, R, 4H).
        TBR = TB * R
        x_flat = x_ref[...].reshape(TBR, x_ref.shape[-1])
        pre = jnp.dot(x_flat, w1_ref[...],
                      preferred_element_type=jnp.float32) + b1_ref[...]

    # relu_mlp activation: LeakyReLU(0.01)
    emb_relu = jnp.where(pre > 0, pre, 0.01 * pre)           # (TB*R, H) f32
    er_c = emb_relu.astype(cdt)

    # [emb_lin | gate1] = emb_relu @ [Wl^T | Wg1^T]  (single N=2H matmul)
    lin_g1 = jnp.dot(er_c, wlg1_ref[...], preferred_element_type=jnp.float32)
    emb_lin = lin_g1[:, :H]
    gate1 = lin_g1[:, H:]

    # per-batch (R, R) self-attention; reshapes are layout-free when R % 8 == 0
    er3 = er_c.reshape(TB, R, H)
    logits = jnp.einsum('bih,bjh->bij', er3,
                        emb_lin.astype(cdt).reshape(TB, R, H),
                        preferred_element_type=jnp.float32)  # (TB, R, R)
    m = jnp.max(logits, axis=-1, keepdims=True)
    e = jnp.exp(logits - m)
    attention = e * pl.reciprocal(jnp.sum(e, axis=-1, keepdims=True), approx=True)
    emb_att = jnp.einsum('bij,bjh->bih', attention.astype(cdt), er3,
                         preferred_element_type=jnp.float32)  # (TB, R, H)

    # sigmoid_mlp on cat([emb_relu, emb_att]) in split-weight form (no concat)
    gate = jax.nn.sigmoid(
        gate1 + jnp.dot(emb_att.reshape(TB * R, H).astype(cdt), wg2_ref[...],
                        preferred_element_type=jnp.float32))  # (TB*R, H)
    encoded = (gate * emb_relu).reshape(TB, R, H)
    enc_ref[...] = encoded.astype(enc_ref.dtype)
    # init_hidden(): mean over the record axis
    hid_ref[...] = jnp.mean(encoded, axis=1).astype(hid_ref.dtype)


def record_encode(x, w1, b1, wlg1, wg2, *, B, R, act_dtype, fused_gather):
    H = wg2.shape[1]
    K = w1.shape[0]                    # Kp (fused) or 4H (fallback)
    cd_i = w1.dtype.itemsize
    act_i = jnp.dtype(act_dtype).itemsize
    if fused_gather:
        in_elem = R * x.shape[-1] * 4
        inter = R * K * (4 + cd_i)
    else:
        in_elem = R * K * act_i
        inter = 0
    per_elem = (2 * (in_elem + R * H * act_i + H * 4)
                + inter + 9 * R * H * 4 + 2 * R * R * 4)
    w_bytes = (K * H + 3 * H * H) * cd_i + H * 4
    TB = _choose_tb(B, R, per_elem, w_bytes)

    const = lambda shape: pl.BlockSpec(shape, lambda b: (0,) * len(shape))
    if fused_gather:
        x_spec = pl.BlockSpec((TB * R, x.shape[-1]), lambda b: (b, 0))
    else:
        x_spec = pl.BlockSpec((TB, R, K), lambda b: (b, 0, 0))

    kernel = functools.partial(_record_encoder_kernel, fused_gather=fused_gather)
    return pl.pallas_call(
        kernel,
        out_shape=(jax.ShapeDtypeStruct((B, R, H), act_dtype),
                   jax.ShapeDtypeStruct((B, H), jnp.float32)),
        grid=(B // TB,),
        in_specs=[x_spec, const(tuple(w1.shape)), const((1, H)),
                  const((H, 2 * H)), const((H, H))],
        out_specs=(pl.BlockSpec((TB, R, H), lambda b: (b, 0, 0)),
                   pl.BlockSpec((TB, H), lambda b: (b, 0))),
        compiler_params=pltpu.CompilerParams(
            dimension_semantics=("parallel",),
            vmem_limit_bytes=_VMEM_LIMIT),
    )(x, w1, b1, wlg1, wg2)


# ---------------------------------------------------------------------------
# Kernel 2: ContentPlanner forward step (gather + LSTM cell + log-softmax attn)
# ---------------------------------------------------------------------------
def planner_step_kernel(idx_ref, sc_ref, h_ref, c_ref, wxh_ref, bias_ref, wp_ref,
                        att_ref, hout_ref, cout_ref):
    TB, R, H = sc_ref.shape
    cdt = wxh_ref.dtype
    sc = sc_ref[...].astype(jnp.float32)                      # (TB, R, H)
    idx = idx_ref[...]                                        # (TB, 1) int32

    # gather selected_content[b, idx[b], :] as a masked sublane reduction (VPU).
    # NOTE: an out-of-range index yields zeros (PyTorch gather would raise).
    rec_ids = jax.lax.broadcasted_iota(jnp.int32, (TB, R, H), 1)
    sel = rec_ids == idx[:, :, None]
    x = jnp.sum(jnp.where(sel, sc, 0.0), axis=1)              # (TB, H) f32

    h = h_ref[...]
    c = c_ref[...]
    # LSTM cell: single K=2H matmul over stacked [x | h]  (gate order i,f,g,o)
    xh = jnp.concatenate([x, h], axis=-1).astype(cdt)         # (TB, 2H)
    gates = (jnp.dot(xh, wxh_ref[...], preferred_element_type=jnp.float32)
             + bias_ref[...])                                 # (TB, 4H) f32
    i_g = jax.nn.sigmoid(gates[:, 0:H])
    f_g = jax.nn.sigmoid(gates[:, H:2 * H])
    g_g = jnp.tanh(gates[:, 2 * H:3 * H])
    o_g = jax.nn.sigmoid(gates[:, 3 * H:4 * H])
    c_new = f_g * c + i_g * g_g
    h_new = o_g * jnp.tanh(c_new)                             # (TB, H)

    # pointer logits, reassociated: logits = (h_new @ Wp) @ sc^T
    v = jnp.dot(h_new.astype(cdt), wp_ref[...],
                preferred_element_type=jnp.float32)           # (TB, H)
    logits = jnp.sum(sc * v[:, None, :], axis=-1)             # (TB, R)
    m = jnp.max(logits, axis=-1, keepdims=True)
    lse = m + jnp.log(jnp.sum(jnp.exp(logits - m), axis=-1, keepdims=True))
    att_ref[...] = (logits - lse).astype(att_ref.dtype)
    hout_ref[...] = h_new.astype(hout_ref.dtype)
    cout_ref[...] = c_new.astype(cout_ref.dtype)


def planner_step(index_b1, selected_content, h_bh, c_bh, wxh_t, bias, wp):
    B, R, H = selected_content.shape
    act_i = selected_content.dtype.itemsize
    cd_i = wxh_t.dtype.itemsize
    per_elem = (2 * (4 + R * H * act_i + 4 * H * 4 + R * 4)
                + 3 * R * H * 4 + 16 * H * 4 + 2 * R * 4)
    w_bytes = (2 * H * 4 * H + H * H) * cd_i + 4 * H * 4
    TB = _choose_tb(B, R, per_elem, w_bytes)

    const = lambda shape: pl.BlockSpec(shape, lambda b: (0,) * len(shape))
    row = lambda shape: pl.BlockSpec(shape, lambda b: (b, 0))
    return pl.pallas_call(
        planner_step_kernel,
        out_shape=(jax.ShapeDtypeStruct((B, R), jnp.float32),
                   jax.ShapeDtypeStruct((B, H), jnp.float32),
                   jax.ShapeDtypeStruct((B, H), jnp.float32)),
        grid=(B // TB,),
        in_specs=[
            row((TB, 1)),                                     # pointer indices
            pl.BlockSpec((TB, R, H), lambda b: (b, 0, 0)),    # selected_content
            row((TB, H)), row((TB, H)),                       # h, c
            const((2 * H, 4 * H)), const((1, 4 * H)), const((H, H)),
        ],
        out_specs=(row((TB, R)), row((TB, H)), row((TB, H))),
        # update the LSTM state in place (h -> h_out, c -> c_out)
        input_output_aliases={2: 1, 3: 2},
        compiler_params=pltpu.CompilerParams(
            dimension_semantics=("parallel",),
            vmem_limit_bytes=_VMEM_LIMIT),
    )(index_b1, selected_content, h_bh, c_bh, wxh_t, bias, wp)


# ---------------------------------------------------------------------------
# Module wrapper (parameter setup + PyTorch-layout glue in plain JAX)
# ---------------------------------------------------------------------------
class ContentPlannerPallas:
    # Fuse the in-kernel one-hot gather only while the folded (TOK*V, H) weight
    # and the one-hot stay MXU-friendly; otherwise fall back to an XLA gather.
    _FUSED_GATHER_MAX_K = 4096

    def __init__(self, input_size, hidden_size, key, compute_dtype=jnp.bfloat16):
        H = hidden_size
        self.hidden_size = H
        self.input_size = input_size
        self.cdtype = compute_dtype
        ks = jax.random.split(key, 9)
        s = 0.1
        # master parameters (f32, PyTorch layouts) -- also used by the reference
        self.embedding = jax.random.normal(ks[0], (input_size, H), jnp.float32) * s
        self.W1 = jax.random.normal(ks[1], (H, 4 * H), jnp.float32) * s   # relu_mlp Linear
        self.b1 = jax.random.normal(ks[2], (H,), jnp.float32) * s
        self.Wl = jax.random.normal(ks[3], (H, H), jnp.float32) * s       # linear (no bias)
        self.Wg = jax.random.normal(ks[4], (H, 2 * H), jnp.float32) * s   # sigmoid_mlp (no bias)
        self.Wih = jax.random.normal(ks[5], (4 * H, H), jnp.float32) * s
        self.Whh = jax.random.normal(ks[6], (4 * H, H), jnp.float32) * s
        self.bih = jax.random.normal(ks[7], (4 * H,), jnp.float32) * s
        self.bhh = jax.random.normal(ks[8], (4 * H,), jnp.float32) * s
        self.Wp = jax.random.normal(jax.random.fold_in(key, 99), (H, H),
                                    jnp.float32) * s                      # linear (no bias)
        # pre-transposed / pre-fused kernel operands (built once, outside kernels)
        cd = compute_dtype
        self._w1t = jnp.transpose(self.W1).astype(cd)                     # (4H, H) fallback
        self._b1 = self.b1.reshape(1, -1)                                 # f32
        self._wlg1t = jnp.concatenate(
            [jnp.transpose(self.Wl), jnp.transpose(self.Wg[:, :H])],
            axis=1).astype(cd)                                            # (H, 2H)
        self._wg2t = jnp.transpose(self.Wg[:, H:]).astype(cd)             # (H, H)
        self._wxh_t = jnp.concatenate(
            [jnp.transpose(self.Wih), jnp.transpose(self.Whh)],
            axis=0).astype(cd)                                            # (2H, 4H)
        self._bias = (self.bih + self.bhh).reshape(1, -1)                 # f32
        self._wp = self.Wp.astype(cd)    # used as h_new @ Wp (reassociated logits)
        self._w1eff = {}                 # TOK -> folded embedding+W1 weight
        self.selected_content = None

    def _folded_embedding_w1(self, tok):
        # Fold the embedding table into relu_mlp's Linear:
        #   pre[b,r,:] = sum_t table[records[b,r,t]] @ W1^T[tH:(t+1)H, :] + b1
        # so row (t*V + v) of the folded weight is table[v] @ W1^T[tH:(t+1)H, :].
        if tok not in self._w1eff:
            H, V = self.hidden_size, self.input_size
            w1t = jnp.transpose(self.W1)                                  # (4H, H) f32
            blocks = [self.embedding @ w1t[t * H:(t + 1) * H, :] for t in range(tok)]
            w = jnp.concatenate(blocks, axis=0)                           # (tok*V, H)
            kp = ((tok * V + 127) // 128) * 128
            w = jnp.pad(w, ((0, kp - tok * V), (0, 0)))
            self._w1eff[tok] = w.astype(self.cdtype)
        return self._w1eff[tok]

    def init_hidden(self, records):
        # records: int32 [B, R, TOK]
        B, R, TOK = records.shape
        V = self.input_size
        if TOK * V <= self._FUSED_GATHER_MAX_K:
            # embedding gather fused into kernel 1: no HBM round trip of emb_cat
            comb = (records.astype(jnp.int32)
                    + jnp.arange(TOK, dtype=jnp.int32)[None, None, :] * V
                    ).reshape(B * R, TOK)
            encoded, hid = record_encode(
                comb, self._folded_embedding_w1(TOK), self._b1,
                self._wlg1t, self._wg2t,
                B=B, R=R, act_dtype=self.cdtype, fused_gather=True)
        else:
            emb_cat = self.embedding[records].reshape(B, R, -1).astype(self.cdtype)
            encoded, hid = record_encode(
                emb_cat, self._w1t, self._b1, self._wlg1t, self._wg2t,
                B=B, R=R, act_dtype=self.cdtype, fused_gather=False)
        self.selected_content = encoded                     # (B, R, H)
        hidden = hid[None]                                  # (1, B, H) f32
        cell = jnp.zeros_like(hidden)
        return hidden, cell

    def forward(self, index, hidden, cell):
        # index: int [B]; hidden/cell: (1, B, H)
        # TODO(synk): fuse an autoregressive decode loop into a single
        # pallas_call (step grid axis "arbitrary", selected_content / LSTM
        # weights VMEM-resident, h/c carried in scratch).
        B = index.shape[0]
        att, h_new, c_new = planner_step(
            index.astype(jnp.int32).reshape(B, 1),
            self.selected_content, hidden[0], cell[0],
            self._wxh_t, self._bias, self._wp)
        return att, h_new[None], c_new[None]


# ---------------------------------------------------------------------------
# Pure-JAX reference (mirrors the PyTorch code) for correctness check
# ---------------------------------------------------------------------------
def ref_forward(m, records, index):
    B, R, _ = records.shape
    H = m.hidden_size
    emb_cat = m.embedding[records].reshape(B, R, -1)
    pre = emb_cat @ m.W1.T + m.b1
    emb_relu = jnp.where(pre > 0, pre, 0.01 * pre)
    emb_lin = emb_relu @ m.Wl.T
    logits = jnp.einsum('bih,bjh->bij', emb_relu, emb_lin)
    attention = jax.nn.softmax(logits, axis=2)
    emb_att = jnp.einsum('bij,bjh->bih', attention, emb_relu)
    gate = jax.nn.sigmoid(jnp.concatenate([emb_relu, emb_att], -1) @ m.Wg.T)
    sc = gate * emb_relu
    hidden = jnp.mean(sc, axis=1, keepdims=True).transpose(1, 0, 2)   # (1,B,H)
    cell = jnp.zeros_like(hidden)
    # planner step
    x = sc[jnp.arange(B), index]                                      # (B, H)
    h, c = hidden[0], cell[0]
    gates = x @ m.Wih.T + m.bih + h @ m.Whh.T + m.bhh
    i_g = jax.nn.sigmoid(gates[:, :H]); f_g = jax.nn.sigmoid(gates[:, H:2 * H])
    g_g = jnp.tanh(gates[:, 2 * H:3 * H]); o_g = jax.nn.sigmoid(gates[:, 3 * H:])
    c_new = f_g * c + i_g * g_g
    h_new = o_g * jnp.tanh(c_new)
    content_lin = sc @ m.Wp.T
    lg = jnp.einsum('bh,brh->br', h_new, content_lin)
    att = jax.nn.log_softmax(lg, axis=-1)
    return att, h_new[None], c_new[None], hidden


if __name__ == "__main__":
    # batch, records, tokens/record, hidden, vocab  (H multiple of 128, R % 8 == 0)
    B, R, TOK, H, V = 16, 16, 4, 128, 50
    key = jax.random.PRNGKey(0)
    k_rec, k_idx, k_par = jax.random.split(key, 3)

    records = jax.random.randint(k_rec, (B, R, TOK), 0, V, dtype=jnp.int32)
    index = jax.random.randint(k_idx, (B,), 0, R, dtype=jnp.int32)

    # f32 compute path: tight parity check against the pure-JAX reference
    model = ContentPlannerPallas(V, H, k_par, compute_dtype=jnp.float32)
    hidden, cell = model.init_hidden(records)                         # kernel 1
    attention, hidden_n, cell_n = model.forward(index, hidden, cell)  # kernel 2
    jax.block_until_ready((attention, hidden_n, cell_n))

    att_ref, h_ref, c_ref, hid0_ref = ref_forward(model, records, index)
    tol = dict(atol=1e-3, rtol=1e-3)   # approx reciprocal in the encoder softmax
    assert jnp.allclose(hidden, hid0_ref, **tol)
    assert jnp.allclose(attention, att_ref, **tol)
    assert jnp.allclose(hidden_n, h_ref, **tol)
    assert jnp.allclose(cell_n, c_ref, **tol)

    # default bf16 compute path (halved HBM traffic / VMEM): loose sanity check
    model_bf16 = ContentPlannerPallas(V, H, k_par)
    hb, cb = model_bf16.init_hidden(records)
    ab, hbn, cbn = model_bf16.forward(index, hb, cb)
    jax.block_until_ready((ab, hbn, cbn))
    assert jnp.max(jnp.abs(ab - att_ref)) < 0.2
    assert jnp.max(jnp.abs(hbn - h_ref)) < 0.1
    assert bool(jnp.all(jnp.isfinite(cbn)))

    print("KERNEL_OK")
</pallas_src>

<mosaic_0001>
module attributes {stable_mosaic.version = 11 : i64} {
  func.func @_record_encoder_kernel(%arg0: i32, %arg1: memref<256x4xi32, #tpu.memory_space<vmem>>, %arg2: memref<256x128xf32, #tpu.memory_space<vmem>>, %arg3: memref<1x128xf32, #tpu.memory_space<vmem>>, %arg4: memref<128x256xf32, #tpu.memory_space<vmem>>, %arg5: memref<128x128xf32, #tpu.memory_space<vmem>>, %arg6: memref<16x16x128xf32, #tpu.memory_space<vmem>>, %arg7: memref<16x128xf32, #tpu.memory_space<vmem>>) attributes {dimension_semantics = [#tpu.dimension_semantics<parallel>], iteration_bounds = array<i64: 1>, scalar_prefetch = 0 : i64, scratch_operands = 0 : i64, tpu.core_type = #tpu.core_type<tc>, window_params = [{transform_indices = @transform_0, window_bounds = array<i64: 256, 4>}, {pipeline_mode = #tpu.pipeline_mode<synchronous>, transform_indices = @transform_1, window_bounds = array<i64: 256, 128>}, {pipeline_mode = #tpu.pipeline_mode<synchronous>, transform_indices = @transform_2, window_bounds = array<i64: 1, 128>}, {pipeline_mode = #tpu.pipeline_mode<synchronous>, transform_indices = @transform_3, window_bounds = array<i64: 128, 256>}, {pipeline_mode = #tpu.pipeline_mode<synchronous>, transform_indices = @transform_4, window_bounds = array<i64: 128, 128>}, {transform_indices = @transform_5, window_bounds = array<i64: 16, 16, 128>}, {transform_indices = @transform_6, window_bounds = array<i64: 16, 128>}]} {
    %0 = tpu.iota {dimensions = array<i32: 1>} : vector<256x256xi32>
    %c0 = arith.constant 0 : index
    %c0_0 = arith.constant 0 : index
    %1 = vector.load %arg1[%c0, %c0_0] : memref<256x4xi32, #tpu.memory_space<vmem>>, vector<256x1xi32>
    %2 = vector.broadcast %1 : vector<256x1xi32> to vector<256x256xi32>
    %3 = arith.cmpi eq, %0, %2 : vector<256x256xi32>
    %4 = arith.extui %3 : vector<256x256xi1> to vector<256x256xi32>
    %5 = arith.sitofp %4 : vector<256x256xi32> to vector<256x256xf32>
    %c0_1 = arith.constant 0 : index
    %c1 = arith.constant 1 : index
    %6 = vector.load %arg1[%c0_1, %c1] : memref<256x4xi32, #tpu.memory_space<vmem>>, vector<256x1xi32>
    %7 = vector.broadcast %6 : vector<256x1xi32> to vector<256x256xi32>
    %8 = arith.cmpi eq, %0, %7 : vector<256x256xi32>
    %9 = arith.extui %8 : vector<256x256xi1> to vector<256x256xi32>
    %10 = arith.sitofp %9 : vector<256x256xi32> to vector<256x256xf32>
    %11 = arith.addf %5, %10 : vector<256x256xf32>
    %c0_2 = arith.constant 0 : index
    %c2 = arith.constant 2 : index
    %12 = vector.load %arg1[%c0_2, %c2] : memref<256x4xi32, #tpu.memory_space<vmem>>, vector<256x1xi32>
    %13 = vector.broadcast %12 : vector<256x1xi32> to vector<256x256xi32>
    %14 = arith.cmpi eq, %0, %13 : vector<256x256xi32>
    %15 = arith.extui %14 : vector<256x256xi1> to vector<256x256xi32>
    %16 = arith.sitofp %15 : vector<256x256xi32> to vector<256x256xf32>
    %17 = arith.addf %11, %16 : vector<256x256xf32>
    %c0_3 = arith.constant 0 : index
    %c3 = arith.constant 3 : index
    %18 = vector.load %arg1[%c0_3, %c3] : memref<256x4xi32, #tpu.memory_space<vmem>>, vector<256x1xi32>
    %19 = vector.broadcast %18 : vector<256x1xi32> to vector<256x256xi32>
    %20 = arith.cmpi eq, %0, %19 : vector<256x256xi32>
    %21 = arith.extui %20 : vector<256x256xi1> to vector<256x256xi32>
    %22 = arith.sitofp %21 : vector<256x256xi32> to vector<256x256xf32>
    %23 = arith.addf %17, %22 : vector<256x256xf32>
    %c0_4 = arith.constant 0 : index
    %c0_5 = arith.constant 0 : index
    %24 = vector.load %arg2[%c0_4, %c0_5] : memref<256x128xf32, #tpu.memory_space<vmem>>, vector<256x128xf32>
    %cst = arith.constant dense<0.000000e+00> : vector<256x128xf32>
    %25 = tpu.matmul %23, %24, %cst {dimension_numbers = #tpu.dot_dimension_numbers<[1], [0], [0], [1], [0, 0, 1, 1], [], []>} : vector<256x256xf32>, vector<256x128xf32>, vector<256x128xf32> -> vector<256x128xf32>
    %c0_6 = arith.constant 0 : index
    %c0_7 = arith.constant 0 : index
    %26 = vector.load %arg3[%c0_6, %c0_7] : memref<1x128xf32, #tpu.memory_space<vmem>>, vector<1x128xf32>
    %27 = vector.broadcast %26 : vector<1x128xf32> to vector<256x128xf32>
    %28 = arith.addf %25, %27 : vector<256x128xf32>
    %cst_8 = arith.constant 0.000000e+00 : f32
    %29 = vector.broadcast %cst_8 : f32 to vector<256x128xf32>
    %30 = arith.cmpf ogt, %28, %29 : vector<256x128xf32>
    %cst_9 = arith.constant 0.00999999977 : f32
    %31 = vector.broadcast %cst_9 : f32 to vector<256x128xf32>
    %32 = arith.mulf %31, %28 : vector<256x128xf32>
    %33 = arith.select %30, %28, %32 : vector<256x128xi1>, vector<256x128xf32>
    %c0_10 = arith.constant 0 : index
    %c0_11 = arith.constant 0 : index
    %34 = vector.load %arg4[%c0_10, %c0_11] : memref<128x256xf32, #tpu.memory_space<vmem>>, vector<128x256xf32>
    %cst_12 = arith.constant dense<0.000000e+00> : vector<256x256xf32>
    %35 = tpu.matmul %33, %34, %cst_12 {dimension_numbers = #tpu.dot_dimension_numbers<[1], [0], [0], [1], [0, 0, 1, 1], [], []>} : vector<256x128xf32>, vector<128x256xf32>, vector<256x256xf32> -> vector<256x256xf32>
    %36 = vector.extract_strided_slice %35 {offsets = [0, 0], sizes = [256, 128], strides = [1, 1]} : vector<256x256xf32> to vector<256x128xf32>
    %37 = vector.extract_strided_slice %35 {offsets = [0, 128], sizes = [256, 128], strides = [1, 1]} : vector<256x256xf32> to vector<256x128xf32>
    %38 = vector.shape_cast %33 : vector<256x128xf32> to vector<16x16x128xf32>
    %39 = vector.shape_cast %36 : vector<256x128xf32> to vector<16x16x128xf32>
    "tpu.trace_start"() <{level = 10 : i32, message = "bih,bjh->bij"}> : () -> ()
    %cst_13 = arith.constant dense<0.000000e+00> : vector<16x16x16xf32>
    %40 = tpu.matmul %38, %39, %cst_13 {dimension_numbers = #tpu.dot_dimension_numbers<[2], [2], [1], [1], [0, 0, 0, 1, 1, 1], [0], [0]>} : vector<16x16x128xf32>, vector<16x16x128xf32>, vector<16x16x16xf32> -> vector<16x16x16xf32>
    "tpu.trace_stop"() : () -> ()
    %cst_14 = arith.constant dense<0xFF800000> : vector<16x16xf32>
    %41 = vector.multi_reduction <maximumf>, %40, %cst_14 [2] : vector<16x16x16xf32> to vector<16x16xf32>
    %42 = vector.shape_cast %41 : vector<16x16xf32> to vector<16x16x1xf32>
    %43 = vector.broadcast %42 : vector<16x16x1xf32> to vector<16x16x16xf32>
    %44 = arith.subf %40, %43 : vector<16x16x16xf32>
    %45 = math.exp %44 : vector<16x16x16xf32>
    %cst_15 = arith.constant dense<0.000000e+00> : vector<16x16xf32>
    %46 = vector.multi_reduction <add>, %45, %cst_15 [2] : vector<16x16x16xf32> to vector<16x16xf32>
    %47 = vector.shape_cast %46 : vector<16x16xf32> to vector<16x16x1xf32>
    %48 = tpu.reciprocal %47 {approx = true} : vector<16x16x1xf32> -> vector<16x16x1xf32>
    %49 = vector.broadcast %48 : vector<16x16x1xf32> to vector<16x16x16xf32>
    %50 = arith.mulf %45, %49 : vector<16x16x16xf32>
    "tpu.trace_start"() <{level = 10 : i32, message = "bij,bjh->bih"}> : () -> ()
    %cst_16 = arith.constant dense<0.000000e+00> : vector<16x16x128xf32>
    %51 = tpu.matmul %50, %38, %cst_16 {dimension_numbers = #tpu.dot_dimension_numbers<[2], [1], [1], [2], [0, 0, 0, 1, 1, 2], [0], [0]>} : vector<16x16x16xf32>, vector<16x16x128xf32>, vector<16x16x128xf32> -> vector<16x16x128xf32>
    "tpu.trace_stop"() : () -> ()
    %52 = vector.shape_cast %51 : vector<16x16x128xf32> to vector<256x128xf32>
    %c0_17 = arith.constant 0 : index
    %c0_18 = arith.constant 0 : index
    %53 = vector.load %arg5[%c0_17, %c0_18] : memref<128x128xf32, #tpu.memory_space<vmem>>, vector<128x128xf32>
    %cst_19 = arith.constant dense<0.000000e+00> : vector<256x128xf32>
    %54 = tpu.matmul %52, %53, %cst_19 {dimension_numbers = #tpu.dot_dimension_numbers<[1], [0], [0], [1], [0, 0, 1, 1], [], []>} : vector<256x128xf32>, vector<128x128xf32>, vector<256x128xf32> -> vector<256x128xf32>
    %55 = arith.addf %37, %54 : vector<256x128xf32>
    %56 = arith.negf %55 : vector<256x128xf32>
    %57 = math.exp %56 : vector<256x128xf32>
    %cst_20 = arith.constant 1.000000e+00 : f32
    %58 = vector.broadcast %cst_20 : f32 to vector<256x128xf32>
    %59 = arith.addf %58, %57 : vector<256x128xf32>
    %60 = arith.divf %58, %59 : vector<256x128xf32>
    %61 = arith.mulf %60, %33 : vector<256x128xf32>
    %62 = vector.shape_cast %61 : vector<256x128xf32> to vector<16x16x128xf32>
    %c0_21 = arith.constant 0 : index
    %c0_22 = arith.constant 0 : index
    %c0_23 = arith.constant 0 : index
    %63 = vector.load %arg6[%c0_21, %c0_22, %c0_23] : memref<16x16x128xf32, #tpu.memory_space<vmem>>, vector<16x16x128xf32>
    tpu.vector_store %arg6[%c0_21, %c0_22, %c0_23], %62 {strides = array<i32>} : memref<16x16x128xf32, #tpu.memory_space<vmem>>, vector<16x16x128xf32>,
    %cst_24 = arith.constant dense<0.000000e+00> : vector<16x128xf32>
    %64 = vector.multi_reduction <add>, %62, %cst_24 [1] : vector<16x16x128xf32> to vector<16x128xf32>
    %cst_25 = arith.constant 1.600000e+01 : f32
    %65 = vector.broadcast %cst_25 : f32 to vector<16x128xf32>
    %66 = arith.divf %64, %65 : vector<16x128xf32>
    %c0_26 = arith.constant 0 : index
    %c0_27 = arith.constant 0 : index
    %67 = vector.load %arg7[%c0_26, %c0_27] : memref<16x128xf32, #tpu.memory_space<vmem>>, vector<16x128xf32>
    tpu.vector_store %arg7[%c0_26, %c0_27], %66 {strides = array<i32>} : memref<16x128xf32, #tpu.memory_space<vmem>>, vector<16x128xf32>,
    return
  }
  func.func @transform_0(%arg0: i32) -> (i32, i32) {
    %c0_i32 = arith.constant 0 : i32
    %c0_i32_0 = arith.constant 0 : i32
    return %arg0, %c0_i32 : i32, i32
  }
  func.func @transform_1(%arg0: i32) -> (i32, i32) {
    %c0_i32 = arith.constant 0 : i32
    %c0_i32_0 = arith.constant 0 : i32
    %c0_i32_1 = arith.constant 0 : i32
    return %c0_i32, %c0_i32_0 : i32, i32
  }
  func.func @transform_2(%arg0: i32) -> (i32, i32) {
    %c0_i32 = arith.constant 0 : i32
    %c0_i32_0 = arith.constant 0 : i32
    %c0_i32_1 = arith.constant 0 : i32
    return %c0_i32, %c0_i32_0 : i32, i32
  }
  func.func @transform_3(%arg0: i32) -> (i32, i32) {
    %c0_i32 = arith.constant 0 : i32
    %c0_i32_0 = arith.constant 0 : i32
    %c0_i32_1 = arith.constant 0 : i32
    return %c0_i32, %c0_i32_0 : i32, i32
  }
  func.func @transform_4(%arg0: i32) -> (i32, i32) {
    %c0_i32 = arith.constant 0 : i32
    %c0_i32_0 = arith.constant 0 : i32
    %c0_i32_1 = arith.constant 0 : i32
    return %c0_i32, %c0_i32_0 : i32, i32
  }
  func.func @transform_5(%arg0: i32) -> (i32, i32, i32) {
    %c0_i32 = arith.constant 0 : i32
    %c0_i32_0 = arith.constant 0 : i32
    %c0_i32_1 = arith.constant 0 : i32
    return %arg0, %c0_i32, %c0_i32_0 : i32, i32, i32
  }
  func.func @transform_6(%arg0: i32) -> (i32, i32) {
    %c0_i32 = arith.constant 0 : i32
    %c0_i32_0 = arith.constant 0 : i32
    return %arg0, %c0_i32 : i32, i32
  }
}

</mosaic_0001>

<bundles_post_ra>
// kernel: tpu_custom_call.1
= control target key start
LH: loop header
LB: loop body
LE: loop exit
PB: predicated region body
PF: predicated region fallthrough
CT: control target
= control target key end

     0   :  { %12 = vsyncpa [#allocation3], 0  ;;  %s9125_s0 = inlined_call_operand.vmem [shape: s32[256,4], index: 0, kind: input, shape index: {}]   ;;  %s9126_s1 = inlined_call_operand.vmem [shape: f32[256,128], index: 1, kind: input, shape index: {}]   ;;  %s9127_s2 = inlined_call_operand.vmem [shape: f32[1,128], index: 2, kind: input, shape index: {}]   ;;  %s9128_s3 = inlined_call_operand.hbm [shape: f32[128,256], index: 3, kind: input, shape index: {}]   ;;  %s9129_s4 = inlined_call_operand.hbm [shape: f32[128,128], index: 4, kind: input, shape index: {}]   ;;  %s9130_s5 = inlined_call_operand.hbm [shape: f32[16,16,128], index: 5, kind: output, shape index: {0}]   ;;  %s9131_s6 = inlined_call_operand.hbm [shape: f32[16,128], index: 6, kind: output, shape index: {1}]  }
   0x1   :  { %13 = vsyncpa [#allocation6], 0 }
   0x2   :  { %14 = vsyncpa [#allocation4], 0 }
   0x3   :  { %15 = vsyncpa [#allocation9], 0  ;;  %s6953_s21 = smov [#allocation2]  }
   0x4   :  { %s27_s22 = sshll.u32 %s6953_s21, 4  ;;  %s28_s22 = int_to_ptr.vmem [resolvable:$true] %s27_s22 }
   0x5   :  { %s6873_s23 = scalar_lea.vmem %s28_s22, 4096  ;;  %p6878_p1 = scmp.lt.s32.totalorder %s28_s22, %s28_s22 }
   0x6   :  { %p6874_p0 = scmp.ne.s32.totalorder %s28_s22, %s6873_s23  ;;  %p6879_p2 = scmp.lt.s32.totalorder %s6873_s23, %s6873_s23 }
   0x8   :  { %p6880_p3 = por %p6879_p2, %p6878_p1 }
   0xa   :  { %p6881_p4 = pnand %p6880_p3, %p6874_p0 }
   0xc   :  { %6884 = shalt.err (!%p6881_p4)
}
   0xd   :  { %s6954_s24 = smov 256   ;;  %s6955_s25 = smov 16  }
   0xe   :  { %33 = dma.hbm_to_vmem [thread:$0]  %s9128_s3, 4096, %s28_s22, [#allocation3], %s6954_s24, %s6954_s24, %s6955_s25  }
   0xf   :  { %s6956_s28 = smov [#allocation5]  }
  0x10   :  { %s39_s29 = sshll.u32 %s6956_s28, 4  ;;  %s40_s29 = int_to_ptr.vmem [resolvable:$true] %s39_s29 }
  0x11   :  { %s6893_s30 = scalar_lea.vmem %s40_s29, 2048  ;;  %p6898_p6 = scmp.lt.s32.totalorder %s40_s29, %s40_s29 }
  0x12   :  { %p6894_p5 = scmp.ne.s32.totalorder %s40_s29, %s6893_s30  ;;  %p6899_p7 = scmp.lt.s32.totalorder %s6893_s30, %s6893_s30 }
  0x14   :  { %p6900_p8 = por %p6899_p7, %p6898_p6 }
  0x16   :  { %p6901_p9 = pnand %p6900_p8, %p6894_p5 }
  0x18   :  { %6904 = shalt.err (!%p6901_p9)
}
  0x19   :  { %s6957_s7 = smov 128   ;;  %s6958_s8 = smov 8  }
  0x1a   :  { %45 = dma.hbm_to_vmem [thread:$0]  %s9129_s4, 2048, %s40_s29, [#allocation6], %s6957_s7, %s6957_s7, %s6958_s8  }
  0x1b   :  { %6945 = dma.done.wait [#allocation3], 4096  }
  0x1c   :  { %6946 = vsyncadd [#allocation3], 4294963200 }
  0x1d   :  { %6947 = dma.done.wait [#allocation6], 2048  }
  0x1e   :  { %6948 = vsyncadd [#allocation6], 4294965248  ;;  %v6959_v0 = vmov 2   ;;  %v6960_v1 = vmov 0.0   ;;  %v7017_v2 = vld [vmem:[%s9125_s0 + $0x18] sm:$0xff]  ;;  %v7022_v3 = vld [vmem:[%s9125_s0] sm:$0xff] }
  0x1f   :  { %6517 = vset.pattern.permute.xlu0 %v6959_v0  ;;  %6508 = vset.pattern.permute.xlu1 %v6959_v0  ;;  %v7029_v4 = vld [vmem:[%s9125_s0 + $0x30] sm:$0xff]  ;;  %v56_v5 = vld [vmem:[%s9125_s0 + $0x8] sm:$0xff]  ;;  %v6961_v6 = vmov 0   ;;  %v1446_v7 = vld [vmem:[%s9126_s1 + $0x78] sm:$0xff]  ;;  %v6962_v9 = vmov 3   ;;  %v6963_v11 = vmov 1  }
  0x20   :  { %1470 = vmatprep.subr.mxu0 %v6960_v1  ;;  %1887 = vmatprep.mubr.f32.mxu1 %v6960_v1  ;;  %v1445_v8 = vld [vmem:[%s9126_s1 + $0x70] sm:$0xff]  ;;  %v1444_v10 = vld [vmem:[%s9126_s1 + $0x68] sm:$0xff]  ;;  %v1443_v12 = vld [vmem:[%s9126_s1 + $0x60] sm:$0xff] }
  0x21   :  { %737 = vperm.xlu0 %6517, %v7017_v2   ;;  %728 = vperm.xlu1 %6508, %v7022_v3   ;;  %v1442_v13 = vld [vmem:[%s9126_s1 + $0x58] sm:$0xff]  ;;  %v1441_v14 = vld [vmem:[%s9126_s1 + $0x50] sm:$0xff]  ;;  %v1440_v15 = vld [vmem:[%s9126_s1 + $0x48] sm:$0xff] }
  0x22   :  { %1471 = vmatpush1.msra.mxu0 %v1446_v7  ;;  %v57_v16 = vld [vmem:[%s9125_s0 + $0x10] sm:$0xff]  ;;  %v7074_v17 = vld [vmem:[%s9125_s0 + $0x48] sm:$0xff]  ;;  %v1439_v18 = vld [vmem:[%s9126_s1 + $0x40] sm:$0xff] }
  0x23   :  { %1472 = vmatprep.subr.mxu0 %v6960_v1  ;;  %v1438_v19 = vld [vmem:[%s9126_s1 + $0x38] sm:$0xff]  ;;  %v7089_v20 = vld [vmem:[%s9125_s0 + $0x60] sm:$0xff]  ;;  %v1437_v21 = vld [vmem:[%s9126_s1 + $0x30] sm:$0xff] }
  0x24   :  { %1473 = vmatpush1.msra.mxu0 %v1445_v8  ;;  %v1436_v22 = vld [vmem:[%s9126_s1 + $0x28] sm:$0xff]  ;;  %v1435_v23 = vld [vmem:[%s9126_s1 + $0x20] sm:$0xff]  ;;  %v1434_v24 = vld [vmem:[%s9126_s1 + $0x18] sm:$0xff] }
  0x25   :  { %746 = vperm.xlu0 %6517, %v7029_v4   ;;  %6509 = vset.pattern.permute.xlu1 %v6961_v6  ;;  %v1433_v25 = vld [vmem:[%s9126_s1 + $0x10] sm:$0xff]  ;;  %v7121_v26 = vld [vmem:[%s9125_s0 + $0x28] sm:$0xff]  ;;  %v1431_v28 = vld [vmem:[%s9126_s1] sm:$0xff] }
  0x26   :  { %91 = vperm.xlu1 %6509, %v56_v5   ;;  %1474 = vmatprep.subr.mxu0 %v6960_v1  ;;  %v1432_v27 = vld [vmem:[%s9126_s1 + $0x8] sm:$0xff]  ;;  %v7136_v29 = vld [vmem:[%s9125_s0 + $0x40] sm:$0xff]  ;;  %v1462_v30 = vld [vmem:[%s9126_s1 + $0xf8] sm:$0xff] }
  0x27   :  { %1475 = vmatpush1.msra.mxu0 %v1444_v10  ;;  %v59_v31 = vld [vmem:[%s9125_s0 + $0x20] sm:$0xff]  ;;  %v1461_v32 = vld [vmem:[%s9126_s1 + $0xf0] sm:$0xff]  ;;  %v7153_v33 = vld [vmem:[%s9125_s0 + $0x58] sm:$0xff] }
  0x28   :  { %1476 = vmatprep.subr.mxu0 %v6960_v1  ;;  %v1460_v34 = vld [vmem:[%s9126_s1 + $0xe8] sm:$0xff]  ;;  %v1459_v35 = vld [vmem:[%s9126_s1 + $0xe0] sm:$0xff]  ;;  %v7168_v36 = vld [vmem:[%s9125_s0 + $0x70] sm:$0xff] }
  0x29   :  { %6526 = vset.pattern.permute.xlu0 %v6962_v9  ;;  %1477 = vmatpush1.msra.mxu0 %v1443_v12  ;;  %v1458_v37 = vld [vmem:[%s9126_s1 + $0xd8] sm:$0xff]  ;;  %v7179_v38 = vld [vmem:[%s9125_s0 + $0x88] sm:$0xff]  ;;  %v1457_v39 = vld [vmem:[%s9126_s1 + $0xd0] sm:$0xff] }
  0x2a   :  { %1080 = vperm.xlu0 %6526, %v7022_v3   ;;  %6510 = vset.pattern.permute.xlu1 %v6963_v11  ;;  %v1456_v40 = vld [vmem:[%s9126_s1 + $0xc8] sm:$0xff]  ;;  %v7194_v41 = vld [vmem:[%s9125_s0 + $0xa0] sm:$0xff]  ;;  %v1454_v43 = vld [vmem:[%s9126_s1 + $0xb8] sm:$0xff] }
  0x2b   :  { %379 = vperm.xlu1 %6510, %v56_v5   ;;  %1478 = vmatprep.subr.mxu0 %v6960_v1  ;;  %v1455_v42 = vld [vmem:[%s9126_s1 + $0xc0] sm:$0xff]  ;;  %v1453_v44 = vld [vmem:[%s9126_s1 + $0xb0] sm:$0xff]  ;;  %v1452_v45 = vld [vmem:[%s9126_s1 + $0xa8] sm:$0xff] }
  0x2c   :  { %1479 = vmatpush1.msra.mxu0 %v1442_v13  ;;  %v1451_v46 = vld [vmem:[%s9126_s1 + $0xa0] sm:$0xff]  ;;  %v1450_v47 = vld [vmem:[%s9126_s1 + $0x98] sm:$0xff]  ;;  %v1449_v48 = vld [vmem:[%s9126_s1 + $0x90] sm:$0xff] }
  0x2d   :  { %1480 = vmatprep.subr.mxu0 %v6960_v1  ;;  %v1448_v49 = vld [vmem:[%s9126_s1 + $0x88] sm:$0xff]  ;;  %v1447_v50 = vld [vmem:[%s9126_s1 + $0x80] sm:$0xff]  ;;  %v7252_v51 = vld [vmem:[%s9125_s0 + $0x78] sm:$0xff] }
  0x2e   :  { %1089 = vperm.xlu0 %6526, %v7017_v2   ;;  %1481 = vmatpush1.msra.mxu0 %v1441_v14  ;;  %v62_v52 = vld [vmem:[%s9125_s0 + $0x38] sm:$0xff]  ;;  %v7262_v53 = vld [vmem:[%s9125_s0 + $0x90] sm:$0xff]  ;;  %v7268_v54 = vld [vmem:[%s9125_s0 + $0xa8] sm:$0xff] }
  0x2f   :  { %6511 = vset.pattern.permute.xlu1 %v6959_v0  ;;  %1482 = vmatprep.subr.mxu0 %v6960_v1  ;;  %v79_v55 = vld [vmem:[%s9125_s0 + $0xc0] sm:$0xff]  ;;  %v65_v56 = vld [vmem:[%s9125_s0 + $0x50] sm:$0xff]  ;;  %v7297_v57 = vld [vmem:[%s9125_s0 + $0xd8] sm:$0xff] }
  0x30   :  { %731 = vperm.xlu1 %6511, %v56_v5   ;;  %1483 = vmatpush1.msra.mxu0 %v1440_v15 }
  0x31   :  { %1484 = vmatprep.subr.mxu0 %v6960_v1 }
  0x32   :  { %1098 = vperm.xlu0 %6526, %v7029_v4   ;;  %1485 = vmatpush1.msra.mxu0 %v1439_v18 }
  0x33   :  { %1486 = vmatprep.subr.mxu0 %v6960_v1 }
  0x34   :  { %6512 = vset.pattern.permute.xlu1 %v6961_v6  ;;  %1487 = vmatpush1.msra.mxu0 %v1438_v19  ;;  %v52_v19 = vlaneseq }
  0x35   :  { %94 = vperm.xlu1 %6512, %v57_v16   ;;  %1488 = vmatprep.subr.mxu0 %v6960_v1 }
  0x36   :  { %1107 = vperm.xlu0 %6526, %v7074_v17   ;;  %1489 = vmatpush1.msra.mxu0 %v1437_v21  ;;  %v7365_v21 = vand.u32 127, %v52_v19 }
  0x37   :  { %1490 = vmatprep.subr.mxu0 %v6960_v1 }
  0x38   :  { %1491 = vmatpush1.msra.mxu0 %v1436_v22 }
  0x39   :  { %6513 = vset.pattern.permute.xlu1 %v6962_v9  ;;  %1492 = vmatprep.subr.mxu0 %v6960_v1 }
  0x3a   :  { %1116 = vperm.xlu0 %6526, %v7089_v20   ;;  %1083 = vperm.xlu1 %6513, %v56_v5  }
  0x3b   :  { %1493 = vmatpush1.msra.mxu0 %v1435_v23 }
  0x3c   :  { %1494 = vmatprep.subr.mxu0 %v6960_v1 }
  0x3d   :  { %1495 = vmatpush1.msra.mxu0 %v1434_v24  ;;  %v7374_v24 = vadd.s32 128, %v7365_v21 }
  0x3e   :  { %6545 = vset.pattern.permute.xlu0 %v6963_v11  ;;  %6514 = vset.pattern.permute.xlu1 %v6959_v0 }
  0x3f   :  { %376 = vperm.xlu0 %6545, %v7022_v3   ;;  %734 = vperm.xlu1 %6514, %v57_v16  }
  0x40   :  { %1496 = vmatprep.subr.mxu0 %v6960_v1 }
  0x41   :  { %1497 = vmatpush1.msra.mxu0 %v1433_v25 }
  0x42   :  { %1498 = vmatprep.subr.mxu0 %v6960_v1 }
  0x43   :  { %382 = vperm.xlu0 %6545, %v57_v16   ;;  %6515 = vset.pattern.permute.xlu1 %v6963_v11 }
  0x44   :  { %385 = vperm.xlu1 %6515, %v7017_v2   ;;  %1499 = vmatpush1.msra.mxu0 %v1432_v27  ;;  %v7383_v27 = vld [vmem:[%s9125_s0 + $0xb8] sm:$0xff] }
  0x45   :  { %1500 = vmatprep.subr.mxu0 %v6960_v1 }
  0x46   :  { %1501 = vmatpush1.msra.mxu0 %v1431_v28 }
  0x47   :  { %391 = vperm.xlu0 %6545, %v7121_v26   ;;  %1502 = vmatprep.subr.mxu0 %v6960_v1 }
  0x48   :  { %6516 = vset.pattern.permute.xlu1 %v6962_v9  ;;  %1503 = vmatpush2.msra.mxu0 %v1462_v30 }
  0x49   :  { %1086 = vperm.xlu1 %6516, %v57_v16   ;;  %1504 = vmatprep.subr.mxu0 %v6960_v1 }
  0x4a   :  { %1505 = vmatpush2.msra.mxu0 %v1461_v32 }
  0x4b   :  { %400 = vperm.xlu0 %6545, %v7136_v29   ;;  %1506 = vmatprep.subr.mxu0 %v6960_v1 }
  0x4c   :  { %1507 = vmatpush2.msra.mxu0 %v1460_v34 }
  0x4d   :  { %6518 = vset.pattern.permute.xlu1 %v6961_v6  ;;  %1508 = vmatprep.subr.mxu0 %v6960_v1 }
  0x4e   :  { %100 = vperm.xlu1 %6518, %v59_v31   ;;  %1509 = vmatpush2.msra.mxu0 %v1459_v35 }
  0x4f   :  { %409 = vperm.xlu0 %6545, %v7153_v33   ;;  %1510 = vmatprep.subr.mxu0 %v6960_v1 }
  0x50   :  { %1511 = vmatpush2.msra.mxu0 %v1458_v37 }
  0x51   :  { %1512 = vmatprep.subr.mxu0 %v6960_v1 }
  0x52   :  { %6519 = vset.pattern.permute.xlu1 %v6963_v11  ;;  %1513 = vmatpush2.msra.mxu0 %v1457_v39 }
  0x53   :  { %418 = vperm.xlu0 %6545, %v7168_v36   ;;  %388 = vperm.xlu1 %6519, %v59_v31  }
  0x54   :  { %1514 = vmatprep.subr.mxu0 %v6960_v1 }
  0x55   :  { %1515 = vmatpush2.msra.mxu0 %v1456_v40 }
  0x56   :  { %1516 = vmatprep.subr.mxu0 %v6960_v1 }
  0x57   :  { %427 = vperm.xlu0 %6545, %v7179_v38   ;;  %6520 = vset.pattern.permute.xlu1 %v6959_v0 }
  0x58   :  { %740 = vperm.xlu1 %6520, %v59_v31   ;;  %1517 = vmatpush2.msra.mxu0 %v1455_v42 }
  0x59   :  { %1518 = vmatprep.subr.mxu0 %v6960_v1 }
  0x5a   :  { %1519 = vmatpush2.msra.mxu0 %v1454_v43 }
  0x5b   :  { %436 = vperm.xlu0 %6545, %v7194_v41   ;;  %1520 = vmatprep.subr.mxu0 %v6960_v1 }
  0x5c   :  { %6521 = vset.pattern.permute.xlu1 %v6961_v6  ;;  %1521 = vmatpush2.msra.mxu0 %v1453_v44 }
  0x5d   :  { %103 = vperm.xlu1 %6521, %v7121_v26   ;;  %1522 = vmatprep.subr.mxu0 %v6960_v1 }
  0x5e   :  { %1523 = vmatpush2.msra.mxu0 %v1452_v45 }
  0x5f   :  { %6564 = vset.pattern.permute.xlu0 %v6961_v6  ;;  %1524 = vmatprep.subr.mxu0 %v6960_v1 }
  0x60   :  { %88 = vperm.xlu0 %6564, %v7022_v3   ;;  %1525 = vmatpush2.msra.mxu0 %v1451_v46 }
  0x61   :  { %6522 = vset.pattern.permute.xlu1 %v6962_v9  ;;  %1526 = vmatprep.subr.mxu0 %v6960_v1 }
  0x62   :  { %1092 = vperm.xlu1 %6522, %v59_v31   ;;  %1527 = vmatpush2.msra.mxu0 %v1450_v47 }
  0x63   :  { %1528 = vmatprep.subr.mxu0 %v6960_v1 }
  0x64   :  { %97 = vperm.xlu0 %6564, %v7017_v2   ;;  %1529 = vmatpush2.msra.mxu0 %v1449_v48 }
  0x65   :  { %1530 = vmatprep.subr.mxu0 %v6960_v1 }
  0x66   :  { %6523 = vset.pattern.permute.xlu1 %v6959_v0  ;;  %1531 = vmatpush2.msra.mxu0 %v1448_v49 }
  0x67   :  { %743 = vperm.xlu1 %6523, %v7121_v26   ;;  %1532 = vmatprep.subr.mxu0 %v6960_v1 }
  0x68   :  { %106 = vperm.xlu0 %6564, %v7029_v4   ;;  %1533 = vmatpush2.msra.mxu0 %v1447_v50 }
  0x6b   :  { %6524 = vset.pattern.permute.xlu1 %v6963_v11 }
  0x6c   :  { %394 = vperm.xlu1 %6524, %v7029_v4   ;;  %115 = vperm.xlu0 %6564, %v7074_v17  }
  0x70   :  { %6525 = vset.pattern.permute.xlu1 %v6962_v9  ;;  %124 = vperm.xlu0 %6564, %v7089_v20  }
  0x71   :  { %1095 = vperm.xlu1 %6525, %v7121_v26  }
  0x74   :  { %133 = vperm.xlu0 %6564, %v7252_v51  }
  0x75   :  { %6527 = vset.pattern.permute.xlu1 %v6961_v6 }
  0x76   :  { %109 = vperm.xlu1 %6527, %v62_v52  }
  0x78   :  { %142 = vperm.xlu0 %6564, %v7262_v53  }
  0x7a   :  { %6528 = vset.pattern.permute.xlu1 %v6963_v11 }
  0x7b   :  { %397 = vperm.xlu1 %6528, %v62_v52  }
  0x7c   :  { %151 = vperm.xlu0 %6564, %v7268_v54  }
  0x7f   :  { %6529 = vset.pattern.permute.xlu1 %v6959_v0 }
  0x80   :  { %749 = vperm.xlu1 %6529, %v62_v52   ;;  %160 = vperm.xlu0 %6564, %v79_v55  }
  0x84   :  { %6530 = vset.pattern.permute.xlu1 %v6961_v6  ;;  %6575 = vset.pattern.permute.xlu0 %v6959_v0 }
  0x85   :  { %112 = vperm.xlu1 %6530, %v7136_v29   ;;  %755 = vperm.xlu0 %6575, %v7074_v17  }
  0x89   :  { %6531 = vset.pattern.permute.xlu1 %v6962_v9  ;;  %764 = vperm.xlu0 %6575, %v7089_v20  }
  0x8a   :  { %1101 = vperm.xlu1 %6531, %v62_v52  }
  0x8d   :  { %773 = vperm.xlu0 %6575, %v7252_v51  }
  0x8e   :  { %6532 = vset.pattern.permute.xlu1 %v6959_v0 }
  0x8f   :  { %752 = vperm.xlu1 %6532, %v7136_v29  }
  0x91   :  { %782 = vperm.xlu0 %6575, %v7262_v53  }
  0x93   :  { %6533 = vset.pattern.permute.xlu1 %v6963_v11 }
  0x94   :  { %403 = vperm.xlu1 %6533, %v7074_v17   ;;  %v7357_v17 = vld [vmem:[%s9125_s0 + $0x68] sm:$0xff] }
  0x95   :  { %791 = vperm.xlu0 %6575, %v7268_v54  }
  0x98   :  { %6534 = vset.pattern.permute.xlu1 %v6962_v9 }
  0x99   :  { %1104 = vperm.xlu1 %6534, %v7136_v29   ;;  %800 = vperm.xlu0 %6575, %v79_v55  }
  0x9c   :  { %v7299_v58 = vpop.permute.xlu1 %728  ;;  %v7301_v59 = vpop.permute.xlu0 %737 }
  0x9d   :  { %6535 = vset.pattern.permute.xlu1 %v6961_v6  ;;  %809 = vperm.xlu0 %6575, %v7297_v57   ;;  %vm823_vm1 = vcmp.eq.s32.totalorder %v7365_v21, %v7299_v58  ;;  %vm829_vm2 = vcmp.eq.s32.totalorder %v7365_v21, %v7301_v59  ;;  %vm824_vm3 = vcmp.eq.s32.totalorder %v7374_v24, %v7299_v58 }
  0x9e   :  { %118 = vperm.xlu1 %6535, %v65_v56   ;;  %vm830_vm4 = vcmp.eq.s32.totalorder %v7374_v24, %v7301_v59  ;;  %v7410_v30 = vsel %vm823_vm1, 1.0, %v6960_v1  ;;  %v7413_v31 = vsel %vm829_vm2, 1.0, %v6960_v1  ;;  %v5791_v37 = vsel %vm824_vm3, 1.0, %v6960_v1 }
  0xa0   :  { %v7305_v60 = vpop.permute.xlu0 %746 }
  0xa1   :  { %v7307_v61 = vpop.permute.xlu1 %91  ;;  %6586 = vset.pattern.permute.xlu0 %v6962_v9 }
  0xa2   :  { %6536 = vset.pattern.permute.xlu1 %v6963_v11  ;;  %1125 = vperm.xlu0 %6586, %v7252_v51   ;;  %vm185_vm5 = vcmp.eq.s32.totalorder %v7365_v21, %v7307_v61  ;;  %vm186_vm7 = vcmp.eq.s32.totalorder %v7374_v24, %v7307_v61 }
  0xa3   :  { %406 = vperm.xlu1 %6536, %v65_v56   ;;  %v5664_v34 = vsel %vm185_vm5, 1.0, %v6960_v1  ;;  %v5665_v39 = vsel %vm186_vm7, 1.0, %v6960_v1 }
  0xa5   :  { %v7312_v62 = vpop.permute.xlu0 %1080 }
  0xa6   :  { %v7314_v63 = vpop.permute.xlu1 %379  ;;  %1134 = vperm.xlu0 %6586, %v7262_v53   ;;  %vm1175_vm8 = vcmp.eq.s32.totalorder %v7365_v21, %v7312_v62  ;;  %vm1176_vm11 = vcmp.eq.s32.totalorder %v7374_v24, %v7312_v62 }
  0xa7   :  { %6537 = vset.pattern.permute.xlu1 %v6959_v0  ;;  %vm473_vm0 = vcmp.eq.s32.totalorder %v7365_v21, %v7314_v63  ;;  %vm474_vm6 = vcmp.eq.s32.totalorder %v7374_v24, %v7314_v63  ;;  %v7433_v40 = vsel %vm1175_vm8, 1.0, %v6960_v1  ;;  %v5855_v48 = vsel %vm1176_vm11, 1.0, %v6960_v1 }
  0xa8   :  { %758 = vperm.xlu1 %6537, %v65_v56   ;;  %v5728_v28 = vsel %vm473_vm0, 1.0, %v6960_v1  ;;  %v5729_v35 = vsel %vm474_vm6, 1.0, %v6960_v1 }
  0xa9   :  { %v7318_v2 = vpop.permute.xlu0 %1089  ;;  %v665_v42 = vadd.f32 %v5728_v28, %v5664_v34  ;;  %v666_v46 = vadd.f32 %v5729_v35, %v5665_v39 }
  0xaa   :  { %1143 = vperm.xlu0 %6586, %v7268_v54   ;;  %vm1181_vm12 = vcmp.eq.s32.totalorder %v7365_v21, %v7318_v2  ;;  %vm1182_vm13 = vcmp.eq.s32.totalorder %v7374_v24, %v7318_v2 }
  0xab   :  { %v7320_v3 = vpop.permute.xlu1 %731  ;;  %v7462_v49 = vsel %vm1181_vm12, 1.0, %v6960_v1  ;;  %v7465_v50 = vsel %vm1182_vm13, 1.0, %v6960_v1 }
  0xac   :  { %6538 = vset.pattern.permute.xlu1 %v6961_v6  ;;  %vm825_vm9 = vcmp.eq.s32.totalorder %v7365_v21, %v7320_v3  ;;  %vm826_vm10 = vcmp.eq.s32.totalorder %v7374_v24, %v7320_v3 }
  0xad   :  { %121 = vperm.xlu1 %6538, %v7153_v33   ;;  %v7325_v4 = vpop.permute.xlu0 %1098  ;;  %v5792_v43 = vsel %vm825_vm9, 1.0, %v6960_v1  ;;  %v5793_v44 = vsel %vm826_vm10, 1.0, %v6960_v1 }
  0xae   :  { %1152 = vperm.xlu0 %6586, %v79_v55   ;;  %v1017_v52 = vadd.f32 %v5792_v43, %v665_v42  ;;  %v1018_v55 = vadd.f32 %v5793_v44, %v666_v46 }
  0xb0   :  { %v7327_v5 = vpop.permute.xlu1 %94 }
  0xb1   :  { %6539 = vset.pattern.permute.xlu1 %v6962_v9  ;;  %v7330_v7 = vpop.permute.xlu0 %1107  ;;  %vm187_vm14 = vcmp.eq.s32.totalorder %v7365_v21, %v7327_v5  ;;  %vm188_vm15 = vcmp.eq.s32.totalorder %v7374_v24, %v7327_v5 }
  0xb2   :  { %1110 = vperm.xlu1 %6539, %v65_v56   ;;  %1161 = vperm.xlu0 %6586, %v7297_v57   ;;  %v5666_v56 = vsel %vm187_vm14, 1.0, %v6960_v1  ;;  %v5667_v58 = vsel %vm188_vm15, 1.0, %v6960_v1 }
  0xb5   :  { %v7333_v8 = vpop.permute.xlu1 %1083  ;;  %v7335_v10 = vpop.permute.xlu0 %1116 }
  0xb6   :  { %6540 = vset.pattern.permute.xlu1 %v6959_v0  ;;  %6589 = vset.pattern.permute.xlu0 %v6963_v11  ;;  %vm1178_vm0 = vcmp.eq.s32.totalorder %v7374_v24, %v7333_v8  ;;  %vm1177_vm1 = vcmp.eq.s32.totalorder %v7365_v21, %v7333_v8 }
  0xb7   :  { %761 = vperm.xlu1 %6540, %v7153_v33   ;;  %445 = vperm.xlu0 %6589, %v7383_v27   ;;  %v5857_v59 = vsel %vm1178_vm0, 1.0, %v6960_v1  ;;  %v5856_v61 = vsel %vm1177_vm1, 1.0, %v6960_v1 }
  0xba   :  { %v7340_v12 = vpop.permute.xlu0 %376  ;;  %v7342_v13 = vpop.permute.xlu1 %734 }
  0xbb   :  { %6541 = vset.pattern.permute.xlu1 %v6963_v11  ;;  %vm471_vm2 = vcmp.eq.s32.totalorder %v7365_v21, %v7340_v12  ;;  %vm472_vm3 = vcmp.eq.s32.totalorder %v7374_v24, %v7340_v12  ;;  %vm827_vm6 = vcmp.eq.s32.totalorder %v7365_v21, %v7342_v13  ;;  %vm828_vm7 = vcmp.eq.s32.totalorder %v7374_v24, %v7342_v13 }
  0xbc   :  { %412 = vperm.xlu1 %6541, %v7089_v20   ;;  %v5726_v62 = vsel %vm471_vm2, 1.0, %v6960_v1  ;;  %v5727_v63 = vsel %vm472_vm3, 1.0, %v6960_v1  ;;  %v1369_v13 = vadd.f32 %v5856_v61, %v1017_v52  ;;  %v5794_v34 = vsel %vm827_vm6, 1.0, %v6960_v1 }
  0xbd   :  { %v5795_v35 = vsel %vm828_vm7, 1.0, %v6960_v1 }
  0xbe   :  { %v7346_v14 = vpop.permute.xlu0 %382 }
  0xbf   :  { %v7348_v15 = vpop.permute.xlu1 %385  ;;  %vm476_vm5 = vcmp.eq.s32.totalorder %v7374_v24, %v7346_v14 }
  0xc0   :  { %6542 = vset.pattern.permute.xlu1 %v6962_v9  ;;  %vm477_vm10 = vcmp.eq.s32.totalorder %v7365_v21, %v7348_v15  ;;  %vm478_vm11 = vcmp.eq.s32.totalorder %v7374_v24, %v7348_v15 }
  0xc1   :  { %1113 = vperm.xlu1 %6542, %v7153_v33   ;;  %v7422_v33 = vsel %vm830_vm4, 1.0, %v6960_v1  ;;  %vm475_vm4 = vcmp.eq.s32.totalorder %v7365_v21, %v7346_v14  ;;  %v1370_v14 = vadd.f32 %v5857_v59, %v1018_v55  ;;  %v5732_v55 = vsel %vm477_vm10, 1.0, %v6960_v1 }
  0xc2   :  { %v7352_v16 = vpop.permute.xlu0 %391  ;;  %v5730_v3 = vsel %vm475_vm4, 1.0, %v6960_v1  ;;  %vm835_vm10 = vcmp.eq.s32.totalorder %v7365_v21, %v7305_v60 }
  0xc3   :  { %v667_v42 = vadd.f32 %v5730_v3, %v5666_v56  ;;  %vm481_vm15 = vcmp.eq.s32.totalorder %v7365_v21, %v7352_v16  ;;  %vm482_vm0 = vcmp.eq.s32.totalorder %v7374_v24, %v7352_v16 }
  0xc4   :  { %v7359_v18 = vpop.permute.xlu1 %1086  ;;  %v7533_v61 = vsel %vm481_vm15, 1.0, %v6960_v1 }
  0xc5   :  { %6543 = vset.pattern.permute.xlu1 %v6961_v6  ;;  %vm1180_vm13 = vcmp.eq.s32.totalorder %v7374_v24, %v7359_v18  ;;  %vm1179_vm1 = vcmp.eq.s32.totalorder %v7365_v21, %v7359_v18 }
  0xc6   :  { %127 = vperm.xlu1 %6543, %v7357_v17   ;;  %v7363_v20 = vpop.permute.xlu0 %400 }
  0xc9   :  { %v7367_v22 = vpop.permute.xlu1 %100 }
  0xca   :  { %6544 = vset.pattern.permute.xlu1 %v6963_v11  ;;  %v7370_v23 = vpop.permute.xlu0 %409  ;;  %vm191_vm4 = vcmp.eq.s32.totalorder %v7365_v21, %v7367_v22  ;;  %vm192_vm6 = vcmp.eq.s32.totalorder %v7374_v24, %v7367_v22 }
  0xcb   :  { %415 = vperm.xlu1 %6544, %v7357_v17  }
  0xce   :  { %v7376_v25 = vpop.permute.xlu1 %388  ;;  %v7378_v26 = vpop.permute.xlu0 %418 }
  0xcf   :  { %6546 = vset.pattern.permute.xlu1 %v6959_v0  ;;  %vm479_vm2 = vcmp.eq.s32.totalorder %v7365_v21, %v7376_v25  ;;  %vm480_vm3 = vcmp.eq.s32.totalorder %v7374_v24, %v7376_v25 }
  0xd0   :  { %767 = vperm.xlu1 %6546, %v7357_v17   ;;  %v5734_v3 = vsel %vm479_vm2, 1.0, %v6960_v1  ;;  %v5735_v16 = vsel %vm480_vm3, 1.0, %v6960_v1 }
  0xd2   :  { %v7407_v29 = vpop.permute.xlu0 %427 }
  0xd3   :  { %v7419_v32 = vpop.permute.xlu1 %740 }
  0xd4   :  { %6547 = vset.pattern.permute.xlu1 %v6961_v6  ;;  %vm831_vm7 = vcmp.eq.s32.totalorder %v7365_v21, %v7419_v32 }
  0xd5   :  { %130 = vperm.xlu1 %6547, %v7168_v36  }
  0xd6   :  { %v7444_v45 = vpop.permute.xlu0 %436 }
  0xd8   :  { %v7458_v47 = vpop.permute.xlu1 %103 }
  0xd9   :  { %6548 = vset.pattern.permute.xlu1 %v6962_v9 }
  0xda   :  { %1119 = vperm.xlu1 %6548, %v7357_v17   ;;  %v5731_v17 = vsel %vm476_vm5, 1.0, %v6960_v1  ;;  %vm836_vm5 = vcmp.eq.s32.totalorder %v7374_v24, %v7305_v60  ;;  %v7660_v60 = vld [vmem:[%s9125_s0 + $0xd0] sm:$0xff] }
  0xdb   :  { %v89_v2 = vpop.permute.xlu0 %88  ;;  %v668_v46 = vadd.f32 %v5731_v17, %v5667_v58  ;;  %v5670_v17 = vsel %vm191_vm4, 1.0, %v6960_v1  ;;  %454 = vperm.xlu0 %6589, %v7660_v60  }
  0xdc   :  { %vm183_vm8 = vcmp.eq.s32.totalorder %v7365_v21, %v89_v2  ;;  %vm184_vm9 = vcmp.eq.s32.totalorder %v7374_v24, %v89_v2  ;;  %v5858_v2 = vsel %vm1179_vm1, 1.0, %v6960_v1 }
  0xdd   :  { %v5662_v5 = vsel %vm183_vm8, 1.0, %v6960_v1  ;;  %v5663_v8 = vsel %vm184_vm9, 1.0, %v6960_v1  ;;  %v7488_v12 = vpop.permute.xlu1 %1092  ;;  %vm832_vm8 = vcmp.eq.s32.totalorder %v7374_v24, %v7419_v32  ;;  %vm194_vm9 = vcmp.eq.s32.totalorder %v7374_v24, %v7458_v47 }
  0xde   :  { %v663_v19 = vadd.f32 %v5726_v62, %v5662_v5  ;;  %6549 = vset.pattern.permute.xlu1 %v6959_v0  ;;  %v664_v28 = vadd.f32 %v5727_v63, %v5663_v8  ;;  %v1020_v62 = vadd.f32 %v5795_v35, %v668_v46  ;;  %v1019_v63 = vadd.f32 %v5794_v34, %v667_v42 }
  0xdf   :  { %v98_v39 = vpop.permute.xlu0 %97  ;;  %770 = vperm.xlu1 %6549, %v7168_v36   ;;  %v5799_v35 = vsel %vm832_vm8, 1.0, %v6960_v1  ;;  %vm1183_vm15 = vcmp.eq.s32.totalorder %v7365_v21, %v7488_v12 }
  0xe0   :  { %vm190_vm12 = vcmp.eq.s32.totalorder %v7374_v24, %v98_v39  ;;  %v1016_v43 = vadd.f32 %v5791_v37, %v664_v28  ;;  %v1015_v44 = vadd.f32 %v7410_v30, %v663_v19  ;;  %vm189_vm14 = vcmp.eq.s32.totalorder %v7365_v21, %v98_v39 }
  0xe1   :  { %v5669_v52 = vsel %vm190_vm12, 1.0, %v6960_v1  ;;  %v5733_v30 = vsel %vm478_vm11, 1.0, %v6960_v1  ;;  %v671_v19 = vadd.f32 %v5734_v3, %v5670_v17  ;;  %vm1184_vm11 = vcmp.eq.s32.totalorder %v7374_v24, %v7488_v12 }
  0xe2   :  { %v7508_v59 = vpop.permute.xlu1 %743  ;;  %v1368_v56 = vadd.f32 %v5855_v48, %v1016_v43  ;;  %v1367_v37 = vadd.f32 %v7433_v40, %v1015_v44  ;;  %v5859_v48 = vsel %vm1180_vm13, 1.0, %v6960_v1  ;;  %v5668_v40 = vsel %vm189_vm14, 1.0, %v6960_v1 }
  0xe3   :  { %6550 = vset.pattern.permute.xlu1 %v6963_v11  ;;  %v670_v15 = vadd.f32 %v5733_v30, %v5669_v52  ;;  %v7527_v58 = vpop.permute.xlu0 %106  ;;  %v669_v5 = vadd.f32 %v5732_v55, %v5668_v40  ;;  %v1372_v8 = vadd.f32 %v5859_v48, %v1020_v62  ;;  %v1371_v28 = vadd.f32 %v5858_v2, %v1019_v63 }
  0xe4   :  { %421 = vperm.xlu1 %6550, %v7252_v51   ;;  %1534 = vmatprep.mubr.f32.mxu0 %v1368_v56  ;;  %v5737_v51 = vsel %vm482_vm0, 1.0, %v6960_v1  ;;  %vm196_vm12 = vcmp.eq.s32.totalorder %v7374_v24, %v7527_v58  ;;  %vm193_vm14 = vcmp.eq.s32.totalorder %v7365_v21, %v7458_v47  ;;  %v5863_v32 = vsel %vm1184_vm11, 1.0, %v6960_v1 }
  0xe5   :  { %1535 = vmatmul.mubr.f32.vlgmr.msra.gmra.mxu0 %v1367_v37  ;;  %v1022_v22 = vadd.f32 %v7422_v33, %v670_v15  ;;  %v5798_v33 = vsel %vm831_vm7, 1.0, %v6960_v1  ;;  %v1021_v39 = vadd.f32 %v7413_v31, %v669_v5  ;;  %vm834_vm0 = vcmp.eq.s32.totalorder %v7374_v24, %v7508_v59 }
  0xe6   :  { %1539 = vmatprep.mubr.f32.mxu0 %v1370_v14  ;;  %v5671_v14 = vsel %vm192_vm6, 1.0, %v6960_v1  ;;  %vm195_vm1 = vcmp.eq.s32.totalorder %v7365_v21, %v7527_v58  ;;  %v5675_v44 = vsel %vm196_vm12, 1.0, %v6960_v1  ;;  %v5672_v52 = vsel %vm193_vm14, 1.0, %v6960_v1 }
  0xe7   :  { %v395_v18 = vpop.permute.xlu1 %394  ;;  %v7566_v25 = vpop.permute.xlu0 %115  ;;  %v672_v34 = vadd.f32 %v5735_v16, %v5671_v14  ;;  %v1374_v43 = vadd.f32 %v7465_v50, %v1022_v22  ;;  %v5862_v56 = vsel %vm1183_vm15, 1.0, %v6960_v1  ;;  %vm833_vm4 = vcmp.eq.s32.totalorder %v7365_v21, %v7508_v59 }
  0xe8   :  { %6551 = vset.pattern.permute.xlu1 %v6962_v9  ;;  %vm484_vm13 = vcmp.eq.s32.totalorder %v7374_v24, %v395_v18  ;;  %vm483_vm2 = vcmp.eq.s32.totalorder %v7365_v21, %v395_v18  ;;  %v5801_v47 = vsel %vm834_vm0, 1.0, %v6960_v1  ;;  %v1373_v37 = vadd.f32 %v7462_v49, %v1021_v39  ;;  %v7675_v39 = vld [vmem:[%s9125_s0 + $0xe8] sm:$0xff] }
  0xe9   :  { %1122 = vperm.xlu1 %6551, %v7168_v36   ;;  %1540 = vmatmul.mubr.f32.gmra.mxu0 %v1369_v13  ;;  %v5673_v36 = vsel %vm194_vm9, 1.0, %v6960_v1  ;;  %v7594_v13 = vld [vmem:[%s9125_s0 + $0x80] sm:$0xff]  ;;  %v5739_v31 = vsel %vm484_vm13, 1.0, %v6960_v1  ;;  %v1024_v46 = vadd.f32 %v5799_v35, %v672_v34  ;;  %v5674_v30 = vsel %vm195_vm1, 1.0, %v6960_v1 }
  0xea   :  { %1544 = vmatprep.mubr.f32.mxu0 %v1372_v8  ;;  %v674_v55 = vadd.f32 %v5737_v51, %v5673_v36  ;;  %v5738_v12 = vsel %vm483_vm2, 1.0, %v6960_v1  ;;  %v676_v48 = vadd.f32 %v5739_v31, %v5675_v44  ;;  %v5803_v15 = vsel %vm836_vm5, 1.0, %v6960_v1  ;;  %463 = vperm.xlu0 %6589, %v7675_v39  }
  0xeb   :  { %v7615_v50 = vpop.permute.xlu0 %124  ;;  %v1376_v40 = vadd.f32 %v5863_v32, %v1024_v46  ;;  %v1023_v59 = vadd.f32 %v5798_v33, %v671_v19  ;;  %vm1188_vm7 = vcmp.eq.s32.totalorder %v7374_v24, %v7325_v4  ;;  %v5800_v58 = vsel %vm833_vm4, 1.0, %v6960_v1 }
  0xec   :  { %v1096_v42 = vpop.permute.xlu1 %1095  ;;  %v1026_v63 = vadd.f32 %v5801_v47, %v674_v55  ;;  %v673_v51 = vadd.f32 %v7533_v61, %v5672_v52  ;;  %v675_v2 = vadd.f32 %v5738_v12, %v5674_v30  ;;  %v5802_v16 = vsel %vm835_vm10, 1.0, %v6960_v1 }
  0xed   :  { %6552 = vset.pattern.permute.xlu1 %v6961_v6  ;;  %1545 = vmatmul.mubr.f32.gmra.mxu0 %v1371_v28  ;;  %vm1186_vm3 = vcmp.eq.s32.totalorder %v7374_v24, %v1096_v42  ;;  %vm1185_vm6 = vcmp.eq.s32.totalorder %v7365_v21, %v1096_v42  ;;  %v1375_v3 = vadd.f32 %v5862_v56, %v1023_v59  ;;  %v5867_v61 = vsel %vm1188_vm7, 1.0, %v6960_v1 }
  0xee   :  { %136 = vperm.xlu1 %6552, %v7594_v13   ;;  %1549 = vmatprep.mubr.f32.mxu0 %v1374_v43  ;;  %v5865_v49 = vsel %vm1186_vm3, 1.0, %v6960_v1  ;;  %v5864_v5 = vsel %vm1185_vm6, 1.0, %v6960_v1  ;;  %v1028_v8 = vadd.f32 %v5803_v15, %v676_v48  ;;  %vm1187_vm5 = vcmp.eq.s32.totalorder %v7365_v21, %v7325_v4 }
  0xef   :  { %v1378_v18 = vadd.f32 %v5865_v49, %v1026_v63  ;;  %v7652_v17 = vpop.permute.xlu0 %133  ;;  %v1025_v22 = vadd.f32 %v5800_v58, %v673_v51  ;;  %v1027_v28 = vadd.f32 %v5802_v16, %v675_v2  ;;  %v5866_v34 = vsel %vm1187_vm5, 1.0, %v6960_v1  ;;  %6592 = vset.pattern.permute.xlu0 %v6961_v6  ;;  %v1822_v49 = vld [vmem:[#allocation2 + $0xf8] sm:$0xff]  ;;  %v1821_v58 = vld [vmem:[#allocation2 + $0xf0] sm:$0xff]  ;;  %v1820_v51 = vld [vmem:[#allocation2 + $0xe8] sm:$0xff] }
  0xf0   :  { %v1380_v4 = vadd.f32 %v5867_v61, %v1028_v8  ;;  %169 = vperm.xlu0 %6592, %v7297_v57   ;;  %vm487_vm0 = vcmp.eq.s32.totalorder %v7365_v21, %v7363_v20  ;;  %vm488_vm1 = vcmp.eq.s32.totalorder %v7374_v24, %v7363_v20  ;;  %vm202_vm2 = vcmp.eq.s32.totalorder %v7374_v24, %v7566_v25  ;;  %v1819_v2 = vld [vmem:[#allocation2 + $0xe0] sm:$0xff] }
  0xf1   :  { %1550 = vmatmul.mubr.f32.gmra.mxu0 %v1373_v37  ;;  %v110_v62 = vpop.permute.xlu1 %109  ;;  %v1377_v19 = vadd.f32 %v5864_v5, %v1025_v22  ;;  %v1379_v36 = vadd.f32 %v5866_v34, %v1027_v28  ;;  %1823 = vmatprep.subr.mxu1 %v1822_v49  ;;  %vm201_vm4 = vcmp.eq.s32.totalorder %v7365_v21, %v7566_v25  ;;  %v5742_v20 = vsel %vm487_vm0, 1.0, %v6960_v1  ;;  %v1818_v5 = vld [vmem:[#allocation2 + $0xd8] sm:$0xff] }
  0xf2   :  { %6553 = vset.pattern.permute.xlu1 %v6963_v11  ;;  %1554 = vmatprep.mubr.f32.mxu0 %v1376_v40  ;;  %vm197_vm10 = vcmp.eq.s32.totalorder %v7365_v21, %v110_v62  ;;  %vm198_vm11 = vcmp.eq.s32.totalorder %v7374_v24, %v110_v62  ;;  %v5743_v63 = vsel %vm488_vm1, 1.0, %v6960_v1  ;;  %v5680_v8 = vsel %vm201_vm4, 1.0, %v6960_v1 }
  0xf3   :  { %424 = vperm.xlu1 %6553, %v7594_v13   ;;  %v7666_v33 = vpop.permute.xlu0 %142  ;;  %v5676_v31 = vsel %vm197_vm10, 1.0, %v6960_v1  ;;  %v5677_v46 = vsel %vm198_vm11, 1.0, %v6960_v1  ;;  %1824 = vmatpush1.msra.mxu1 %v1821_v58 }
  0xf4   :  { %1825 = vmatprep.subr.mxu1 %v1820_v51 }
  0xf5   :  { %1555 = vmatmul.mubr.f32.gmra.mxu0 %v1375_v3  ;;  %v5681_v3 = vsel %vm202_vm2, 1.0, %v6960_v1  ;;  %1826 = vmatpush1.msra.mxu1 %v1819_v2  ;;  %v1807_v2 = vld [vmem:[#allocation2 + $0x80] sm:$0xff] }
  0xf6   :  { %1559 = vmatprep.mubr.f32.mxu0 %v1378_v18  ;;  %v398_v14 = vpop.permute.xlu1 %397  ;;  %v1817_v18 = vld [vmem:[#allocation2 + $0xd0] sm:$0xff]  ;;  %1827 = vmatprep.subr.mxu1 %v1818_v5  ;;  %v1804_v5 = vld [vmem:[#allocation2 + $0x68] sm:$0xff] }
  0xf7   :  { %6554 = vset.pattern.permute.xlu1 %v6959_v0  ;;  %vm485_vm8 = vcmp.eq.s32.totalorder %v7365_v21, %v398_v14  ;;  %vm486_vm9 = vcmp.eq.s32.totalorder %v7374_v24, %v398_v14  ;;  %v7681_v42 = vpop.permute.xlu0 %151  ;;  %1828 = vmatpush1.msra.mxu1 %v1817_v18  ;;  %v1803_v18 = vld [vmem:[#allocation2 + $0x60] sm:$0xff] }
  0xf8   :  { %776 = vperm.xlu1 %6554, %v7594_v13   ;;  %v5740_v43 = vsel %vm485_vm8, 1.0, %v6960_v1  ;;  %v5741_v44 = vsel %vm486_vm9, 1.0, %v6960_v1 }
  0xf9   :  { %1560 = vmatmul.mubr.f32.gmra.mxu0 %v1377_v19  ;;  %v677_v56 = vadd.f32 %v5740_v43, %v5676_v31  ;;  %v678_v47 = vadd.f32 %v5741_v44, %v5677_v46  ;;  %v1816_v19 = vld [vmem:[#allocation2 + $0xc8] sm:$0xff]  ;;  %v1814_v43 = vld [vmem:[#allocation2 + $0xb8] sm:$0xff] }
  0xfa   :  { %1564 = vmatprep.mubr.f32.mxu0 %v1380_v4  ;;  %1829 = vmatprep.subr.mxu1 %v1816_v19  ;;  %v1798_v19 = vld [vmem:[#allocation2 + $0x38] sm:$0xff] }
  0xfb   :  { %v750_v35 = vpop.permute.xlu1 %749 }
  0xfc   :  { %6555 = vset.pattern.permute.xlu1 %v6961_v6  ;;  %vm837_vm12 = vcmp.eq.s32.totalorder %v7365_v21, %v750_v35  ;;  %vm838_vm13 = vcmp.eq.s32.totalorder %v7374_v24, %v750_v35 }
  0xfd   :  { %139 = vperm.xlu1 %6555, %v7179_v38   ;;  %1565 = vmatmul.mubr.f32.gmra.mxu0 %v1379_v36  ;;  %v5804_v52 = vsel %vm837_vm12, 1.0, %v6960_v1  ;;  %v5805_v55 = vsel %vm838_vm13, 1.0, %v6960_v1  ;;  %vm1194_vm12 = vcmp.eq.s32.totalorder %v7374_v24, %v7330_v7 }
  0xfe   :  { %v1029_v30 = vadd.f32 %v5804_v52, %v677_v56  ;;  %v1030_v12 = vadd.f32 %v5805_v55, %v678_v47  ;;  %v1813_v55 = vld [vmem:[#allocation2 + $0xb0] sm:$0xff] }
 0x100   :  { %v113_v32 = vpop.permute.xlu1 %112 }
 0x101   :  { %6556 = vset.pattern.permute.xlu1 %v6962_v9  ;;  %vm199_vm3 = vcmp.eq.s32.totalorder %v7365_v21, %v113_v32  ;;  %vm200_vm6 = vcmp.eq.s32.totalorder %v7374_v24, %v113_v32  ;;  %v1815_v32 = vld [vmem:[#allocation2 + $0xc0] sm:$0xff] }
 0x102   :  { %1128 = vperm.xlu1 %6556, %v7594_v13   ;;  %v7697_v13 = vpop.permute.xlu0 %160  ;;  %v5679_v61 = vsel %vm200_vm6, 1.0, %v6960_v1  ;;  %1830 = vmatpush1.msra.mxu1 %v1815_v32  ;;  %v1795_v32 = vld [vmem:[#allocation2 + $0x20] sm:$0xff] }
 0x103   :  { %v680_v36 = vadd.f32 %v5743_v63, %v5679_v61  ;;  %1831 = vmatprep.subr.mxu1 %v1814_v43  ;;  %v1808_v63 = vld [vmem:[#allocation2 + $0x88] sm:$0xff] }
 0x104   :  { %1832 = vmatpush1.msra.mxu1 %v1813_v55 }
 0x105   :  { %v1102_v37 = vpop.permute.xlu1 %1101 }
 0x106   :  { %vm1189_vm14 = vcmp.eq.s32.totalorder %v7365_v21, %v1102_v37  ;;  %vm1190_vm15 = vcmp.eq.s32.totalorder %v7374_v24, %v1102_v37  ;;  %6557 = vset.pattern.permute.xlu1 %v6959_v0  ;;  %v756_v62 = vpop.permute.xlu0 %755  ;;  %v1812_v37 = vld [vmem:[#allocation2 + $0xa8] sm:$0xff] }
 0x107   :  { %v5868_v48 = vsel %vm1189_vm14, 1.0, %v6960_v1  ;;  %v5869_v40 = vsel %vm1190_vm15, 1.0, %v6960_v1  ;;  %779 = vperm.xlu1 %6557, %v7179_v38   ;;  %vm842_vm8 = vcmp.eq.s32.totalorder %v7374_v24, %v756_v62  ;;  %vm841_vm11 = vcmp.eq.s32.totalorder %v7365_v21, %v756_v62  ;;  %1833 = vmatprep.subr.mxu1 %v1812_v37  ;;  %v1792_v37 = vld [vmem:[#allocation2 + $0x8] sm:$0xff] }
 0x108   :  { %v1382_v15 = vadd.f32 %v5869_v40, %v1030_v12  ;;  %v1381_v59 = vadd.f32 %v5868_v48, %v1029_v30  ;;  %v5809_v35 = vsel %vm842_vm8, 1.0, %v6960_v1  ;;  %v5808_v46 = vsel %vm841_vm11, 1.0, %v6960_v1  ;;  %v1811_v40 = vld [vmem:[#allocation2 + $0xa0] sm:$0xff] }
 0x109   :  { %vm1193_vm15 = vcmp.eq.s32.totalorder %v7365_v21, %v7330_v7  ;;  %v5873_v30 = vsel %vm1194_vm12, 1.0, %v6960_v1  ;;  %1834 = vmatpush1.msra.mxu1 %v1811_v40  ;;  %v1810_v7 = vld [vmem:[#allocation2 + $0x98] sm:$0xff]  ;;  %vm493_vm8 = vcmp.eq.s32.totalorder %v7365_v21, %v7370_v23  ;;  %vm207_vm12 = vcmp.eq.s32.totalorder %v7365_v21, %v7615_v50 }
 0x10a   :  { %1569 = vmatprep.mubr.f32.mxu0 %v1382_v15  ;;  %v753_v57 = vpop.permute.xlu1 %752  ;;  %v5872_v49 = vsel %vm1193_vm15, 1.0, %v6960_v1  ;;  %1835 = vmatprep.subr.mxu1 %v1810_v7 }
 0x10b   :  { %6558 = vset.pattern.permute.xlu1 %v6963_v11  ;;  %1570 = vmatmul.mubr.f32.gmra.mxu0 %v1381_v59  ;;  %vm839_vm7 = vcmp.eq.s32.totalorder %v7365_v21, %v753_v57  ;;  %vm840_vm5 = vcmp.eq.s32.totalorder %v7374_v24, %v753_v57 }
 0x10c   :  { %430 = vperm.xlu1 %6558, %v7262_v53   ;;  %v5678_v53 = vsel %vm199_vm3, 1.0, %v6960_v1  ;;  %v5806_v22 = vsel %vm839_vm7, 1.0, %v6960_v1  ;;  %v5807_v34 = vsel %vm840_vm5, 1.0, %v6960_v1 }
 0x10d   :  { %v679_v28 = vadd.f32 %v5742_v20, %v5678_v53  ;;  %v1032_v56 = vadd.f32 %v5807_v34, %v680_v36  ;;  %v1809_v20 = vld [vmem:[#allocation2 + $0x90] sm:$0xff]  ;;  %v1806_v53 = vld [vmem:[#allocation2 + $0x78] sm:$0xff] }
 0x10e   :  { %1836 = vmatpush1.msra.mxu1 %v1809_v20  ;;  %v7780_v34 = vld [vmem:[%s9125_s0 + $0xf0] sm:$0xff] }
 0x10f   :  { %v404_v16 = vpop.permute.xlu1 %403  ;;  %v1031_v44 = vadd.f32 %v5806_v22, %v679_v28  ;;  %1837 = vmatprep.subr.mxu1 %v1808_v63  ;;  %v1801_v22 = vld [vmem:[#allocation2 + $0x50] sm:$0xff]  ;;  %178 = vperm.xlu0 %6592, %v7780_v34  }
 0x110   :  { %vm489_vm9 = vcmp.eq.s32.totalorder %v7365_v21, %v404_v16  ;;  %vm490_vm10 = vcmp.eq.s32.totalorder %v7374_v24, %v404_v16  ;;  %6559 = vset.pattern.permute.xlu1 %v6962_v9  ;;  %v1805_v16 = vld [vmem:[#allocation2 + $0x70] sm:$0xff]  ;;  %1838 = vmatpush1.msra.mxu1 %v1807_v2 }
 0x111   :  { %v5744_v14 = vsel %vm489_vm9, 1.0, %v6960_v1  ;;  %v5745_v25 = vsel %vm490_vm10, 1.0, %v6960_v1  ;;  %1131 = vperm.xlu1 %6559, %v7179_v38   ;;  %v7749_v38 = vld [vmem:[%s9125_s0 + $0x98] sm:$0xff]  ;;  %1839 = vmatprep.subr.mxu1 %v1806_v53  ;;  %v1797_v28 = vld [vmem:[#allocation2 + $0x30] sm:$0xff]  ;;  %vm494_vm9 = vcmp.eq.s32.totalorder %v7374_v24, %v7370_v23  ;;  %vm208_vm10 = vcmp.eq.s32.totalorder %v7374_v24, %v7615_v50 }
 0x112   :  { %v682_v4 = vadd.f32 %v5745_v25, %v5681_v3  ;;  %v681_v31 = vadd.f32 %v5744_v14, %v5680_v8  ;;  %1840 = vmatpush1.msra.mxu1 %v1805_v16  ;;  %v1802_v8 = vld [vmem:[#allocation2 + $0x58] sm:$0xff]  ;;  %v1800_v14 = vld [vmem:[#allocation2 + $0x48] sm:$0xff]  ;;  %v1799_v25 = vld [vmem:[#allocation2 + $0x40] sm:$0xff]  ;;  %v5748_v23 = vsel %vm493_vm8, 1.0, %v6960_v1  ;;  %v5749_v7 = vsel %vm494_vm9, 1.0, %v6960_v1 }
 0x113   :  { %1841 = vmatprep.subr.mxu1 %v1804_v5  ;;  %6597 = vset.pattern.permute.xlu0 %v6959_v0  ;;  %v5687_v20 = vsel %vm208_vm10, 1.0, %v6960_v1  ;;  %v5686_v50 = vsel %vm207_vm12, 1.0, %v6960_v1 }
 0x114   :  { %v1105_v52 = vpop.permute.xlu1 %1104  ;;  %v1034_v47 = vadd.f32 %v5809_v35, %v682_v4  ;;  %v1033_v57 = vadd.f32 %v5808_v46, %v681_v31  ;;  %1842 = vmatpush1.msra.mxu1 %v1803_v18  ;;  %v1796_v35 = vld [vmem:[#allocation2 + $0x28] sm:$0xff]  ;;  %v1794_v31 = vld [vmem:[#allocation2 + $0x18] sm:$0xff]  ;;  %818 = vperm.xlu0 %6597, %v7780_v34  }
 0x115   :  { %vm1191_vm13 = vcmp.eq.s32.totalorder %v7365_v21, %v1105_v52  ;;  %vm1192_vm14 = vcmp.eq.s32.totalorder %v7374_v24, %v1105_v52  ;;  %6560 = vset.pattern.permute.xlu1 %v6961_v6  ;;  %1843 = vmatprep.subr.mxu1 %v1802_v8 }
 0x116   :  { %v5870_v12 = vsel %vm1191_vm13, 1.0, %v6960_v1  ;;  %v5871_v48 = vsel %vm1192_vm14, 1.0, %v6960_v1  ;;  %145 = vperm.xlu1 %6560, %v7749_v38   ;;  %v1386_v58 = vadd.f32 %v5873_v30, %v1034_v47  ;;  %v1385_v51 = vadd.f32 %v5872_v49, %v1033_v57  ;;  %1844 = vmatpush1.msra.mxu1 %v1801_v22  ;;  %v77_v22 = vld [vmem:[%s9125_s0 + $0xb0] sm:$0xff] }
 0x117   :  { %v1384_v15 = vadd.f32 %v5871_v48, %v1032_v56  ;;  %v1383_v59 = vadd.f32 %v5870_v12, %v1031_v44  ;;  %1845 = vmatprep.subr.mxu1 %v1800_v14  ;;  %v1793_v56 = vld [vmem:[#allocation2 + $0x10] sm:$0xff]  ;;  %v1791_v12 = vld [vmem:[#allocation2] sm:$0xff] }
 0x118   :  { %1846 = vmatpush1.msra.mxu1 %v1799_v25  ;;  %6600 = vset.pattern.permute.xlu0 %v6962_v9 }
 0x119   :  { %1574 = vmatprep.mubr.f32.mxu0 %v1384_v15  ;;  %v119_v62 = vpop.permute.xlu1 %118  ;;  %1847 = vmatprep.subr.mxu1 %v1798_v19 }
 0x11a   :  { %6561 = vset.pattern.permute.xlu1 %v6963_v11  ;;  %1575 = vmatmul.mubr.f32.gmra.mxu0 %v1383_v59  ;;  %vm203_vm2 = vcmp.eq.s32.totalorder %v7365_v21, %v119_v62  ;;  %vm204_vm4 = vcmp.eq.s32.totalorder %v7374_v24, %v119_v62  ;;  %v6859_v59 = vld [vmem:[%s9125_s0 + $0xa0] sm:$0xff] }
 0x11b   :  { %433 = vperm.xlu1 %6561, %v7749_v38   ;;  %1579 = vmatprep.mubr.f32.mxu0 %v1386_v58  ;;  %v5682_v43 = vsel %vm203_vm2, 1.0, %v6960_v1  ;;  %v5683_v46 = vsel %vm204_vm4, 1.0, %v6960_v1  ;;  %v765_v58 = vpop.permute.xlu0 %764  ;;  %vm1200_vm4 = vcmp.eq.s32.totalorder %v7374_v24, %v7335_v10 }
 0x11c   :  { %1848 = vmatpush1.msra.mxu1 %v1797_v28  ;;  %1170 = vperm.xlu0 %6600, %v7780_v34  }
 0x11d   :  { %1849 = vmatprep.subr.mxu1 %v1796_v35  ;;  %v5879_v35 = vsel %vm1200_vm4, 1.0, %v6960_v1  ;;  %vm213_vm4 = vcmp.eq.s32.totalorder %v7365_v21, %v7652_v17 }
 0x11e   :  { %1580 = vmatmul.mubr.f32.gmra.mxu0 %v1385_v51  ;;  %v407_v3 = vpop.permute.xlu1 %406  ;;  %1850 = vmatpush1.msra.mxu1 %v1795_v32 }
 0x11f   :  { %6562 = vset.pattern.permute.xlu1 %v6959_v0  ;;  %vm491_vm0 = vcmp.eq.s32.totalorder %v7365_v21, %v407_v3  ;;  %vm492_vm1 = vcmp.eq.s32.totalorder %v7374_v24, %v407_v3  ;;  %1851 = vmatprep.subr.mxu1 %v1794_v31 }
 0x120   :  { %785 = vperm.xlu1 %6562, %v7749_v38   ;;  %v5747_v36 = vsel %vm492_vm1, 1.0, %v6960_v1  ;;  %1852 = vmatpush1.msra.mxu1 %v1793_v56  ;;  %v7863_v56 = vpop.permute.xlu0 %773 }
 0x121   :  { %v684_v47 = vadd.f32 %v5747_v36, %v5683_v46  ;;  %1853 = vmatprep.subr.mxu1 %v1792_v37 }
 0x122   :  { %1854 = vmatpush1.msra.mxu1 %v1791_v12 }
 0x123   :  { %v759_v61 = vpop.permute.xlu1 %758 }
 0x124   :  { %6563 = vset.pattern.permute.xlu1 %v6961_v6  ;;  %vm843_vm3 = vcmp.eq.s32.totalorder %v7365_v21, %v759_v61  ;;  %vm844_vm6 = vcmp.eq.s32.totalorder %v7374_v24, %v759_v61  ;;  %v7866_v37 = vpop.permute.xlu0 %782 }
 0x125   :  { %148 = vperm.xlu1 %6563, %v7194_v41   ;;  %v5746_v41 = vsel %vm491_vm0, 1.0, %v6960_v1  ;;  %v5810_v44 = vsel %vm843_vm3, 1.0, %v6960_v1  ;;  %v5811_v55 = vsel %vm844_vm6, 1.0, %v6960_v1  ;;  %vm848_vm0 = vcmp.eq.s32.totalorder %v7374_v24, %v765_v58 }
 0x126   :  { %v683_v52 = vadd.f32 %v5746_v41, %v5682_v43  ;;  %v1036_v48 = vadd.f32 %v5811_v55, %v684_v47  ;;  %vm847_vm3 = vcmp.eq.s32.totalorder %v7365_v21, %v765_v58  ;;  %v5815_v8 = vsel %vm848_vm0, 1.0, %v6960_v1 }
 0x127   :  { %v5814_v19 = vsel %vm847_vm3, 1.0, %v6960_v1  ;;  %vm499_vm0 = vcmp.eq.s32.totalorder %v7365_v21, %v7378_v26 }
 0x128   :  { %v7785_v4 = vpop.permute.xlu1 %121  ;;  %v1035_v30 = vadd.f32 %v5810_v44, %v683_v52 }
 0x129   :  { %6565 = vset.pattern.permute.xlu1 %v6962_v9  ;;  %vm205_vm11 = vcmp.eq.s32.totalorder %v7365_v21, %v7785_v4  ;;  %vm206_vm13 = vcmp.eq.s32.totalorder %v7374_v24, %v7785_v4 }
 0x12a   :  { %1137 = vperm.xlu1 %6565, %v7749_v38   ;;  %v5684_v63 = vsel %vm205_vm11, 1.0, %v6960_v1  ;;  %v5685_v51 = vsel %vm206_vm13, 1.0, %v6960_v1 }
 0x12b   :  { %v685_v16 = vadd.f32 %v5748_v23, %v5684_v63  ;;  %v686_v61 = vadd.f32 %v5749_v7, %v5685_v51 }
 0x12d   :  { %v1111_v38 = vpop.permute.xlu1 %1110 }
 0x12e   :  { %vm1195_vm7 = vcmp.eq.s32.totalorder %v7365_v21, %v1111_v38  ;;  %vm1196_vm5 = vcmp.eq.s32.totalorder %v7374_v24, %v1111_v38  ;;  %6566 = vset.pattern.permute.xlu1 %v6959_v0  ;;  %v7872_v38 = vpop.permute.xlu0 %791 }
 0x12f   :  { %v5874_v40 = vsel %vm1195_vm7, 1.0, %v6960_v1  ;;  %v5875_v15 = vsel %vm1196_vm5, 1.0, %v6960_v1  ;;  %788 = vperm.xlu1 %6566, %v6859_v59   ;;  %vm1199_vm5 = vcmp.eq.s32.totalorder %v7365_v21, %v7335_v10 }
 0x130   :  { %v1388_v57 = vadd.f32 %v5875_v15, %v1036_v48  ;;  %v1387_v49 = vadd.f32 %v5874_v40, %v1035_v30  ;;  %v5878_v46 = vsel %vm1199_vm5, 1.0, %v6960_v1  ;;  %vm854_vm5 = vcmp.eq.s32.totalorder %v7374_v24, %v7863_v56 }
 0x132   :  { %1584 = vmatprep.mubr.f32.mxu0 %v1388_v57  ;;  %v762_v62 = vpop.permute.xlu1 %761  ;;  %v7885_v58 = vpop.permute.xlu0 %800 }
 0x133   :  { %6567 = vset.pattern.permute.xlu1 %v6963_v11  ;;  %1585 = vmatmul.mubr.f32.gmra.mxu0 %v1387_v49  ;;  %vm845_vm14 = vcmp.eq.s32.totalorder %v7365_v21, %v762_v62  ;;  %vm846_vm15 = vcmp.eq.s32.totalorder %v7374_v24, %v762_v62 }
 0x134   :  { %439 = vperm.xlu1 %6567, %v7268_v54   ;;  %v5812_v2 = vsel %vm845_vm14, 1.0, %v6960_v1  ;;  %v5813_v5 = vsel %vm846_vm15, 1.0, %v6960_v1 }
 0x135   :  { %v1037_v14 = vadd.f32 %v5812_v2, %v685_v16  ;;  %v1038_v41 = vadd.f32 %v5813_v5, %v686_v61  ;;  %v6861_v16 = vld [vmem:[%s9125_s0 + $0xc0] sm:$0xff] }
 0x137   :  { %v413_v54 = vpop.permute.xlu1 %412 }
 0x138   :  { %vm495_vm1 = vcmp.eq.s32.totalorder %v7365_v21, %v413_v54  ;;  %vm496_vm2 = vcmp.eq.s32.totalorder %v7374_v24, %v413_v54  ;;  %6568 = vset.pattern.permute.xlu1 %v6962_v9 }
 0x139   :  { %v5750_v3 = vsel %vm495_vm1, 1.0, %v6960_v1  ;;  %v5751_v53 = vsel %vm496_vm2, 1.0, %v6960_v1  ;;  %1140 = vperm.xlu1 %6568, %v6859_v59   ;;  %vm500_vm1 = vcmp.eq.s32.totalorder %v7374_v24, %v7378_v26  ;;  %vm214_vm2 = vcmp.eq.s32.totalorder %v7374_v24, %v7652_v17 }
 0x13a   :  { %v688_v18 = vadd.f32 %v5751_v53, %v5687_v20  ;;  %v687_v25 = vadd.f32 %v5750_v3, %v5686_v50  ;;  %v6860_v50 = vld [vmem:[%s9125_s0 + $0xb8] sm:$0xff]  ;;  %v7895_v53 = vpop.permute.xlu0 %809  ;;  %v5754_v26 = vsel %vm499_vm0, 1.0, %v6960_v1  ;;  %v5755_v5 = vsel %vm500_vm1, 1.0, %v6960_v1 }
 0x13b   :  { %v5692_v17 = vsel %vm213_vm4, 1.0, %v6960_v1 }
 0x13c   :  { %v1114_v28 = vpop.permute.xlu1 %1113  ;;  %v1040_v4 = vadd.f32 %v5815_v8, %v688_v18  ;;  %v1039_v31 = vadd.f32 %v5814_v19, %v687_v25  ;;  %v5693_v18 = vsel %vm214_vm2, 1.0, %v6960_v1 }
 0x13d   :  { %vm1197_vm6 = vcmp.eq.s32.totalorder %v7365_v21, %v1114_v28  ;;  %vm1198_vm7 = vcmp.eq.s32.totalorder %v7374_v24, %v1114_v28  ;;  %6569 = vset.pattern.permute.xlu1 %v6961_v6 }
 0x13e   :  { %v5876_v36 = vsel %vm1197_vm6, 1.0, %v6960_v1  ;;  %v5877_v32 = vsel %vm1198_vm7, 1.0, %v6960_v1  ;;  %154 = vperm.xlu1 %6569, %v77_v22   ;;  %v1392_v55 = vadd.f32 %v5879_v35, %v1040_v4  ;;  %v1391_v10 = vadd.f32 %v5878_v46, %v1039_v31 }
 0x13f   :  { %v1390_v43 = vadd.f32 %v5877_v32, %v1038_v41  ;;  %v1389_v44 = vadd.f32 %v5876_v36, %v1037_v14  ;;  %v1126_v14 = vpop.permute.xlu0 %1125  ;;  %v5821_v41 = vsel %vm854_vm5, 1.0, %v6960_v1 }
 0x141   :  { %1589 = vmatprep.mubr.f32.mxu0 %v1390_v43  ;;  %v128_v52 = vpop.permute.xlu1 %127  ;;  %v80_v43 = vld [vmem:[%s9125_s0 + $0xc8] sm:$0xff] }
 0x142   :  { %6570 = vset.pattern.permute.xlu1 %v6963_v11  ;;  %1590 = vmatmul.mubr.f32.gmra.mxu0 %v1389_v44  ;;  %vm209_vm10 = vcmp.eq.s32.totalorder %v7365_v21, %v128_v52  ;;  %vm210_vm11 = vcmp.eq.s32.totalorder %v7374_v24, %v128_v52 }
 0x143   :  { %442 = vperm.xlu1 %6570, %v77_v22   ;;  %1594 = vmatprep.mubr.f32.mxu0 %v1392_v55  ;;  %v5689_v15 = vsel %vm210_vm11, 1.0, %v6960_v1  ;;  %vm853_vm11 = vcmp.eq.s32.totalorder %v7365_v21, %v7863_v56 }
 0x144   :  { %v5820_v44 = vsel %vm853_vm11, 1.0, %v6960_v1 }
 0x146   :  { %1595 = vmatmul.mubr.f32.gmra.mxu0 %v1391_v10  ;;  %v416_v47 = vpop.permute.xlu1 %415 }
 0x147   :  { %6571 = vset.pattern.permute.xlu1 %v6959_v0  ;;  %vm497_vm8 = vcmp.eq.s32.totalorder %v7365_v21, %v416_v47  ;;  %vm498_vm9 = vcmp.eq.s32.totalorder %v7374_v24, %v416_v47 }
 0x148   :  { %794 = vperm.xlu1 %6571, %v77_v22   ;;  %v5752_v48 = vsel %vm497_vm8, 1.0, %v6960_v1  ;;  %v5753_v40 = vsel %vm498_vm9, 1.0, %v6960_v1 }
 0x149   :  { %v690_v62 = vadd.f32 %v5753_v40, %v5689_v15 }
 0x14b   :  { %v768_v30 = vpop.permute.xlu1 %767 }
 0x14c   :  { %6572 = vset.pattern.permute.xlu1 %v6961_v6  ;;  %vm849_vm12 = vcmp.eq.s32.totalorder %v7365_v21, %v768_v30  ;;  %vm850_vm13 = vcmp.eq.s32.totalorder %v7374_v24, %v768_v30 }
 0x14d   :  { %157 = vperm.xlu1 %6572, %v7383_v27   ;;  %v5688_v27 = vsel %vm209_vm10, 1.0, %v6960_v1  ;;  %v5816_v59 = vsel %vm849_vm12, 1.0, %v6960_v1  ;;  %v5817_v57 = vsel %vm850_vm13, 1.0, %v6960_v1  ;;  %vm1206_vm12 = vcmp.eq.s32.totalorder %v7374_v24, %v1126_v14 }
 0x14e   :  { %v689_v49 = vadd.f32 %v5752_v48, %v5688_v27  ;;  %v1042_v20 = vadd.f32 %v5817_v57, %v690_v62  ;;  %v5885_v10 = vsel %vm1206_vm12, 1.0, %v6960_v1  ;;  %vm219_vm12 = vcmp.eq.s32.totalorder %v7365_v21, %v7666_v33 }
 0x150   :  { %v131_v12 = vpop.permute.xlu1 %130  ;;  %v1041_v7 = vadd.f32 %v5816_v59, %v689_v49 }
 0x151   :  { %6573 = vset.pattern.permute.xlu1 %v6962_v9  ;;  %vm211_vm3 = vcmp.eq.s32.totalorder %v7365_v21, %v131_v12  ;;  %vm212_vm6 = vcmp.eq.s32.totalorder %v7374_v24, %v131_v12 }
 0x152   :  { %1146 = vperm.xlu1 %6573, %v77_v22   ;;  %v5690_v8 = vsel %vm211_vm3, 1.0, %v6960_v1  ;;  %v5691_v22 = vsel %vm212_vm6, 1.0, %v6960_v1 }
 0x153   :  { %v691_v4 = vadd.f32 %v5754_v26, %v5690_v8  ;;  %v692_v32 = vadd.f32 %v5755_v5, %v5691_v22 }
 0x155   :  { %v1120_v23 = vpop.permute.xlu1 %1119 }
 0x156   :  { %vm1201_vm14 = vcmp.eq.s32.totalorder %v7365_v21, %v1120_v23  ;;  %vm1202_vm15 = vcmp.eq.s32.totalorder %v7374_v24, %v1120_v23  ;;  %6574 = vset.pattern.permute.xlu1 %v6959_v0 }
 0x157   :  { %v5880_v63 = vsel %vm1201_vm14, 1.0, %v6960_v1  ;;  %v5881_v54 = vsel %vm1202_vm15, 1.0, %v6960_v1  ;;  %797 = vperm.xlu1 %6574, %v6860_v50   ;;  %vm1205_vm15 = vcmp.eq.s32.totalorder %v7365_v21, %v1126_v14  ;;  %v6862_v14 = vld [vmem:[%s9125_s0 + $0xd8] sm:$0xff] }
 0x158   :  { %v1394_v51 = vadd.f32 %v5881_v54, %v1042_v20  ;;  %v1393_v2 = vadd.f32 %v5880_v63, %v1041_v7  ;;  %v5884_v27 = vsel %vm1205_vm15, 1.0, %v6960_v1  ;;  %vm860_vm15 = vcmp.eq.s32.totalorder %v7374_v24, %v7866_v37 }
 0x15a   :  { %1599 = vmatprep.mubr.f32.mxu0 %v1394_v51  ;;  %v771_v3 = vpop.permute.xlu1 %770 }
 0x15b   :  { %6576 = vset.pattern.permute.xlu1 %v6963_v11  ;;  %1600 = vmatmul.mubr.f32.gmra.mxu0 %v1393_v2  ;;  %vm851_vm7 = vcmp.eq.s32.totalorder %v7365_v21, %v771_v3  ;;  %vm852_vm8 = vcmp.eq.s32.totalorder %v7374_v24, %v771_v3 }
 0x15c   :  { %448 = vperm.xlu1 %6576, %v6861_v16   ;;  %v5818_v25 = vsel %vm851_vm7, 1.0, %v6960_v1  ;;  %v5819_v35 = vsel %vm852_vm8, 1.0, %v6960_v1  ;;  %vm505_vm8 = vcmp.eq.s32.totalorder %v7365_v21, %v7407_v29 }
 0x15d   :  { %v1043_v31 = vadd.f32 %v5818_v25, %v691_v4  ;;  %v1044_v55 = vadd.f32 %v5819_v35, %v692_v32  ;;  %v1135_v35 = vpop.permute.xlu0 %1134 }
 0x15f   :  { %v422_v61 = vpop.permute.xlu1 %421 }
 0x160   :  { %vm501_vm9 = vcmp.eq.s32.totalorder %v7365_v21, %v422_v61  ;;  %vm502_vm10 = vcmp.eq.s32.totalorder %v7374_v24, %v422_v61  ;;  %6577 = vset.pattern.permute.xlu1 %v6962_v9 }
 0x161   :  { %v5756_v19 = vsel %vm501_vm9, 1.0, %v6960_v1  ;;  %v5757_v28 = vsel %vm502_vm10, 1.0, %v6960_v1  ;;  %1149 = vperm.xlu1 %6577, %v6860_v50   ;;  %vm506_vm9 = vcmp.eq.s32.totalorder %v7374_v24, %v7407_v29  ;;  %vm220_vm10 = vcmp.eq.s32.totalorder %v7374_v24, %v7666_v33 }
 0x162   :  { %v694_v36 = vadd.f32 %v5757_v28, %v5693_v18  ;;  %v693_v46 = vadd.f32 %v5756_v19, %v5692_v17  ;;  %v5760_v29 = vsel %vm505_vm8, 1.0, %v6960_v1  ;;  %v5761_v25 = vsel %vm506_vm9, 1.0, %v6960_v1 }
 0x163   :  { %v5699_v19 = vsel %vm220_vm10, 1.0, %v6960_v1  ;;  %v5698_v33 = vsel %vm219_vm12, 1.0, %v6960_v1 }
 0x164   :  { %v1123_v52 = vpop.permute.xlu1 %1122  ;;  %v1046_v56 = vadd.f32 %v5821_v41, %v694_v36  ;;  %v1045_v40 = vadd.f32 %v5820_v44, %v693_v46  ;;  %v5827_v44 = vsel %vm860_vm15, 1.0, %v6960_v1 }
 0x165   :  { %vm1203_vm13 = vcmp.eq.s32.totalorder %v7365_v21, %v1123_v52  ;;  %vm1204_vm14 = vcmp.eq.s32.totalorder %v7374_v24, %v1123_v52  ;;  %6578 = vset.pattern.permute.xlu1 %v6961_v6 }
 0x166   :  { %v5882_v47 = vsel %vm1203_vm13, 1.0, %v6960_v1  ;;  %v5883_v30 = vsel %vm1204_vm14, 1.0, %v6960_v1  ;;  %163 = vperm.xlu1 %6578, %v80_v43   ;;  %v1398_v15 = vadd.f32 %v5885_v10, %v1046_v56  ;;  %v1397_v57 = vadd.f32 %v5884_v27, %v1045_v40 }
 0x167   :  { %v1396_v12 = vadd.f32 %v5883_v30, %v1044_v55  ;;  %v1395_v48 = vadd.f32 %v5882_v47, %v1043_v31 }
 0x169   :  { %1604 = vmatprep.mubr.f32.mxu0 %v1396_v12  ;;  %v137_v59 = vpop.permute.xlu1 %136 }
 0x16a   :  { %6579 = vset.pattern.permute.xlu1 %v6963_v11  ;;  %1605 = vmatmul.mubr.f32.gmra.mxu0 %v1395_v48  ;;  %vm215_vm2 = vcmp.eq.s32.totalorder %v7365_v21, %v137_v59  ;;  %vm216_vm3 = vcmp.eq.s32.totalorder %v7374_v24, %v137_v59 }
 0x16b   :  { %451 = vperm.xlu1 %6579, %v80_v43   ;;  %1609 = vmatprep.mubr.f32.mxu0 %v1398_v15  ;;  %v5694_v63 = vsel %vm215_vm2, 1.0, %v6960_v1  ;;  %v5695_v54 = vsel %vm216_vm3, 1.0, %v6960_v1  ;;  %vm859_vm3 = vcmp.eq.s32.totalorder %v7365_v21, %v7866_v37  ;;  %v83_v37 = vld [vmem:[%s9125_s0 + $0xe0] sm:$0xff] }
 0x16c   :  { %v5826_v56 = vsel %vm859_vm3, 1.0, %v6960_v1  ;;  %vm225_vm3 = vcmp.eq.s32.totalorder %v7365_v21, %v7681_v42 }
 0x16e   :  { %1610 = vmatmul.mubr.f32.gmra.mxu0 %v1397_v57  ;;  %v425_v49 = vpop.permute.xlu1 %424 }
 0x16f   :  { %6580 = vset.pattern.permute.xlu1 %v6959_v0  ;;  %vm503_vm0 = vcmp.eq.s32.totalorder %v7365_v21, %v425_v49  ;;  %vm504_vm1 = vcmp.eq.s32.totalorder %v7374_v24, %v425_v49 }
 0x170   :  { %803 = vperm.xlu1 %6580, %v80_v43   ;;  %v5758_v7 = vsel %vm503_vm0, 1.0, %v6960_v1  ;;  %v5759_v20 = vsel %vm504_vm1, 1.0, %v6960_v1 }
 0x171   :  { %v695_v2 = vadd.f32 %v5758_v7, %v5694_v63  ;;  %v696_v3 = vadd.f32 %v5759_v20, %v5695_v54 }
 0x173   :  { %v777_v62 = vpop.permute.xlu1 %776 }
 0x174   :  { %6581 = vset.pattern.permute.xlu1 %v6961_v6  ;;  %vm855_vm4 = vcmp.eq.s32.totalorder %v7365_v21, %v777_v62  ;;  %vm856_vm6 = vcmp.eq.s32.totalorder %v7374_v24, %v777_v62 }
 0x175   :  { %166 = vperm.xlu1 %6581, %v7660_v60   ;;  %v5822_v50 = vsel %vm855_vm4, 1.0, %v6960_v1  ;;  %v5823_v51 = vsel %vm856_vm6, 1.0, %v6960_v1  ;;  %vm1212_vm4 = vcmp.eq.s32.totalorder %v7374_v24, %v1135_v35 }
 0x176   :  { %v1047_v26 = vadd.f32 %v5822_v50, %v695_v2  ;;  %v1048_v5 = vadd.f32 %v5823_v51, %v696_v3  ;;  %v5891_v48 = vsel %vm1212_vm4, 1.0, %v6960_v1  ;;  %vm226_vm4 = vcmp.eq.s32.totalorder %v7374_v24, %v7681_v42  ;;  %v1144_v42 = vpop.permute.xlu0 %1143 }
 0x178   :  { %v140_v23 = vpop.permute.xlu1 %139 }
 0x179   :  { %6582 = vset.pattern.permute.xlu1 %v6962_v9  ;;  %vm217_vm11 = vcmp.eq.s32.totalorder %v7365_v21, %v140_v23  ;;  %vm218_vm13 = vcmp.eq.s32.totalorder %v7374_v24, %v140_v23 }
 0x17a   :  { %1155 = vperm.xlu1 %6582, %v80_v43   ;;  %v5696_v28 = vsel %vm217_vm11, 1.0, %v6960_v1  ;;  %v5697_v4 = vsel %vm218_vm13, 1.0, %v6960_v1 }
 0x17b   :  { %v697_v31 = vadd.f32 %v5760_v29, %v5696_v28  ;;  %v698_v55 = vadd.f32 %v5761_v25, %v5697_v4 }
 0x17d   :  { %v1129_v16 = vpop.permute.xlu1 %1128 }
 0x17e   :  { %vm1207_vm7 = vcmp.eq.s32.totalorder %v7365_v21, %v1129_v16  ;;  %vm1208_vm5 = vcmp.eq.s32.totalorder %v7374_v24, %v1129_v16  ;;  %6583 = vset.pattern.permute.xlu1 %v6959_v0 }
 0x17f   :  { %v5886_v18 = vsel %vm1207_vm7, 1.0, %v6960_v1  ;;  %v5887_v8 = vsel %vm1208_vm5, 1.0, %v6960_v1  ;;  %806 = vperm.xlu1 %6583, %v7660_v60   ;;  %vm1211_vm5 = vcmp.eq.s32.totalorder %v7365_v21, %v1135_v35 }
 0x180   :  { %v1400_v61 = vadd.f32 %v5887_v8, %v1048_v5  ;;  %v1399_v17 = vadd.f32 %v5886_v18, %v1047_v26  ;;  %v5890_v49 = vsel %vm1211_vm5, 1.0, %v6960_v1  ;;  %v8037_v18 = vld [vmem:[%s9127_s2] ss:$0 sm:$0xff]  ;;  %vm865_vm5 = vcmp.eq.s32.totalorder %v7365_v21, %v7872_v38 }
 0x182   :  { %1614 = vmatprep.mubr.f32.mxu0 %v1400_v61  ;;  %v780_v22 = vpop.permute.xlu1 %779 }
 0x183   :  { %6584 = vset.pattern.permute.xlu1 %v6963_v11  ;;  %1615 = vmatmul.mubr.f32.gmra.mxu0 %v1399_v17  ;;  %vm857_vm14 = vcmp.eq.s32.totalorder %v7365_v21, %v780_v22  ;;  %vm858_vm0 = vcmp.eq.s32.totalorder %v7374_v24, %v780_v22 }
 0x184   :  { %457 = vperm.xlu1 %6584, %v6862_v14   ;;  %v5824_v36 = vsel %vm857_vm14, 1.0, %v6960_v1  ;;  %v5825_v46 = vsel %vm858_vm0, 1.0, %v6960_v1 }
 0x185   :  { %v1049_v10 = vadd.f32 %v5824_v36, %v697_v31  ;;  %v1050_v12 = vadd.f32 %v5825_v46, %v698_v55 }
 0x187   :  { %v431_v41 = vpop.permute.xlu1 %430 }
 0x188   :  { %vm507_vm1 = vcmp.eq.s32.totalorder %v7365_v21, %v431_v41  ;;  %vm508_vm2 = vcmp.eq.s32.totalorder %v7374_v24, %v431_v41  ;;  %6585 = vset.pattern.permute.xlu1 %v6962_v9 }
 0x189   :  { %v5762_v32 = vsel %vm507_vm1, 1.0, %v6960_v1  ;;  %v5763_v43 = vsel %vm508_vm2, 1.0, %v6960_v1  ;;  %1158 = vperm.xlu1 %6585, %v7660_v60   ;;  %vm511_vm1 = vcmp.eq.s32.totalorder %v7365_v21, %v7444_v45  ;;  %vm512_vm2 = vcmp.eq.s32.totalorder %v7374_v24, %v7444_v45 }
 0x18a   :  { %v700_v52 = vadd.f32 %v5763_v43, %v5699_v19  ;;  %v699_v47 = vadd.f32 %v5762_v32, %v5698_v33  ;;  %v5766_v31 = vsel %vm511_vm1, 1.0, %v6960_v1  ;;  %v5767_v46 = vsel %vm512_vm2, 1.0, %v6960_v1 }
 0x18b   :  { %vm1218_vm1 = vcmp.eq.s32.totalorder %v7374_v24, %v1144_v42 }
 0x18c   :  { %v1132_v30 = vpop.permute.xlu1 %1131  ;;  %v1052_v60 = vadd.f32 %v5827_v44, %v700_v52  ;;  %v1051_v57 = vadd.f32 %v5826_v56, %v699_v47  ;;  %v5704_v52 = vsel %vm225_vm3, 1.0, %v6960_v1 }
 0x18d   :  { %vm1209_vm6 = vcmp.eq.s32.totalorder %v7365_v21, %v1132_v30  ;;  %vm1210_vm7 = vcmp.eq.s32.totalorder %v7374_v24, %v1132_v30  ;;  %6587 = vset.pattern.permute.xlu1 %v6961_v6 }
 0x18e   :  { %v5888_v40 = vsel %vm1209_vm6, 1.0, %v6960_v1  ;;  %v5889_v27 = vsel %vm1210_vm7, 1.0, %v6960_v1  ;;  %172 = vperm.xlu1 %6587, %v83_v37   ;;  %v1404_v62 = vadd.f32 %v5891_v48, %v1052_v60  ;;  %v1403_v7 = vadd.f32 %v5890_v49, %v1051_v57 }
 0x18f   :  { %v1402_v15 = vadd.f32 %v5889_v27, %v1050_v12  ;;  %v1401_v59 = vadd.f32 %v5888_v40, %v1049_v10  ;;  %v5832_v12 = vsel %vm865_vm5, 1.0, %v6960_v1 }
 0x191   :  { %1619 = vmatprep.mubr.f32.mxu0 %v1402_v15  ;;  %v146_v23 = vpop.permute.xlu1 %145  ;;  %v6863_v15 = vld [vmem:[%s9125_s0 + $0xe8] sm:$0xff] }
 0x192   :  { %6588 = vset.pattern.permute.xlu1 %v6963_v11  ;;  %1620 = vmatmul.mubr.f32.gmra.mxu0 %v1401_v59  ;;  %vm221_vm10 = vcmp.eq.s32.totalorder %v7365_v21, %v146_v23  ;;  %vm222_vm12 = vcmp.eq.s32.totalorder %v7374_v24, %v146_v23 }
 0x193   :  { %460 = vperm.xlu1 %6588, %v83_v37   ;;  %1624 = vmatprep.mubr.f32.mxu0 %v1404_v62  ;;  %v5700_v2 = vsel %vm221_vm10, 1.0, %v6960_v1  ;;  %v5701_v16 = vsel %vm222_vm12, 1.0, %v6960_v1  ;;  %vm866_vm10 = vcmp.eq.s32.totalorder %v7374_v24, %v7872_v38 }
 0x194   :  { %v5833_v23 = vsel %vm866_vm10, 1.0, %v6960_v1 }
 0x196   :  { %1625 = vmatmul.mubr.f32.gmra.mxu0 %v1403_v7  ;;  %v434_v20 = vpop.permute.xlu1 %433 }
 0x197   :  { %6590 = vset.pattern.permute.xlu1 %v6959_v0  ;;  %vm509_vm8 = vcmp.eq.s32.totalorder %v7365_v21, %v434_v20  ;;  %vm510_vm9 = vcmp.eq.s32.totalorder %v7374_v24, %v434_v20 }
 0x198   :  { %812 = vperm.xlu1 %6590, %v83_v37   ;;  %v5764_v54 = vsel %vm509_vm8, 1.0, %v6960_v1  ;;  %v5765_v51 = vsel %vm510_vm9, 1.0, %v6960_v1 }
 0x199   :  { %v701_v26 = vadd.f32 %v5764_v54, %v5700_v2  ;;  %v702_v8 = vadd.f32 %v5765_v51, %v5701_v16  ;;  %v8130_v54 = vld [vmem:[%s9125_s0 + $0xf8] sm:$0xff] }
 0x19b   :  { %v786_v63 = vpop.permute.xlu1 %785 }
 0x19c   :  { %6591 = vset.pattern.permute.xlu1 %v6961_v6  ;;  %vm861_vm11 = vcmp.eq.s32.totalorder %v7365_v21, %v786_v63  ;;  %vm862_vm13 = vcmp.eq.s32.totalorder %v7374_v24, %v786_v63 }
 0x19d   :  { %175 = vperm.xlu1 %6591, %v7675_v39   ;;  %v5828_v3 = vsel %vm861_vm11, 1.0, %v6960_v1  ;;  %v5829_v5 = vsel %vm862_vm13, 1.0, %v6960_v1 }
 0x19e   :  { %v1053_v61 = vadd.f32 %v5828_v3, %v701_v26  ;;  %v1054_v14 = vadd.f32 %v5829_v5, %v702_v8 }
 0x1a0   :  { %v8026_v50 = vpop.permute.xlu1 %148 }
 0x1a1   :  { %6593 = vset.pattern.permute.xlu1 %v6962_v9  ;;  %vm223_vm6 = vcmp.eq.s32.totalorder %v7365_v21, %v8026_v50  ;;  %vm224_vm8 = vcmp.eq.s32.totalorder %v7374_v24, %v8026_v50 }
 0x1a2   :  { %1164 = vperm.xlu1 %6593, %v83_v37   ;;  %v5705_v37 = vsel %vm226_vm4, 1.0, %v6960_v1  ;;  %v5702_v56 = vsel %vm223_vm6, 1.0, %v6960_v1  ;;  %v5703_v60 = vsel %vm224_vm8, 1.0, %v6960_v1 }
 0x1a3   :  { %v703_v7 = vadd.f32 %v5766_v31, %v5702_v56  ;;  %v704_v50 = vadd.f32 %v5767_v46, %v5703_v60 }
 0x1a5   :  { %v1536_v17 = vpop.f32.mrf.mxu0  ;;  %v1138_v22 = vpop.permute.xlu1 %1137 }
 0x1a6   :  { %v1537_v29 = vadd.f32 %v8037_v18, %v1536_v17  ;;  %vm1213_vm14 = vcmp.eq.s32.totalorder %v7365_v21, %v1138_v22  ;;  %vm1214_vm15 = vcmp.eq.s32.totalorder %v7374_v24, %v1138_v22  ;;  %6594 = vset.pattern.permute.xlu1 %v6959_v0  ;;  %v5897_v17 = vsel %vm1218_vm1, 1.0, %v6960_v1 }
 0x1a7   :  { %v5892_v25 = vsel %vm1213_vm14, 1.0, %v6960_v1  ;;  %v5893_v19 = vsel %vm1214_vm15, 1.0, %v6960_v1  ;;  %v1538_v28 = vpop.f32.mrf.mxu0  ;;  %815 = vperm.xlu1 %6594, %v7675_v39   ;;  %vm1217_vm15 = vcmp.eq.s32.totalorder %v7365_v21, %v1144_v42 }
 0x1a8   :  { %vm1695_vm0 = vcmp.gt.f32.partialorder %v1537_v29, 0.0  ;;  %v1727_v41 = vmul.f32 0.01, %v1537_v29  ;;  %v1406_v33 = vadd.f32 %v5893_v19, %v1054_v14  ;;  %v1405_v4 = vadd.f32 %v5892_v25, %v1053_v61 }
 0x1a9   :  { %v1541_v35 = vpop.f32.mrf.mxu0 }
 0x1aa   :  { %v8052_v36 = vsel %vm1695_vm0, %v1537_v29, %v1727_v41  ;;  %v1542_v32 = vadd.f32 %v8037_v18, %v1541_v35  ;;  %1629 = vmatprep.mubr.f32.mxu0 %v1406_v33  ;;  %v789_v39 = vpop.permute.xlu1 %788 }
 0x1ab   :  { %9164 = vst [vmem:[#allocation14_spill] sm:$0xff] %v8052_v36  ;;  %v1543_v43 = vpop.f32.mrf.mxu0  ;;  %1888 = vmatmul.mubr.f32.vlgmr.msra.gmra.mxu1 %v8052_v36  ;;  %6595 = vset.pattern.permute.xlu1 %v6963_v11  ;;  %vm863_vm9 = vcmp.eq.s32.totalorder %v7365_v21, %v789_v39  ;;  %vm864_vm11 = vcmp.eq.s32.totalorder %v7374_v24, %v789_v39 }
 0x1ac   :  { %vm1696_vm7 = vcmp.gt.f32.partialorder %v1542_v32, 0.0  ;;  %v1728_v44 = vmul.f32 0.01, %v1542_v32  ;;  %1630 = vmatmul.mubr.f32.gmra.mxu0 %v1405_v4  ;;  %466 = vperm.xlu1 %6595, %v7780_v34   ;;  %v5830_v48 = vsel %vm863_vm9, 1.0, %v6960_v1  ;;  %v5831_v20 = vsel %vm864_vm11, 1.0, %v6960_v1 }
 0x1ad   :  { %v1546_v55 = vpop.f32.mrf.mxu0  ;;  %1893 = vmatprep.mubr.f32.mxu1 %v6960_v1  ;;  %v1055_v2 = vadd.f32 %v5830_v48, %v703_v7  ;;  %v1056_v26 = vadd.f32 %v5831_v20, %v704_v50  ;;  %v5896_v4 = vsel %vm1217_vm15, 1.0, %v6960_v1 }
 0x1ae   :  { %v8079_v34 = vsel %vm1696_vm7, %v1542_v32, %v1728_v44  ;;  %v1547_v45 = vadd.f32 %v8037_v18, %v1546_v55 }
 0x1af   :  { %9165 = vst [vmem:[#allocation15_spill] sm:$0xff] %v8079_v34  ;;  %v1548_v10 = vpop.f32.mrf.mxu0  ;;  %1894 = vmatmul.mubr.f32.gmra.mxu1 %v8079_v34  ;;  %v440_v47 = vpop.permute.xlu1 %439 }
 0x1b0   :  { %vm1697_vm12 = vcmp.gt.f32.partialorder %v1547_v45, 0.0  ;;  %v1729_v30 = vmul.f32 0.01, %v1547_v45  ;;  %vm513_vm13 = vcmp.eq.s32.totalorder %v7365_v21, %v440_v47  ;;  %vm514_vm14 = vcmp.eq.s32.totalorder %v7374_v24, %v440_v47  ;;  %6596 = vset.pattern.permute.xlu1 %v6962_v9  ;;  %1899 = vmatprep.mubr.f32.mxu1 %v6960_v1 }
 0x1b1   :  { %v5769_v40 = vsel %vm514_vm14, 1.0, %v6960_v1  ;;  %v1551_v27 = vpop.f32.mrf.mxu0  ;;  %1167 = vperm.xlu1 %6596, %v6863_v15   ;;  %v5768_v57 = vsel %vm513_vm13, 1.0, %v6960_v1 }
 0x1b2   :  { %v8114_v59 = vsel %vm1697_vm12, %v1547_v45, %v1729_v30  ;;  %v706_v49 = vadd.f32 %v5769_v40, %v5705_v37  ;;  %v1552_v62 = vadd.f32 %v8037_v18, %v1551_v27  ;;  %v705_v3 = vadd.f32 %v5768_v57, %v5704_v52 }
 0x1b3   :  { %9166 = vst [vmem:[#allocation16_spill] sm:$0xff] %v8114_v59  ;;  %v1553_v63 = vpop.f32.mrf.mxu0  ;;  %1900 = vmatmul.mubr.f32.gmra.mxu1 %v8114_v59 }
 0x1b4   :  { %vm1698_vm0 = vcmp.gt.f32.partialorder %v1552_v62, 0.0  ;;  %v1730_v51 = vmul.f32 0.01, %v1552_v62  ;;  %v1141_v38 = vpop.permute.xlu1 %1140  ;;  %1905 = vmatprep.mubr.f32.mxu1 %v6960_v1  ;;  %v1058_v8 = vadd.f32 %v5833_v23, %v706_v49 }
 0x1b5   :  { %vm1215_vm2 = vcmp.eq.s32.totalorder %v7365_v21, %v1141_v38  ;;  %vm1216_vm3 = vcmp.eq.s32.totalorder %v7374_v24, %v1141_v38  ;;  %v1556_v16 = vpop.f32.mrf.mxu0  ;;  %6598 = vset.pattern.permute.xlu1 %v6961_v6  ;;  %v1057_v6 = vadd.f32 %v5832_v12, %v705_v3 }
 0x1b6   :  { %v8137_v5 = vsel %vm1698_vm0, %v1552_v62, %v1730_v51  ;;  %v5894_v61 = vsel %vm1215_vm2, 1.0, %v6960_v1  ;;  %181 = vperm.xlu1 %6598, %v8130_v54   ;;  %v5895_v22 = vsel %vm1216_vm3, 1.0, %v6960_v1  ;;  %v1557_v14 = vadd.f32 %v8037_v18, %v1556_v16 }
 0x1b7   :  { %9167 = vst [vmem:[#allocation17_spill] sm:$0xff] %v8137_v5  ;;  %v1558_v29 = vpop.f32.mrf.mxu0  ;;  %1906 = vmatmul.mubr.f32.gmra.mxu1 %v8137_v5  ;;  %v1407_v25 = vadd.f32 %v5894_v61, %v1055_v2  ;;  %v1408_v19 = vadd.f32 %v5895_v22, %v1056_v26  ;;  %v1410_v35 = vadd.f32 %v5897_v17, %v1058_v8 }
 0x1b8   :  { %1911 = vmatprep.mubr.f32.mxu1 %v6960_v1  ;;  %vm1699_vm4 = vcmp.gt.f32.partialorder %v1557_v14, 0.0  ;;  %v1731_v28 = vmul.f32 0.01, %v1557_v14  ;;  %v1409_v31 = vadd.f32 %v5896_v4, %v1057_v6  ;;  %vm232_vm0 = vcmp.eq.s32.totalorder %v7374_v24, %v7697_v13 }
 0x1b9   :  { %v1561_v41 = vpop.f32.mrf.mxu0  ;;  %v155_v33 = vpop.permute.xlu1 %154  ;;  %1634 = vmatprep.mubr.f32.mxu0 %v1408_v19  ;;  %v5711_v26 = vsel %vm232_vm0, 1.0, %v6960_v1 }
 0x1ba   :  { %v1562_v32 = vadd.f32 %v8037_v18, %v1561_v41  ;;  %6599 = vset.pattern.permute.xlu1 %v6963_v11  ;;  %v8151_v39 = vsel %vm1699_vm4, %v1557_v14, %v1731_v28  ;;  %1635 = vmatmul.mubr.f32.gmra.mxu0 %v1407_v25  ;;  %vm227_vm9 = vcmp.eq.s32.totalorder %v7365_v21, %v155_v33 }
 0x1bb   :  { %v1563_v43 = vpop.f32.mrf.mxu0  ;;  %469 = vperm.xlu1 %6599, %v8130_v54   ;;  %1912 = vmatmul.mubr.f32.gmra.mxu1 %v8151_v39  ;;  %vm228_vm10 = vcmp.eq.s32.totalorder %v7374_v24, %v155_v33  ;;  %v5706_v42 = vsel %vm227_vm9, 1.0, %v6960_v1  ;;  %vm871_vm9 = vcmp.eq.s32.totalorder %v7365_v21, %v7885_v58 }
 0x1bc   :  { %vm1700_vm6 = vcmp.gt.f32.partialorder %v1562_v32, 0.0  ;;  %v1732_v44 = vmul.f32 0.01, %v1562_v32  ;;  %1639 = vmatprep.mubr.f32.mxu0 %v1410_v35  ;;  %1917 = vmatprep.mubr.f32.mxu1 %v6960_v1  ;;  %v5707_v12 = vsel %vm228_vm10, 1.0, %v6960_v1 }
 0x1bd   :  { %v1566_v46 = vpop.f32.mrf.mxu0 }
 0x1be   :  { %v8156_v52 = vsel %vm1700_vm6, %v1562_v32, %v1732_v44  ;;  %v1567_v55 = vadd.f32 %v8037_v18, %v1566_v46  ;;  %v443_v11 = vpop.permute.xlu1 %442  ;;  %1640 = vmatmul.mubr.f32.gmra.mxu0 %v1409_v31  ;;  %vm872_vm6 = vcmp.eq.s32.totalorder %v7374_v24, %v7885_v58  ;;  %v5838_v32 = vsel %vm871_vm9, 1.0, %v6960_v1 }
 0x1bf   :  { %v1568_v45 = vpop.f32.mrf.mxu0  ;;  %6601 = vset.pattern.permute.xlu1 %v6959_v0  ;;  %1918 = vmatmul.mubr.f32.gmra.mxu1 %v8156_v52  ;;  %vm515_vm5 = vcmp.eq.s32.totalorder %v7365_v21, %v443_v11  ;;  %vm516_vm8 = vcmp.eq.s32.totalorder %v7374_v24, %v443_v11  ;;  %v8169_v0 = vpop.permute.xlu0 %1152  ;;  %v5839_v29 = vsel %vm872_vm6, 1.0, %v6960_v1 }
 0x1c0   :  { %vm1701_vm7 = vcmp.gt.f32.partialorder %v1567_v55, 0.0  ;;  %v1733_v37 = vmul.f32 0.01, %v1567_v55  ;;  %821 = vperm.xlu1 %6601, %v8130_v54   ;;  %1923 = vmatprep.mubr.f32.mxu1 %v6960_v1  ;;  %v5771_v47 = vsel %vm516_vm8, 1.0, %v6960_v1  ;;  %vm1223_vm0 = vcmp.eq.s32.totalorder %v7365_v21, %v8169_v0 }
 0x1c1   :  { %v708_v27 = vadd.f32 %v5771_v47, %v5707_v12 }
 0x1c2   :  { %v8163_v56 = vsel %vm1701_vm7, %v1567_v55, %v1733_v37  ;;  %vm231_vm7 = vcmp.eq.s32.totalorder %v7365_v21, %v7697_v13 }
 0x1c3   :  { %v795_v10 = vpop.permute.xlu1 %794  ;;  %1924 = vmatmul.mubr.f32.gmra.mxu1 %v8163_v56  ;;  %v8183_v15 = vpop.permute.xlu0 %1161  ;;  %v5710_v58 = vsel %vm231_vm7, 1.0, %v6960_v1 }
 0x1c4   :  { %6602 = vset.pattern.permute.xlu1 %v6962_v9  ;;  %1929 = vmatprep.mubr.f32.mxu1 %v6960_v1  ;;  %vm867_vm11 = vcmp.eq.s32.totalorder %v7365_v21, %v795_v10  ;;  %vm868_vm12 = vcmp.eq.s32.totalorder %v7374_v24, %v795_v10  ;;  %v5770_v9 = vsel %vm515_vm5, 1.0, %v6960_v1 }
 0x1c5   :  { %1173 = vperm.xlu1 %6602, %v8130_v54   ;;  %v5834_v60 = vsel %vm867_vm11, 1.0, %v6960_v1  ;;  %v5835_v48 = vsel %vm868_vm12, 1.0, %v6960_v1  ;;  %v707_v40 = vadd.f32 %v5770_v9, %v5706_v42  ;;  %vm1224_vm12 = vcmp.eq.s32.totalorder %v7374_v24, %v8169_v0 }
 0x1c6   :  { %v1060_v23 = vadd.f32 %v5835_v48, %v708_v27  ;;  %v5903_v13 = vsel %vm1224_vm12, 1.0, %v6960_v1  ;;  %v5902_v27 = vsel %vm1223_vm0, 1.0, %v6960_v1 }
 0x1c7   :  { %v1059_v62 = vadd.f32 %v5834_v60, %v707_v40  ;;  %v446_v3 = vpop.permute.xlu0 %445 }
 0x1c8   :  { %v158_v30 = vpop.permute.xlu1 %157  ;;  %vm517_vm1 = vcmp.eq.s32.totalorder %v7365_v21, %v446_v3  ;;  %vm518_vm2 = vcmp.eq.s32.totalorder %v7374_v24, %v446_v3 }
 0x1c9   :  { %vm229_vm3 = vcmp.eq.s32.totalorder %v7365_v21, %v158_v30  ;;  %vm230_vm4 = vcmp.eq.s32.totalorder %v7374_v24, %v158_v30  ;;  %v5772_v8 = vsel %vm517_vm1, 1.0, %v6960_v1  ;;  %v5773_v61 = vsel %vm518_vm2, 1.0, %v6960_v1 }
 0x1ca   :  { %v5708_v17 = vsel %vm229_vm3, 1.0, %v6960_v1  ;;  %v5709_v22 = vsel %vm230_vm4, 1.0, %v6960_v1 }
 0x1cb   :  { %v1571_v57 = vpop.f32.mrf.mxu0  ;;  %v709_v41 = vadd.f32 %v5772_v8, %v5708_v17  ;;  %v710_v33 = vadd.f32 %v5773_v61, %v5709_v22 }
 0x1cc   :  { %v1572_v49 = vadd.f32 %v8037_v18, %v1571_v57 }
 0x1cd   :  { %v1573_v7 = vpop.f32.mrf.mxu0  ;;  %v1147_v20 = vpop.permute.xlu1 %1146 }
 0x1ce   :  { %vm1702_vm13 = vcmp.gt.f32.partialorder %v1572_v49, 0.0  ;;  %v1734_v63 = vmul.f32 0.01, %v1572_v49  ;;  %vm1219_vm14 = vcmp.eq.s32.totalorder %v7365_v21, %v1147_v20  ;;  %vm1220_vm15 = vcmp.eq.s32.totalorder %v7374_v24, %v1147_v20 }
 0x1cf   :  { %v5898_v54 = vsel %vm1219_vm14, 1.0, %v6960_v1  ;;  %v5899_v50 = vsel %vm1220_vm15, 1.0, %v6960_v1 }
 0x1d0   :  { %v8190_v51 = vsel %vm1702_vm13, %v1572_v49, %v1734_v63  ;;  %v1412_v38 = vadd.f32 %v5899_v50, %v1060_v23  ;;  %v1411_v2 = vadd.f32 %v5898_v54, %v1059_v62  ;;  %v455_v63 = vpop.permute.xlu0 %454 }
 0x1d1   :  { %1930 = vmatmul.mubr.f32.gmra.mxu1 %v8190_v51  ;;  %vm524_vm12 = vcmp.eq.s32.totalorder %v7374_v24, %v455_v63 }
 0x1d2   :  { %1644 = vmatprep.mubr.f32.mxu0 %v1412_v38  ;;  %v798_v16 = vpop.permute.xlu1 %797  ;;  %1935 = vmatprep.mubr.f32.mxu1 %v6960_v1 }
 0x1d3   :  { %1645 = vmatmul.mubr.f32.gmra.mxu0 %v1411_v2  ;;  %vm869_vm5 = vcmp.eq.s32.totalorder %v7365_v21, %v798_v16  ;;  %vm870_vm8 = vcmp.eq.s32.totalorder %v7374_v24, %v798_v16 }
 0x1d4   :  { %v5836_v25 = vsel %vm869_vm5, 1.0, %v6960_v1  ;;  %v5837_v19 = vsel %vm870_vm8, 1.0, %v6960_v1  ;;  %v8257_v22 = vpop.permute.xlu0 %463 }
 0x1d5   :  { %v1061_v44 = vadd.f32 %v5836_v25, %v709_v41  ;;  %v1062_v31 = vadd.f32 %v5837_v19, %v710_v33 }
 0x1d7   :  { %v449_v14 = vpop.permute.xlu1 %448 }
 0x1d8   :  { %vm519_vm10 = vcmp.eq.s32.totalorder %v7365_v21, %v449_v14  ;;  %vm520_vm11 = vcmp.eq.s32.totalorder %v7374_v24, %v449_v14 }
 0x1d9   :  { %v5774_v6 = vsel %vm519_vm10, 1.0, %v6960_v1  ;;  %v5775_v28 = vsel %vm520_vm11, 1.0, %v6960_v1  ;;  %vm523_vm11 = vcmp.eq.s32.totalorder %v7365_v21, %v455_v63 }
 0x1da   :  { %v712_v4 = vadd.f32 %v5775_v28, %v5711_v26  ;;  %v1576_v35 = vpop.f32.mrf.mxu0  ;;  %v711_v46 = vadd.f32 %v5774_v6, %v5710_v58 }
 0x1db   :  { %v1577_v43 = vadd.f32 %v8037_v18, %v1576_v35 }
 0x1dc   :  { %v1578_v55 = vpop.f32.mrf.mxu0  ;;  %v1150_v11 = vpop.permute.xlu1 %1149  ;;  %v1064_v45 = vadd.f32 %v5839_v29, %v712_v4  ;;  %v1063_v40 = vadd.f32 %v5838_v32, %v711_v46 }
 0x1dd   :  { %vm1703_vm13 = vcmp.gt.f32.partialorder %v1577_v43, 0.0  ;;  %v1735_v37 = vmul.f32 0.01, %v1577_v43  ;;  %vm1221_vm14 = vcmp.eq.s32.totalorder %v7365_v21, %v1150_v11  ;;  %vm1222_vm15 = vcmp.eq.s32.totalorder %v7374_v24, %v1150_v11  ;;  %v170_v32 = vpop.permute.xlu0 %169 }
 0x1de   :  { %v5900_v10 = vsel %vm1221_vm14, 1.0, %v6960_v1  ;;  %v5901_v9 = vsel %vm1222_vm15, 1.0, %v6960_v1  ;;  %v1581_v47 = vpop.f32.mrf.mxu0  ;;  %v1416_v49 = vadd.f32 %v5903_v13, %v1064_v45  ;;  %v1415_v23 = vadd.f32 %v5902_v27, %v1063_v40 }
 0x1df   :  { %v8235_v30 = vsel %vm1703_vm13, %v1577_v43, %v1735_v37  ;;  %v1582_v42 = vadd.f32 %v8037_v18, %v1581_v47  ;;  %v1414_v12 = vadd.f32 %v5901_v9, %v1062_v31  ;;  %v1413_v60 = vadd.f32 %v5900_v10, %v1061_v44 }
 0x1e0   :  { %v1583_v48 = vpop.f32.mrf.mxu0  ;;  %1936 = vmatmul.mubr.f32.gmra.mxu1 %v8235_v30  ;;  %vm238_vm15 = vcmp.eq.s32.totalorder %v7374_v24, %v170_v32  ;;  %vm237_vm0 = vcmp.eq.s32.totalorder %v7365_v21, %v170_v32  ;;  %v5778_v44 = vsel %vm523_vm11, 1.0, %v6960_v1  ;;  %v5779_v31 = vsel %vm524_vm12, 1.0, %v6960_v1 }
 0x1e1   :  { %vm1704_vm1 = vcmp.gt.f32.partialorder %v1582_v42, 0.0  ;;  %v1736_v0 = vmul.f32 0.01, %v1582_v42  ;;  %1649 = vmatprep.mubr.f32.mxu0 %v1414_v12  ;;  %v164_v57 = vpop.permute.xlu1 %163  ;;  %1941 = vmatprep.mubr.f32.mxu1 %v6960_v1  ;;  %v5717_v11 = vsel %vm238_vm15, 1.0, %v6960_v1  ;;  %v5716_v37 = vsel %vm237_vm0, 1.0, %v6960_v1 }
 0x1e2   :  { %1650 = vmatmul.mubr.f32.gmra.mxu0 %v1413_v60  ;;  %vm233_vm4 = vcmp.eq.s32.totalorder %v7365_v21, %v164_v57  ;;  %vm234_vm6 = vcmp.eq.s32.totalorder %v7374_v24, %v164_v57  ;;  %vm1229_vm11 = vcmp.eq.s32.totalorder %v7365_v21, %v8183_v15 }
 0x1e3   :  { %v8241_v62 = vsel %vm1704_vm1, %v1582_v42, %v1736_v0  ;;  %1654 = vmatprep.mubr.f32.mxu0 %v1416_v49  ;;  %v5712_v2 = vsel %vm233_vm4, 1.0, %v6960_v1  ;;  %v5713_v3 = vsel %vm234_vm6, 1.0, %v6960_v1 }
 0x1e4   :  { %1942 = vmatmul.mubr.f32.gmra.mxu1 %v8241_v62 }
 0x1e5   :  { %1947 = vmatprep.mubr.f32.mxu1 %v6960_v1 }
 0x1e6   :  { %1655 = vmatmul.mubr.f32.gmra.mxu0 %v1415_v23  ;;  %v452_v7 = vpop.permute.xlu1 %451 }
 0x1e7   :  { %vm521_vm2 = vcmp.eq.s32.totalorder %v7365_v21, %v452_v7  ;;  %vm522_vm3 = vcmp.eq.s32.totalorder %v7374_v24, %v452_v7 }
 0x1e8   :  { %v5776_v54 = vsel %vm521_vm2, 1.0, %v6960_v1  ;;  %v5777_v50 = vsel %vm522_vm3, 1.0, %v6960_v1  ;;  %vm878_vm3 = vcmp.eq.s32.totalorder %v7374_v24, %v7895_v53 }
 0x1e9   :  { %v713_v8 = vadd.f32 %v5776_v54, %v5712_v2  ;;  %v714_v61 = vadd.f32 %v5777_v50, %v5713_v3  ;;  %v5845_v40 = vsel %vm878_vm3, 1.0, %v6960_v1 }
 0x1eb   :  { %v804_v20 = vpop.permute.xlu1 %803 }
 0x1ec   :  { %vm873_vm7 = vcmp.eq.s32.totalorder %v7365_v21, %v804_v20  ;;  %vm874_vm5 = vcmp.eq.s32.totalorder %v7374_v24, %v804_v20 }
 0x1ed   :  { %v5840_v16 = vsel %vm873_vm7, 1.0, %v6960_v1  ;;  %v5841_v26 = vsel %vm874_vm5, 1.0, %v6960_v1  ;;  %vm877_vm7 = vcmp.eq.s32.totalorder %v7365_v21, %v7895_v53  ;;  %vm1230_vm5 = vcmp.eq.s32.totalorder %v7374_v24, %v8183_v15 }
 0x1ee   :  { %v1065_v29 = vadd.f32 %v5840_v16, %v713_v8  ;;  %v1066_v25 = vadd.f32 %v5841_v26, %v714_v61  ;;  %v5844_v53 = vsel %vm877_vm7, 1.0, %v6960_v1  ;;  %v5909_v8 = vsel %vm1230_vm5, 1.0, %v6960_v1 }
 0x1ef   :  { %vm529_vm7 = vcmp.eq.s32.totalorder %v7365_v21, %v8257_v22  ;;  %vm530_vm5 = vcmp.eq.s32.totalorder %v7374_v24, %v8257_v22 }
 0x1f0   :  { %v167_v38 = vpop.permute.xlu1 %166 }
 0x1f1   :  { %vm235_vm13 = vcmp.eq.s32.totalorder %v7365_v21, %v167_v38  ;;  %vm236_vm14 = vcmp.eq.s32.totalorder %v7374_v24, %v167_v38 }
 0x1f2   :  { %v5714_v46 = vsel %vm235_vm13, 1.0, %v6960_v1  ;;  %v5715_v55 = vsel %vm236_vm14, 1.0, %v6960_v1 }
 0x1f3   :  { %v1586_v17 = vpop.f32.mrf.mxu0  ;;  %v715_v42 = vadd.f32 %v5778_v44, %v5714_v46  ;;  %v716_v12 = vadd.f32 %v5779_v31, %v5715_v55 }
 0x1f4   :  { %v1587_v14 = vadd.f32 %v8037_v18, %v1586_v17 }
 0x1f5   :  { %v1588_v19 = vpop.f32.mrf.mxu0  ;;  %v1156_v6 = vpop.permute.xlu1 %1155 }
 0x1f6   :  { %vm1705_vm8 = vcmp.gt.f32.partialorder %v1587_v14, 0.0  ;;  %v1737_v28 = vmul.f32 0.01, %v1587_v14  ;;  %vm1225_vm9 = vcmp.eq.s32.totalorder %v7365_v21, %v1156_v6  ;;  %vm1226_vm10 = vcmp.eq.s32.totalorder %v7374_v24, %v1156_v6 }
 0x1f7   :  { %v5904_v41 = vsel %vm1225_vm9, 1.0, %v6960_v1  ;;  %v5905_v33 = vsel %vm1226_vm10, 1.0, %v6960_v1  ;;  %v5908_v19 = vsel %vm1229_vm11, 1.0, %v6960_v1 }
 0x1f8   :  { %v8264_v4 = vsel %vm1705_vm8, %v1587_v14, %v1737_v28  ;;  %v1417_v35 = vadd.f32 %v5904_v41, %v1065_v29  ;;  %v1418_v58 = vadd.f32 %v5905_v33, %v1066_v25 }
 0x1f9   :  { %1948 = vmatmul.mubr.f32.gmra.mxu1 %v8264_v4 }
 0x1fa   :  { %1659 = vmatprep.mubr.f32.mxu0 %v1418_v58  ;;  %v807_v43 = vpop.permute.xlu1 %806  ;;  %1953 = vmatprep.mubr.f32.mxu1 %v6960_v1 }
 0x1fb   :  { %1660 = vmatmul.mubr.f32.gmra.mxu0 %v1417_v35  ;;  %vm875_vm1 = vcmp.eq.s32.totalorder %v7365_v21, %v807_v43  ;;  %vm876_vm2 = vcmp.eq.s32.totalorder %v7374_v24, %v807_v43 }
 0x1fc   :  { %v5842_v13 = vsel %vm875_vm1, 1.0, %v6960_v1  ;;  %v5843_v10 = vsel %vm876_vm2, 1.0, %v6960_v1 }
 0x1fd   :  { %v1067_v0 = vadd.f32 %v5842_v13, %v715_v42  ;;  %v1068_v57 = vadd.f32 %v5843_v10, %v716_v12 }
 0x1ff   :  { %v458_v45 = vpop.permute.xlu1 %457 }
 0x200   :  { %vm525_vm4 = vcmp.eq.s32.totalorder %v7365_v21, %v458_v45  ;;  %vm526_vm6 = vcmp.eq.s32.totalorder %v7374_v24, %v458_v45 }
 0x201   :  { %v5780_v9 = vsel %vm525_vm4, 1.0, %v6960_v1  ;;  %v5781_v47 = vsel %vm526_vm6, 1.0, %v6960_v1 }
 0x202   :  { %v718_v60 = vadd.f32 %v5781_v47, %v5717_v11  ;;  %v1591_v48 = vpop.f32.mrf.mxu0  ;;  %v717_v49 = vadd.f32 %v5780_v9, %v5716_v37  ;;  %v179_v37 = vpop.permute.xlu0 %178 }
 0x203   :  { %v1592_v27 = vadd.f32 %v8037_v18, %v1591_v48  ;;  %vm244_vm11 = vcmp.eq.s32.totalorder %v7374_v24, %v179_v37 }
 0x204   :  { %v1070_v23 = vadd.f32 %v5845_v40, %v718_v60  ;;  %v1593_v7 = vpop.f32.mrf.mxu0  ;;  %v1159_v20 = vpop.permute.xlu1 %1158  ;;  %v1069_v61 = vadd.f32 %v5844_v53, %v717_v49  ;;  %v5784_v49 = vsel %vm529_vm7, 1.0, %v6960_v1 }
 0x205   :  { %vm1706_vm8 = vcmp.gt.f32.partialorder %v1592_v27, 0.0  ;;  %v1738_v63 = vmul.f32 0.01, %v1592_v27  ;;  %vm1227_vm9 = vcmp.eq.s32.totalorder %v7365_v21, %v1159_v20  ;;  %vm1228_vm10 = vcmp.eq.s32.totalorder %v7374_v24, %v1159_v20 }
 0x206   :  { %v5906_v54 = vsel %vm1227_vm9, 1.0, %v6960_v1  ;;  %v5907_v50 = vsel %vm1228_vm10, 1.0, %v6960_v1  ;;  %v1596_v38 = vpop.f32.mrf.mxu0  ;;  %v1422_v25 = vadd.f32 %v5909_v8, %v1070_v23  ;;  %v1421_v15 = vadd.f32 %v5908_v19, %v1069_v61 }
 0x207   :  { %v8301_v2 = vsel %vm1706_vm8, %v1592_v27, %v1738_v63  ;;  %v1419_v3 = vadd.f32 %v5906_v54, %v1067_v0  ;;  %v1420_v16 = vadd.f32 %v5907_v50, %v1068_v57  ;;  %v1597_v26 = vadd.f32 %v8037_v18, %v1596_v38  ;;  %v819_v57 = vpop.permute.xlu0 %818 }
 0x208   :  { %v1598_v17 = vpop.f32.mrf.mxu0  ;;  %1954 = vmatmul.mubr.f32.gmra.mxu1 %v8301_v2  ;;  %vm243_vm10 = vcmp.eq.s32.totalorder %v7365_v21, %v179_v37  ;;  %v5785_v23 = vsel %vm530_vm5, 1.0, %v6960_v1  ;;  %v5723_v63 = vsel %vm244_vm11, 1.0, %v6960_v1 }
 0x209   :  { %vm1707_vm12 = vcmp.gt.f32.partialorder %v1597_v26, 0.0  ;;  %v1739_v14 = vmul.f32 0.01, %v1597_v26  ;;  %1664 = vmatprep.mubr.f32.mxu0 %v1420_v16  ;;  %v173_v29 = vpop.permute.xlu1 %172  ;;  %1959 = vmatprep.mubr.f32.mxu1 %v6960_v1  ;;  %v5722_v20 = vsel %vm243_vm10, 1.0, %v6960_v1 }
 0x20a   :  { %1665 = vmatmul.mubr.f32.gmra.mxu0 %v1419_v3  ;;  %vm239_vm15 = vcmp.eq.s32.totalorder %v7365_v21, %v173_v29  ;;  %vm240_vm0 = vcmp.eq.s32.totalorder %v7374_v24, %v173_v29 }
 0x20b   :  { %v8313_v6 = vsel %vm1707_vm12, %v1597_v26, %v1739_v14  ;;  %1669 = vmatprep.mubr.f32.mxu0 %v1422_v25  ;;  %v5718_v32 = vsel %vm239_vm15, 1.0, %v6960_v1  ;;  %v5719_v43 = vsel %vm240_vm0, 1.0, %v6960_v1  ;;  %vm884_vm12 = vcmp.eq.s32.totalorder %v7374_v24, %v819_v57  ;;  %v1171_v50 = vpop.permute.xlu0 %1170 }
 0x20c   :  { %1960 = vmatmul.mubr.f32.gmra.mxu1 %v8313_v6  ;;  %vm883_vm15 = vcmp.eq.s32.totalorder %v7365_v21, %v819_v57  ;;  %v5851_v54 = vsel %vm884_vm12, 1.0, %v6960_v1  ;;  %vm1235_vm7 = vcmp.eq.s32.totalorder %v7365_v21, %v1171_v50 }
 0x20d   :  { %1965 = vmatprep.mubr.f32.mxu1 %v6960_v1  ;;  %v5850_v29 = vsel %vm883_vm15, 1.0, %v6960_v1 }
 0x20e   :  { %1670 = vmatmul.mubr.f32.gmra.mxu0 %v1421_v15  ;;  %v461_v28 = vpop.permute.xlu1 %460 }
 0x20f   :  { %vm527_vm13 = vcmp.eq.s32.totalorder %v7365_v21, %v461_v28  ;;  %vm528_vm14 = vcmp.eq.s32.totalorder %v7374_v24, %v461_v28 }
 0x210   :  { %v5782_v33 = vsel %vm527_vm13, 1.0, %v6960_v1  ;;  %v5783_v35 = vsel %vm528_vm14, 1.0, %v6960_v1 }
 0x211   :  { %v719_v46 = vadd.f32 %v5782_v33, %v5718_v32  ;;  %v720_v55 = vadd.f32 %v5783_v35, %v5719_v43 }
 0x213   :  { %v813_v41 = vpop.permute.xlu1 %812 }
 0x214   :  { %vm879_vm1 = vcmp.eq.s32.totalorder %v7365_v21, %v813_v41  ;;  %vm880_vm2 = vcmp.eq.s32.totalorder %v7374_v24, %v813_v41 }
 0x215   :  { %v5846_v44 = vsel %vm879_vm1, 1.0, %v6960_v1  ;;  %v5847_v31 = vsel %vm880_vm2, 1.0, %v6960_v1  ;;  %vm1236_vm2 = vcmp.eq.s32.totalorder %v7374_v24, %v1171_v50 }
 0x216   :  { %v1071_v13 = vadd.f32 %v5846_v44, %v719_v46  ;;  %v1072_v10 = vadd.f32 %v5847_v31, %v720_v55  ;;  %v5915_v32 = vsel %vm1236_vm2, 1.0, %v6960_v1 }
 0x218   :  { %v176_v58 = vpop.permute.xlu1 %175 }
 0x219   :  { %vm241_vm8 = vcmp.eq.s32.totalorder %v7365_v21, %v176_v58  ;;  %vm242_vm9 = vcmp.eq.s32.totalorder %v7374_v24, %v176_v58 }
 0x21a   :  { %v5720_v22 = vsel %vm241_vm8, 1.0, %v6960_v1  ;;  %v5721_v7 = vsel %vm242_vm9, 1.0, %v6960_v1 }
 0x21b   :  { %v1601_v11 = vpop.f32.mrf.mxu0  ;;  %v721_v8 = vadd.f32 %v5784_v49, %v5720_v22  ;;  %v722_v61 = vadd.f32 %v5785_v23, %v5721_v7 }
 0x21c   :  { %v1602_v45 = vadd.f32 %v8037_v18, %v1601_v11 }
 0x21d   :  { %v1603_v9 = vpop.f32.mrf.mxu0  ;;  %v1165_v47 = vpop.permute.xlu1 %1164 }
 0x21e   :  { %vm1708_vm3 = vcmp.gt.f32.partialorder %v1602_v45, 0.0  ;;  %v1740_v42 = vmul.f32 0.01, %v1602_v45  ;;  %vm1231_vm4 = vcmp.eq.s32.totalorder %v7365_v21, %v1165_v47  ;;  %vm1232_vm6 = vcmp.eq.s32.totalorder %v7374_v24, %v1165_v47 }
 0x21f   :  { %v5910_v12 = vsel %vm1231_vm4, 1.0, %v6960_v1  ;;  %v5911_v60 = vsel %vm1232_vm6, 1.0, %v6960_v1 }
 0x220   :  { %v8334_v48 = vsel %vm1708_vm3, %v1602_v45, %v1740_v42  ;;  %v1423_v40 = vadd.f32 %v5910_v12, %v1071_v13  ;;  %v1424_v27 = vadd.f32 %v5911_v60, %v1072_v10  ;;  %v5914_v10 = vsel %vm1235_vm7, 1.0, %v6960_v1 }
 0x221   :  { %1966 = vmatmul.mubr.f32.gmra.mxu1 %v8334_v48 }
 0x222   :  { %1674 = vmatprep.mubr.f32.mxu0 %v1424_v27  ;;  %v816_v0 = vpop.permute.xlu1 %815  ;;  %1971 = vmatprep.mubr.f32.mxu1 %v6960_v1 }
 0x223   :  { %1675 = vmatmul.mubr.f32.gmra.mxu0 %v1423_v40  ;;  %vm881_vm13 = vcmp.eq.s32.totalorder %v7365_v21, %v816_v0  ;;  %vm882_vm14 = vcmp.eq.s32.totalorder %v7374_v24, %v816_v0 }
 0x224   :  { %v5848_v38 = vsel %vm881_vm13, 1.0, %v6960_v1  ;;  %v5849_v3 = vsel %vm882_vm14, 1.0, %v6960_v1 }
 0x225   :  { %v1073_v19 = vadd.f32 %v5848_v38, %v721_v8  ;;  %v1074_v15 = vadd.f32 %v5849_v3, %v722_v61 }
 0x227   :  { %v467_v53 = vpop.permute.xlu1 %466 }
 0x228   :  { %vm531_vm0 = vcmp.eq.s32.totalorder %v7365_v21, %v467_v53  ;;  %vm532_vm1 = vcmp.eq.s32.totalorder %v7374_v24, %v467_v53 }
 0x229   :  { %v5786_v16 = vsel %vm531_vm0, 1.0, %v6960_v1  ;;  %v5787_v26 = vsel %vm532_vm1, 1.0, %v6960_v1 }
 0x22a   :  { %v724_v17 = vadd.f32 %v5787_v26, %v5723_v63  ;;  %v1606_v14 = vpop.f32.mrf.mxu0  ;;  %v723_v28 = vadd.f32 %v5786_v16, %v5722_v20 }
 0x22b   :  { %v1607_v25 = vadd.f32 %v8037_v18, %v1606_v14 }
 0x22c   :  { %v1076_v41 = vadd.f32 %v5851_v54, %v724_v17  ;;  %v1608_v33 = vpop.f32.mrf.mxu0  ;;  %v1168_v35 = vpop.permute.xlu1 %1167  ;;  %v1075_v37 = vadd.f32 %v5850_v29, %v723_v28 }
 0x22d   :  { %vm1709_vm3 = vcmp.gt.f32.partialorder %v1607_v25, 0.0  ;;  %v1741_v58 = vmul.f32 0.01, %v1607_v25  ;;  %vm1233_vm4 = vcmp.eq.s32.totalorder %v7365_v21, %v1168_v35  ;;  %vm1234_vm6 = vcmp.eq.s32.totalorder %v7374_v24, %v1168_v35 }
 0x22e   :  { %v5912_v43 = vsel %vm1233_vm4, 1.0, %v6960_v1  ;;  %v5913_v44 = vsel %vm1234_vm6, 1.0, %v6960_v1  ;;  %v1611_v31 = vpop.f32.mrf.mxu0  ;;  %v1428_v9 = vadd.f32 %v5915_v32, %v1076_v41  ;;  %v1427_v60 = vadd.f32 %v5914_v10, %v1075_v37 }
 0x22f   :  { %v8372_v46 = vsel %vm1709_vm3, %v1607_v25, %v1741_v58  ;;  %v1425_v55 = vadd.f32 %v5912_v43, %v1073_v19  ;;  %v1426_v11 = vadd.f32 %v5913_v44, %v1074_v15  ;;  %v1612_v45 = vadd.f32 %v8037_v18, %v1611_v31  ;;  %v8417_v44 = vld [vmem:[%s9127_s2] ss:$0 sm:$0xff]  ;;  %s6964_s2 = smov [#allocation7]  }
 0x230   :  { %v1613_v13 = vpop.f32.mrf.mxu0  ;;  %1972 = vmatmul.mubr.f32.gmra.mxu1 %v8372_v46  ;;  %s5633_s28 = sshll.u32 %s6964_s2, 4  ;;  %s5634_s28 = int_to_ptr.vmem [resolvable:$true] %s5633_s28 }
 0x231   :  { %vm1710_vm5 = vcmp.gt.f32.partialorder %v1612_v45, 0.0  ;;  %v1742_v47 = vmul.f32 0.01, %v1612_v45  ;;  %1679 = vmatprep.mubr.f32.mxu0 %v1426_v11  ;;  %v182_v42 = vpop.permute.xlu1 %181  ;;  %1977 = vmatprep.mubr.f32.mxu1 %v6960_v1  ;;  %s6905_s29 = scalar_lea.vmem %s5634_s28, 4096  ;;  %p6910_p11 = scmp.lt.s32.totalorder %s5634_s28, %s5634_s28 }
 0x232   :  { %1680 = vmatmul.mubr.f32.gmra.mxu0 %v1425_v55  ;;  %vm245_vm10 = vcmp.eq.s32.totalorder %v7365_v21, %v182_v42  ;;  %vm246_vm11 = vcmp.eq.s32.totalorder %v7374_v24, %v182_v42  ;;  %p6906_p10 = scmp.ne.s32.totalorder %s5634_s28, %s6905_s29  ;;  %p6911_p12 = scmp.lt.s32.totalorder %s6905_s29, %s6905_s29 }
 0x233   :  { %v8378_v12 = vsel %vm1710_vm5, %v1612_v45, %v1742_v47  ;;  %1684 = vmatprep.mubr.f32.mxu0 %v1428_v9  ;;  %v5724_v49 = vsel %vm245_vm10, 1.0, %v6960_v1  ;;  %v5725_v23 = vsel %vm246_vm11, 1.0, %v6960_v1 }
 0x234   :  { %1978 = vmatmul.mubr.f32.gmra.mxu1 %v8378_v12  ;;  %p6912_p13 = por %p6911_p12, %p6910_p11 }
 0x235   :  { %1983 = vmatprep.mubr.f32.mxu1 %v6960_v1 }
 0x236   :  { %1685 = vmatmul.mubr.f32.gmra.mxu0 %v1427_v60  ;;  %v470_v40 = vpop.permute.xlu1 %469  ;;  %p6913_p0 = pnand %p6912_p13, %p6906_p10 }
 0x237   :  { %vm533_vm8 = vcmp.eq.s32.totalorder %v7365_v21, %v470_v40  ;;  %vm534_vm9 = vcmp.eq.s32.totalorder %v7374_v24, %v470_v40 }
 0x238   :  { %v5788_v0 = vsel %vm533_vm8, 1.0, %v6960_v1  ;;  %v5789_v57 = vsel %vm534_vm9, 1.0, %v6960_v1 }
 0x239   :  { %v725_v20 = vadd.f32 %v5788_v0, %v5724_v49  ;;  %v726_v63 = vadd.f32 %v5789_v57, %v5725_v23 }
 0x23b   :  { %v822_v27 = vpop.permute.xlu1 %821 }
 0x23c   :  { %vm885_vm12 = vcmp.eq.s32.totalorder %v7365_v21, %v822_v27  ;;  %vm886_vm13 = vcmp.eq.s32.totalorder %v7374_v24, %v822_v27 }
 0x23d   :  { %v5852_v22 = vsel %vm885_vm12, 1.0, %v6960_v1  ;;  %v5853_v7 = vsel %vm886_vm13, 1.0, %v6960_v1 }
 0x23e   :  { %v1077_v54 = vadd.f32 %v5852_v22, %v725_v20  ;;  %v1078_v50 = vadd.f32 %v5853_v7, %v726_v63 }
 0x240   :  { %v1174_v53 = vpop.permute.xlu1 %1173 }
 0x241   :  { %vm1237_vm14 = vcmp.eq.s32.totalorder %v7365_v21, %v1174_v53  ;;  %vm1238_vm15 = vcmp.eq.s32.totalorder %v7374_v24, %v1174_v53 }
 0x242   :  { %v5916_v38 = vsel %vm1237_vm14, 1.0, %v6960_v1  ;;  %v5917_v3 = vsel %vm1238_vm15, 1.0, %v6960_v1 }
 0x243   :  { %v1429_v16 = vadd.f32 %v5916_v38, %v1077_v54  ;;  %v1430_v26 = vadd.f32 %v5917_v3, %v1078_v50  ;;  %v1616_v8 = vpop.f32.mrf.mxu0 }
 0x244   :  { %v1617_v61 = vadd.f32 %v8037_v18, %v1616_v8 }
 0x245   :  { %v1618_v17 = vpop.f32.mrf.mxu0  ;;  %1689 = vmatprep.mubr.f32.mxu0 %v1430_v26 }
 0x246   :  { %vm1711_vm0 = vcmp.gt.f32.partialorder %v1617_v61, 0.0  ;;  %v1743_v14 = vmul.f32 0.01, %v1617_v61  ;;  %1690 = vmatmul.mubr.f32.gmra.mxu0 %v1429_v16 }
 0x247   :  { %6191 = vmatprep.mubr.f32.mxu0 %v8235_v30 }
 0x248   :  { %v8400_v29 = vsel %vm1711_vm0, %v1617_v61, %v1743_v14  ;;  %vm3280_vm0 = vcmask 130048  }
 0x249   :  { %1984 = vmatmul.mubr.f32.gmra.mxu1 %v8400_v29 }
 0x24a   :  { %1989 = vmatprep.mubr.f32.mxu1 %v6960_v1 }
 0x252   :  { %v1621_v21 = vpop.f32.mrf.mxu0 }
 0x253   :  { %v1622_v24 = vadd.f32 %v8037_v18, %v1621_v21 }
 0x254   :  { %v1623_v25 = vpop.f32.mrf.mxu0 }
 0x255   :  { %vm1712_vm1 = vcmp.gt.f32.partialorder %v1622_v24, 0.0  ;;  %v1744_v19 = vmul.f32 0.01, %v1622_v24 }
 0x256   :  { %v1626_v15 = vpop.f32.mrf.mxu0 }
 0x257   :  { %v8405_v28 = vsel %vm1712_vm1, %v1622_v24, %v1744_v19  ;;  %v1627_v41 = vadd.f32 %v8037_v18, %v1626_v15  ;;  %vm5603_vm1 = vcmask 1041409  }
 0x258   :  { %v1628_v33 = vpop.f32.mrf.mxu0  ;;  %1990 = vmatmul.mubr.f32.gmra.mxu1 %v8405_v28 }
 0x259   :  { %vm1713_vm2 = vcmp.gt.f32.partialorder %v1627_v41, 0.0  ;;  %v1745_v35 = vmul.f32 0.01, %v1627_v41  ;;  %1995 = vmatprep.mubr.f32.mxu1 %v6960_v1 }
 0x25b   :  { %v8410_v58 = vsel %vm1713_vm2, %v1627_v41, %v1745_v35  ;;  %vm5605_vm2 = vcmask 1042434  }
 0x25c   :  { %9168 = vst [vmem:[#allocation18_spill] sm:$0xff] %v8410_v58  ;;  %1996 = vmatmul.mubr.f32.gmra.mxu1 %v8410_v58 }
 0x25d   :  { %2001 = vmatprep.mubr.f32.mxu1 %v6960_v1 }
 0x26b   :  { %v1889_v32 = vpop.f32.mrf.mxu1 }
 0x26c   :  { %v1631_v43 = vpop.f32.mrf.mxu0 }
 0x26d   :  { %v1632_v18 = vadd.f32 %v8417_v44, %v1631_v43  ;;  %v8420_v31 = vpop.f32.mrf.mxu1 }
 0x26e   :  { %9169 = vst [vmem:[#allocation19_spill] sm:$0xff] %v8420_v31  ;;  %v1633_v55 = vpop.f32.mrf.mxu0 }
 0x26f   :  { %vm1714_vm3 = vcmp.gt.f32.partialorder %v1632_v18, 0.0  ;;  %v1746_v11 = vmul.f32 0.01, %v1632_v18  ;;  %v1895_v45 = vpop.f32.mrf.mxu1 }
 0x270   :  { %6159 = vmatprep.subr.mxu1 %v1895_v45 }
 0x271   :  { %v8422_v37 = vsel %vm1714_vm3, %v1632_v18, %v1746_v11  ;;  %v8424_v13 = vpop.f32.mrf.mxu1  ;;  %6160 = vmatpush3.xpose.msra.mxu1 %v1895_v45  ;;  %vm5607_vm3 = vcmask 1043459  }
 0x272   :  { %9170 = vst [vmem:[#allocation20_spill] sm:$0xff] %v8422_v37  ;;  %9171 = vst [vmem:[#allocation21_spill] sm:$0xff] %v8424_v13  ;;  %2002 = vmatmul.mubr.f32.gmra.mxu1 %v8422_v37  ;;  %6161 = vmatprep.subr.mxu1 %v1889_v32 }
 0x273   :  { %v8427_v10 = vpop.f32.mrf.mxu1  ;;  %2007 = vmatprep.mubr.f32.mxu1 %v6960_v1 }
 0x275   :  { %v8430_v9 = vpop.f32.mrf.mxu1  ;;  %6162 = vmatpush3.xpose.msra.mxu1 %v1889_v32 }
 0x276   :  { %9172 = vst [vmem:[#allocation22_spill] sm:$0xff] %v8430_v9 }
 0x277   :  { %v8432_v47 = vpop.f32.mrf.mxu1 }
 0x278   :  { %6166 = vmatprep.subr.mxu1 %v8432_v47 }
 0x279   :  { %v8436_v57 = vpop.f32.mrf.mxu1 }
 0x27a   :  { %v1636_v42 = vpop.f32.mrf.mxu0  ;;  %9173 = vst [vmem:[#allocation23_spill] sm:$0xff] %v8436_v57 }
 0x27b   :  { %v1637_v60 = vadd.f32 %v8417_v44, %v1636_v42  ;;  %v8443_v20 = vpop.f32.mrf.mxu1 }
 0x27c   :  { %v1638_v40 = vpop.f32.mrf.mxu0 }
 0x27d   :  { %vm1715_vm4 = vcmp.gt.f32.partialorder %v1637_v60, 0.0  ;;  %v1747_v27 = vmul.f32 0.01, %v1637_v60  ;;  %v8449_v53 = vpop.f32.mrf.mxu1 }
 0x27e   :  { %v1641_v0 = vpop.f32.mrf.mxu0  ;;  %9176 = vst [vmem:[#allocation26_spill] sm:$0xff] %v8449_v53 }
 0x27f   :  { %v8438_v49 = vsel %vm1715_vm4, %v1637_v60, %v1747_v27  ;;  %v1642_v23 = vadd.f32 %v8417_v44, %v1641_v0  ;;  %v8451_v54 = vpop.f32.mrf.mxu1  ;;  %vm5609_vm4 = vcmask 1044484  }
 0x280   :  { %9174 = vst [vmem:[#allocation24_spill] sm:$0xff] %v8438_v49  ;;  %v1643_v22 = vpop.f32.mrf.mxu0  ;;  %2008 = vmatmul.mubr.f32.gmra.mxu1 %v8438_v49 }
 0x281   :  { %vm1716_vm6 = vcmp.gt.f32.partialorder %v1642_v23, 0.0  ;;  %v1748_v7 = vmul.f32 0.01, %v1642_v23  ;;  %2013 = vmatprep.mubr.f32.mxu1 %v6960_v1  ;;  %v8453_v50 = vpop.f32.mrf.mxu1 }
 0x282   :  { %9177 = vst [vmem:[#allocation27_spill] sm:$0xff] %v8453_v50 }
 0x283   :  { %v8445_v63 = vsel %vm1716_vm6, %v1642_v23, %v1748_v7  ;;  %v8455_v3 = vpop.f32.mrf.mxu1  ;;  %vm5611_vm6 = vcmask 1045509  }
 0x284   :  { %9175 = vst [vmem:[#allocation25_spill] sm:$0xff] %v8445_v63  ;;  %2014 = vmatmul.mubr.f32.gmra.mxu1 %v8445_v63 }
 0x285   :  { %2019 = vmatprep.mubr.f32.mxu1 %v6960_v1  ;;  %v8458_v61 = vpop.f32.mrf.mxu1 }
 0x286   :  { %9178 = vst [vmem:[#allocation28_spill] sm:$0xff] %v8458_v61 }
 0x291   :  { %v8463_v14 = vpop.f32.mrf.mxu1 }
 0x293   :  { %v1646_v38 = vpop.f32.mrf.mxu0  ;;  %v8466_v21 = vpop.f32.mrf.mxu1 }
 0x294   :  { %v1647_v16 = vadd.f32 %v8417_v44, %v1646_v38  ;;  %9180 = vst [vmem:[#allocation30_spill] sm:$0xff] %v8466_v21 }
 0x295   :  { %v1648_v26 = vpop.f32.mrf.mxu0 }
 0x296   :  { %vm1717_vm7 = vcmp.gt.f32.partialorder %v1647_v16, 0.0  ;;  %v1749_v8 = vmul.f32 0.01, %v1647_v16 }
 0x298   :  { %v8460_v17 = vsel %vm1717_vm7, %v1647_v16, %v1749_v8  ;;  %vm5613_vm7 = vcmask 1046534  }
 0x299   :  { %9179 = vst [vmem:[#allocation29_spill] sm:$0xff] %v8460_v17  ;;  %2020 = vmatmul.mubr.f32.gmra.mxu1 %v8460_v17 }
 0x29a   :  { %2025 = vmatprep.mubr.f32.mxu1 %v6960_v1 }
 0x2a0   :  { %v1937_v24 = vpop.f32.mrf.mxu1 }
 0x2a2   :  { %v1651_v25 = vpop.f32.mrf.mxu0  ;;  %v8468_v19 = vpop.f32.mrf.mxu1 }
 0x2a3   :  { %9181 = vst [vmem:[#allocation31_spill] sm:$0xff] %v8468_v19  ;;  %v1652_v15 = vadd.f32 %v8417_v44, %v1651_v25 }
 0x2a4   :  { %v1653_v41 = vpop.f32.mrf.mxu0  ;;  %v1943_v33 = vpop.f32.mrf.mxu1 }
 0x2a5   :  { %vm1718_vm5 = vcmp.gt.f32.partialorder %v1652_v15, 0.0  ;;  %v1750_v35 = vmul.f32 0.01, %v1652_v15  ;;  %6187 = vmatprep.subr.mxu0 %v1943_v33 }
 0x2a6   :  { %v1656_v32 = vpop.f32.mrf.mxu0  ;;  %6188 = vmatpush3.xpose.msra.mxu0 %v1943_v33  ;;  %v8487_v22 = vpop.f32.mrf.mxu1 }
 0x2a7   :  { %v8471_v43 = vsel %vm1718_vm5, %v1652_v15, %v1750_v35  ;;  %v1657_v18 = vadd.f32 %v8417_v44, %v1656_v32  ;;  %6189 = vmatprep.subr.mxu0 %v1937_v24  ;;  %9185 = vst [vmem:[#allocation35_spill] sm:$0xff] %v8487_v22  ;;  %vm5615_vm5 = vcmask 1047559  }
 0x2a8   :  { %9182 = vst [vmem:[#allocation32_spill] sm:$0xff] %v8471_v43  ;;  %v1658_v55 = vpop.f32.mrf.mxu0  ;;  %2026 = vmatmul.mubr.f32.gmra.mxu1 %v8471_v43 }
 0x2a9   :  { %vm1719_vm8 = vcmp.gt.f32.partialorder %v1657_v18, 0.0  ;;  %v1751_v11 = vmul.f32 0.01, %v1657_v18  ;;  %2031 = vmatprep.mubr.f32.mxu1 %v6960_v1 }
 0x2aa   :  { %6190 = vmatpush3.xpose.msra.mxu0 %v1937_v24 }
 0x2ab   :  { %v8476_v45 = vsel %vm1719_vm8, %v1657_v18, %v1751_v11 }
 0x2ac   :  { %9183 = vst [vmem:[#allocation33_spill] sm:$0xff] %v8476_v45  ;;  %2032 = vmatmul.mubr.f32.gmra.mxu1 %v8476_v45 }
 0x2ad   :  { %6192 = vmatmul.mubr.f32.vlgmr.msra.gmra.mxu0 %v8241_v62  ;;  %2037 = vmatprep.mubr.f32.mxu1 %v6960_v1 }
 0x2ae   :  { %6205 = vmatprep.mubr.f32.mxu0 %v8313_v6 }
 0x2b9   :  { %v8490_v16 = vpop.f32.mrf.mxu1 }
 0x2bb   :  { %v1661_v42 = vpop.f32.mrf.mxu0  ;;  %v8496_v41 = vpop.f32.mrf.mxu1 }
 0x2bc   :  { %v1662_v60 = vadd.f32 %v8417_v44, %v1661_v42  ;;  %9187 = vst [vmem:[#allocation37_spill] sm:$0xff] %v8496_v41 }
 0x2bd   :  { %v1663_v40 = vpop.f32.mrf.mxu0 }
 0x2be   :  { %vm1720_vm9 = vcmp.gt.f32.partialorder %v1662_v60, 0.0  ;;  %v1752_v27 = vmul.f32 0.01, %v1662_v60 }
 0x2c0   :  { %v8483_v0 = vsel %vm1720_vm9, %v1662_v60, %v1752_v27 }
 0x2c1   :  { %9184 = vst [vmem:[#allocation34_spill] sm:$0xff] %v8483_v0  ;;  %2038 = vmatmul.mubr.f32.gmra.mxu1 %v8483_v0 }
 0x2c2   :  { %2043 = vmatprep.mubr.f32.mxu1 %v6960_v1 }
 0x2c8   :  { %v8499_v35 = vpop.f32.mrf.mxu1 }
 0x2ca   :  { %v1666_v23 = vpop.f32.mrf.mxu0  ;;  %v8505_v18 = vpop.f32.mrf.mxu1 }
 0x2cb   :  { %v1667_v7 = vadd.f32 %v8417_v44, %v1666_v23  ;;  %9189 = vst [vmem:[#allocation39_spill] sm:$0xff] %v8505_v18 }
 0x2cc   :  { %v1668_v38 = vpop.f32.mrf.mxu0  ;;  %v1961_v55 = vpop.f32.mrf.mxu1 }
 0x2cd   :  { %vm1721_vm10 = vcmp.gt.f32.partialorder %v1667_v7, 0.0  ;;  %v1753_v26 = vmul.f32 0.01, %v1667_v7 }
 0x2ce   :  { %v1671_v8 = vpop.f32.mrf.mxu0  ;;  %v8507_v11 = vpop.f32.mrf.mxu1 }
 0x2cf   :  { %v8492_v24 = vsel %vm1721_vm10, %v1667_v7, %v1753_v26  ;;  %v1672_v25 = vadd.f32 %v8417_v44, %v1671_v8  ;;  %9190 = vst [vmem:[#allocation40_spill] sm:$0xff] %v8507_v11 }
 0x2d0   :  { %9186 = vst [vmem:[#allocation36_spill] sm:$0xff] %v8492_v24  ;;  %v1673_v15 = vpop.f32.mrf.mxu0  ;;  %2044 = vmatmul.mubr.f32.gmra.mxu1 %v8492_v24 }
 0x2d1   :  { %vm1722_vm11 = vcmp.gt.f32.partialorder %v1672_v25, 0.0  ;;  %v1754_v33 = vmul.f32 0.01, %v1672_v25  ;;  %2049 = vmatprep.mubr.f32.mxu1 %v6960_v1 }
 0x2d3   :  { %v8501_v32 = vsel %vm1722_vm11, %v1672_v25, %v1754_v33 }
 0x2d4   :  { %9188 = vst [vmem:[#allocation38_spill] sm:$0xff] %v8501_v32  ;;  %2050 = vmatmul.mubr.f32.gmra.mxu1 %v8501_v32 }
 0x2d5   :  { %2055 = vmatprep.mubr.f32.mxu1 %v6960_v1 }
 0x2e1   :  { %v1967_v42 = vpop.f32.mrf.mxu1 }
 0x2e2   :  { %6201 = vmatprep.subr.mxu0 %v1967_v42 }
 0x2e3   :  { %v1676_v60 = vpop.f32.mrf.mxu0  ;;  %6202 = vmatpush3.xpose.msra.mxu0 %v1967_v42 }
 0x2e4   :  { %v1677_v40 = vadd.f32 %v8417_v44, %v1676_v60  ;;  %6203 = vmatprep.subr.mxu0 %v1961_v55 }
 0x2e5   :  { %v1678_v27 = vpop.f32.mrf.mxu0 }
 0x2e6   :  { %vm1723_vm12 = vcmp.gt.f32.partialorder %v1677_v40, 0.0  ;;  %v1755_v23 = vmul.f32 0.01, %v1677_v40  ;;  %v8526_v27 = vpop.f32.mrf.mxu1 }
 0x2e7   :  { %6204 = vmatpush3.xpose.msra.mxu0 %v1961_v55  ;;  %9194 = vst [vmem:[#allocation44_spill] sm:$0xff] %v8526_v27 }
 0x2e8   :  { %v8510_v7 = vsel %vm1723_vm12, %v1677_v40, %v1755_v23 }
 0x2e9   :  { %9191 = vst [vmem:[#allocation41_spill] sm:$0xff] %v8510_v7  ;;  %2056 = vmatmul.mubr.f32.gmra.mxu1 %v8510_v7 }
 0x2ea   :  { %6206 = vmatmul.mubr.f32.vlgmr.msra.gmra.mxu0 %v8334_v48  ;;  %2061 = vmatprep.mubr.f32.mxu1 %v6960_v1 }
 0x2eb   :  { %6219 = vmatprep.mubr.f32.mxu0 %v8400_v29 }
 0x2f0   :  { %v1973_v23 = vpop.f32.mrf.mxu1 }
 0x2f2   :  { %v1681_v38 = vpop.f32.mrf.mxu0 }
 0x2f3   :  { %v1682_v26 = vadd.f32 %v8417_v44, %v1681_v38 }
 0x2f4   :  { %v1683_v8 = vpop.f32.mrf.mxu0 }
 0x2f5   :  { %vm1724_vm13 = vcmp.gt.f32.partialorder %v1682_v26, 0.0  ;;  %v1756_v25 = vmul.f32 0.01, %v1682_v26  ;;  %v8529_v8 = vpop.f32.mrf.mxu1 }
 0x2f6   :  { %v1686_v15 = vpop.f32.mrf.mxu0  ;;  %9195 = vst [vmem:[#allocation45_spill] sm:$0xff] %v8529_v8 }
 0x2f7   :  { %v8517_v33 = vsel %vm1724_vm13, %v1682_v26, %v1756_v25  ;;  %v1687_v55 = vadd.f32 %v8417_v44, %v1686_v15  ;;  %v1979_v11 = vpop.f32.mrf.mxu1 }
 0x2f8   :  { %9192 = vst [vmem:[#allocation42_spill] sm:$0xff] %v8517_v33  ;;  %v1688_v42 = vpop.f32.mrf.mxu0  ;;  %2062 = vmatmul.mubr.f32.gmra.mxu1 %v8517_v33 }
 0x2f9   :  { %vm1725_vm14 = vcmp.gt.f32.partialorder %v1687_v55, 0.0  ;;  %v1757_v60 = vmul.f32 0.01, %v1687_v55  ;;  %2067 = vmatprep.mubr.f32.mxu1 %v6960_v1 }
 0x2fb   :  { %v8522_v40 = vsel %vm1725_vm14, %v1687_v55, %v1757_v60  ;;  %v8535_v55 = vpop.f32.mrf.mxu1 }
 0x2fc   :  { %9193 = vst [vmem:[#allocation43_spill] sm:$0xff] %v8522_v40  ;;  %2068 = vmatmul.mubr.f32.gmra.mxu1 %v8522_v40  ;;  %9197 = vst [vmem:[#allocation47_spill] sm:$0xff] %v8535_v55 }
 0x2fd   :  { %2073 = vmatprep.mubr.f32.mxu1 %v6960_v1 }
 0x306   :  { %v1691_v38 = vpop.f32.mrf.mxu0 }
 0x307   :  { %v1692_v26 = vadd.f32 %v8417_v44, %v1691_v38 }
 0x308   :  { %v1693_v25 = vpop.f32.mrf.mxu0 }
 0x309   :  { %vm1726_vm15 = vcmp.gt.f32.partialorder %v1692_v26, 0.0  ;;  %v1758_v15 = vmul.f32 0.01, %v1692_v26  ;;  %v1985_v1 = vpop.f32.mrf.mxu1 }
 0x30b   :  { %v8531_v42 = vsel %vm1726_vm15, %v1692_v26, %v1758_v15  ;;  %v8542_v44 = vpop.f32.mrf.mxu1 }
 0x30c   :  { %9196 = vst [vmem:[#allocation46_spill] sm:$0xff] %v8531_v42  ;;  %2074 = vmatmul.mubr.f32.gmra.mxu1 %v8531_v42  ;;  %9198 = vst [vmem:[#allocation48_spill] sm:$0xff] %v8542_v44 }
 0x30d   :  { %6163 = vmatprep.mubr.f32.mxu1 %v8052_v36 }
 0x310   :  { %6164 = vmatmul.mubr.f32.vlgmr.msra.gmra.mxu1 %v8079_v34 }
 0x311   :  { %6167 = vmatpush3.xpose.msra.mxu1 %v8432_v47  ;;  %6170 = vmatprep.mubr.f32.mxu1 %v8114_v59 }
 0x312   :  { %6168 = vmatprep.subr.mxu1 %v8427_v10 }
 0x315   :  { %6169 = vmatpush3.xpose.msra.mxu1 %v8427_v10 }
 0x316   :  { %6173 = vmatprep.subr.mxu1 %v8451_v54 }
 0x318   :  { %6171 = vmatmul.mubr.f32.vlgmr.msra.gmra.mxu1 %v8137_v5  ;;  %v1991_v60 = vpop.f32.mrf.mxu1 }
 0x319   :  { %6174 = vmatpush3.xpose.msra.mxu1 %v8451_v54  ;;  %6177 = vmatprep.mubr.f32.mxu1 %v8151_v39 }
 0x31a   :  { %6175 = vmatprep.subr.mxu1 %v8443_v20  ;;  %6215 = vmatprep.subr.mxu0 %v1991_v60  ;;  %v8563_v10 = vpop.f32.mrf.mxu1 }
 0x31b   :  { %6216 = vmatpush3.xpose.msra.mxu0 %v1991_v60  ;;  %9199 = vst [vmem:[#allocation49_spill] sm:$0xff] %v8563_v10 }
 0x31c   :  { %6217 = vmatprep.subr.mxu0 %v1985_v1  ;;  %v1997_v47 = vpop.f32.mrf.mxu1 }
 0x31d   :  { %6176 = vmatpush3.xpose.msra.mxu1 %v8443_v20 }
 0x31e   :  { %6180 = vmatprep.subr.mxu1 %v8463_v14  ;;  %v8568_v20 = vpop.f32.mrf.mxu1 }
 0x31f   :  { %6218 = vmatpush3.xpose.msra.mxu0 %v1985_v1  ;;  %9200 = vst [vmem:[#allocation50_spill] sm:$0xff] %v8568_v20 }
 0x320   :  { %6178 = vmatmul.mubr.f32.vlgmr.msra.gmra.mxu1 %v8156_v52 }
 0x321   :  { %6181 = vmatpush3.xpose.msra.mxu1 %v8463_v14  ;;  %6184 = vmatprep.mubr.f32.mxu1 %v8163_v56 }
 0x322   :  { %6182 = vmatprep.subr.mxu1 %v8455_v3  ;;  %6220 = vmatmul.mubr.f32.vlgmr.msra.gmra.mxu0 %v8405_v28 }
 0x323   :  { %6233 = vmatprep.mubr.f32.mxu0 %v8438_v49 }
 0x325   :  { %6183 = vmatpush3.xpose.msra.mxu1 %v8455_v3 }
 0x326   :  { %6194 = vmatprep.subr.mxu1 %v8499_v35 }
 0x328   :  { %6185 = vmatmul.mubr.f32.vlgmr.msra.gmra.mxu1 %v8190_v51 }
 0x329   :  { %6195 = vmatpush3.xpose.msra.mxu1 %v8499_v35  ;;  %6198 = vmatprep.mubr.f32.mxu1 %v8264_v4 }
 0x32a   :  { %6196 = vmatprep.subr.mxu1 %v8490_v16 }
 0x32d   :  { %6197 = vmatpush3.xpose.msra.mxu1 %v8490_v16 }
 0x32e   :  { %6208 = vmatprep.subr.mxu1 %v1979_v11 }
 0x330   :  { %6199 = vmatmul.mubr.f32.vlgmr.msra.gmra.mxu1 %v8301_v2 }
 0x331   :  { %6209 = vmatpush3.xpose.msra.mxu1 %v1979_v11  ;;  %6212 = vmatprep.mubr.f32.mxu1 %v8372_v46 }
 0x332   :  { %6210 = vmatprep.subr.mxu1 %v1973_v23  ;;  %v2003_v54 = vpop.f32.mrf.mxu1 }
 0x334   :  { %v8572_v3 = vpop.f32.mrf.mxu1 }
 0x335   :  { %6211 = vmatpush3.xpose.msra.mxu1 %v1973_v23  ;;  %9201 = vst [vmem:[#allocation51_spill] sm:$0xff] %v8572_v3 }
 0x336   :  { %6222 = vmatprep.subr.mxu1 %v2003_v54 }
 0x338   :  { %6213 = vmatmul.mubr.f32.vlgmr.msra.gmra.mxu1 %v8378_v12 }
 0x339   :  { %6223 = vmatpush3.xpose.msra.mxu1 %v2003_v54  ;;  %6226 = vmatprep.mubr.f32.mxu1 %v8410_v58 }
 0x33a   :  { %6224 = vmatprep.subr.mxu1 %v1997_v47 }
 0x33d   :  { %6225 = vmatpush3.xpose.msra.mxu1 %v1997_v47 }
 0x340   :  { %6227 = vmatmul.mubr.f32.vlgmr.msra.gmra.mxu1 %v8422_v37  ;;  %v2009_v14 = vpop.f32.mrf.mxu1 }
 0x341   :  { %6240 = vmatprep.mubr.f32.mxu1 %v8460_v17 }
 0x342   :  { %v8576_v16 = vpop.f32.mrf.mxu1 }
 0x343   :  { %9202 = vst [vmem:[#allocation52_spill] sm:$0xff] %v8576_v16 }
 0x344   :  { %v2015_v35 = vpop.f32.mrf.mxu1 }
 0x345   :  { %6229 = vmatprep.subr.mxu0 %v2015_v35 }
 0x346   :  { %6230 = vmatpush3.xpose.msra.mxu0 %v2015_v35  ;;  %v8580_v11 = vpop.f32.mrf.mxu1 }
 0x347   :  { %6231 = vmatprep.subr.mxu0 %v2009_v14  ;;  %9203 = vst [vmem:[#allocation53_spill] sm:$0xff] %v8580_v11 }
 0x34a   :  { %6232 = vmatpush3.xpose.msra.mxu0 %v2009_v14 }
 0x34d   :  { %6234 = vmatmul.mubr.f32.vlgmr.msra.gmra.mxu0 %v8445_v63 }
 0x34e   :  { %6247 = vmatprep.mubr.f32.mxu0 %v8476_v45 }
 0x359   :  { %v2021_v23 = vpop.f32.mrf.mxu1 }
 0x35b   :  { %v8582_v38 = vpop.f32.mrf.mxu1 }
 0x35c   :  { %9204 = vst [vmem:[#allocation54_spill] sm:$0xff] %v8582_v38 }
 0x368   :  { %v2027_v26 = vpop.f32.mrf.mxu1 }
 0x369   :  { %6236 = vmatprep.subr.mxu1 %v2027_v26 }
 0x36a   :  { %6237 = vmatpush3.xpose.msra.mxu1 %v2027_v26  ;;  %v8586_v25 = vpop.f32.mrf.mxu1 }
 0x36b   :  { %6238 = vmatprep.subr.mxu1 %v2021_v23  ;;  %9205 = vst [vmem:[#allocation55_spill] sm:$0xff] %v8586_v25 }
 0x36c   :  { %v2033_v15 = vpop.f32.mrf.mxu1 }
 0x36d   :  { %v8644_v25 = vpop.f32.mrf.mxu0 }
 0x36e   :  { %6239 = vmatpush3.xpose.msra.mxu1 %v2021_v23  ;;  %v8588_v1 = vpop.f32.mrf.mxu1 }
 0x36f   :  { %9206 = vst [vmem:[#allocation56_spill] sm:$0xff] %v8588_v1  ;;  %v8652_v16 = vpop.f32.mrf.mxu0 }
 0x370   :  { %v3305_v11 = vsel %vm3280_vm0, %v8652_v16, -inf }
 0x371   :  { %6241 = vmatmul.mubr.f32.vlgmr.msra.gmra.mxu1 %v8471_v43 }
 0x372   :  { %6254 = vmatprep.mubr.f32.mxu1 %v8492_v24 }
 0x381   :  { %v2039_v60 = vpop.f32.mrf.mxu1 }
 0x382   :  { %6243 = vmatprep.subr.mxu0 %v2039_v60 }
 0x383   :  { %6244 = vmatpush3.xpose.msra.mxu0 %v2039_v60  ;;  %v8592_v47 = vpop.f32.mrf.mxu1 }
 0x384   :  { %6245 = vmatprep.subr.mxu0 %v2033_v15  ;;  %9207 = vst [vmem:[#allocation57_spill] sm:$0xff] %v8592_v47 }
 0x387   :  { %6246 = vmatpush3.xpose.msra.mxu0 %v2033_v15 }
 0x38a   :  { %6248 = vmatmul.mubr.f32.vlgmr.msra.gmra.mxu0 %v8483_v0 }
 0x38b   :  { %6261 = vmatprep.mubr.f32.mxu0 %v8510_v7 }
 0x390   :  { %v2045_v54 = vpop.f32.mrf.mxu1 }
 0x392   :  { %v8594_v14 = vpop.f32.mrf.mxu1 }
 0x393   :  { %9208 = vst [vmem:[#allocation58_spill] sm:$0xff] %v8594_v14 }
 0x394   :  { %v2051_v35 = vpop.f32.mrf.mxu1 }
 0x395   :  { %6250 = vmatprep.subr.mxu1 %v2051_v35 }
 0x396   :  { %6251 = vmatpush3.xpose.msra.mxu1 %v2051_v35  ;;  %v8598_v23 = vpop.f32.mrf.mxu1 }
 0x397   :  { %6252 = vmatprep.subr.mxu1 %v2045_v54  ;;  %9209 = vst [vmem:[#allocation59_spill] sm:$0xff] %v8598_v23 }
 0x39a   :  { %6253 = vmatpush3.xpose.msra.mxu1 %v2045_v54 }
 0x39d   :  { %6255 = vmatmul.mubr.f32.vlgmr.msra.gmra.mxu1 %v8501_v32 }
 0x39e   :  { %6268 = vmatprep.mubr.f32.mxu1 %v8522_v40 }
 0x3a9   :  { %v2057_v26 = vpop.f32.mrf.mxu1 }
 0x3ab   :  { %v8600_v15 = vpop.f32.mrf.mxu1 }
 0x3ac   :  { %9210 = vst [vmem:[#allocation60_spill] sm:$0xff] %v8600_v15 }
 0x3b8   :  { %v2063_v60 = vpop.f32.mrf.mxu1 }
 0x3b9   :  { %6257 = vmatprep.subr.mxu0 %v2063_v60 }
 0x3ba   :  { %6258 = vmatpush3.xpose.msra.mxu0 %v2063_v60  ;;  %v8604_v35 = vpop.f32.mrf.mxu1 }
 0x3bb   :  { %6259 = vmatprep.subr.mxu0 %v2057_v26  ;;  %9211 = vst [vmem:[#allocation61_spill] sm:$0xff] %v8604_v35 }
 0x3bc   :  { %v2069_v54 = vpop.f32.mrf.mxu1 }
 0x3be   :  { %6260 = vmatpush3.xpose.msra.mxu0 %v2057_v26  ;;  %v8610_v15 = vpop.f32.mrf.mxu1 }
 0x3bf   :  { %6271 = vmatprep.subr.mxu0 %v8079_v34  ;;  %9212 = vst [vmem:[#allocation62_spill] sm:$0xff] %v8610_v15 }
 0x3c1   :  { %6262 = vmatmul.mubr.f32.vlgmr.msra.gmra.mxu0 %v8517_v33 }
 0x3c2   :  { %6272 = vmatpush3.msra.mxu0 %v8079_v34 }
 0x3c3   :  { %6273 = vmatprep.subr.mxu0 %v8052_v36 }
 0x3c4   :  { %6274 = vmatpush3.msra.mxu0 %v8052_v36 }
 0x3c5   :  { %6285 = vmatprep.subr.mxu0 %v8156_v52 }
 0x3cc   :  { %v2075_v60 = vpop.f32.mrf.mxu1 }
 0x3cd   :  { %6264 = vmatprep.subr.mxu1 %v2075_v60 }
 0x3ce   :  { %v8612_v26 = vpop.f32.mrf.mxu1  ;;  %6265 = vmatpush3.xpose.msra.mxu1 %v2075_v60 }
 0x3cf   :  { %9213 = vst [vmem:[#allocation63_spill] sm:$0xff] %v8612_v26  ;;  %6266 = vmatprep.subr.mxu1 %v2069_v54 }
 0x3d0   :  { %v8614_v14 = vpop.f32.mrf.mxu1 }
 0x3d1   :  { %v3284_v35 = vsel %vm3280_vm0, %v8614_v14, -inf }
 0x3d2   :  { %6267 = vmatpush3.xpose.msra.mxu1 %v2069_v54  ;;  %3285 = vmax.xlane.f32.xlu1 %v3284_v35  ;;  %v8618_v23 = vpop.f32.mrf.mxu1 }
 0x3d3   :  { %6278 = vmatprep.subr.mxu1 %v8137_v5  ;;  %v3281_v15 = vsel %vm3280_vm0, %v8618_v23, -inf }
 0x3d4   :  { %3282 = vmax.xlane.f32.xlu0 %v3281_v15 }
 0x3d5   :  { %6269 = vmatmul.mubr.f32.vlgmr.msra.gmra.mxu1 %v8531_v42 }
 0x3d6   :  { %6279 = vmatpush3.msra.mxu1 %v8137_v5  ;;  %v8656_v5 = vpop.f32.mrf.mxu0 }
 0x3d7   :  { %6280 = vmatprep.subr.mxu1 %v8114_v59 }
 0x3d8   :  { %v8626_v60 = vpop.f32.mrf.mxu1  ;;  %6281 = vmatpush3.msra.mxu1 %v8114_v59  ;;  %v3308_v59 = vsel %vm3280_vm0, %v8644_v25, -inf  ;;  %v8662_v20 = vpop.f32.mrf.mxu0 }
 0x3d9   :  { %6292 = vmatprep.subr.mxu1 %v8190_v51  ;;  %v3290_v35 = vsel %vm3280_vm0, %v8626_v60, -inf }
 0x3da   :  { %3291 = vmax.xlane.f32.xlu1 %v3290_v35  ;;  %v8632_v54 = vpop.f32.mrf.mxu1 }
 0x3db   :  { %v3287_v15 = vsel %vm3280_vm0, %v8632_v54, -inf }
 0x3dc   :  { %3288 = vmax.xlane.f32.xlu0 %v3287_v15 }
 0x3e0   :  { %v8636_v26 = vpop.f32.mrf.mxu1 }
 0x3e1   :  { %v3296_v1 = vsel %vm3280_vm0, %v8636_v26, -inf }
 0x3e2   :  { %3297 = vmax.xlane.f32.xlu0 %v3296_v1  ;;  %v8640_v47 = vpop.f32.mrf.mxu1  ;;  %v8670_v3 = vpop.f32.mrf.mxu0 }
 0x3e3   :  { %v3293_v38 = vsel %vm3280_vm0, %v8640_v47, -inf  ;;  %v3332_v10 = vsel %vm3280_vm0, %v8670_v3, -inf }
 0x3e4   :  { %v8678_v34 = vpop.f32.mrf.mxu0 }
 0x3e5   :  { %v3329_v44 = vsel %vm3280_vm0, %v8678_v34, -inf }
 0x3e6   :  { %3294 = vmax.xlane.f32.xlu0 %v3293_v38 }
 0x3e8   :  { %v8646_v35 = vpop.f32.mrf.mxu1 }
 0x3e9   :  { %v3302_v15 = vsel %vm3280_vm0, %v8646_v35, -inf }
 0x3ea   :  { %3309 = vmax.xlane.f32.xlu0 %v3308_v59  ;;  %3303 = vmax.xlane.f32.xlu1 %v3302_v15  ;;  %v8654_v1 = vpop.f32.mrf.mxu1  ;;  %v3320_v59 = vsel %vm3280_vm0, %v8656_v5, -inf }
 0x3eb   :  { %v3299_v38 = vsel %vm3280_vm0, %v8654_v1, -inf }
 0x3ee   :  { %3306 = vmax.xlane.f32.xlu0 %v3305_v11  ;;  %3300 = vmax.xlane.f32.xlu1 %v3299_v38  ;;  %v3317_v11 = vsel %vm3280_vm0, %v8662_v20, -inf }
 0x3f0   :  { %v8664_v36 = vpop.f32.mrf.mxu1 }
 0x3f1   :  { %v3314_v15 = vsel %vm3280_vm0, %v8664_v36, -inf }
 0x3f2   :  { %3321 = vmax.xlane.f32.xlu0 %v3320_v59  ;;  %3315 = vmax.xlane.f32.xlu1 %v3314_v15  ;;  %v8672_v8 = vpop.f32.mrf.mxu1 }
 0x3f3   :  { %v3311_v38 = vsel %vm3280_vm0, %v8672_v8, -inf }
 0x3f6   :  { %3318 = vmax.xlane.f32.xlu0 %v3317_v11  ;;  %3312 = vmax.xlane.f32.xlu1 %v3311_v38 }
 0x3f8   :  { %v8680_v55 = vpop.f32.mrf.mxu1 }
 0x3f9   :  { %v3326_v59 = vsel %vm3280_vm0, %v8680_v55, -inf }
 0x3fa   :  { %3330 = vmax.xlane.f32.xlu0 %v3329_v44  ;;  %3327 = vmax.xlane.f32.xlu1 %v3326_v59  ;;  %v8686_v15 = vpop.f32.mrf.mxu1 }
 0x3fb   :  { %v3323_v27 = vsel %vm3280_vm0, %v8686_v15, -inf }
 0x3fe   :  { %3333 = vmax.xlane.f32.xlu0 %v3332_v10  ;;  %3324 = vmax.xlane.f32.xlu1 %v3323_v27 }
 0x400   :  { %v8692_v11 = vpop.f32.mrf.mxu1 }
 0x401   :  { %v3338_v38 = vsel %vm3280_vm0, %v8692_v11, -inf }
 0x402   :  { %3339 = vmax.xlane.f32.xlu0 %v3338_v38  ;;  %v8696_v41 = vpop.f32.mrf.mxu1 }
 0x403   :  { %v3335_v44 = vsel %vm3280_vm0, %v8696_v41, -inf }
 0x404   :  { %3336 = vmax.xlane.f32.xlu1 %v3335_v44 }
 0x40d   :  { %v8700_v59 = vpop.f32.mrf.mxu0 }
 0x40e   :  { %v3344_v18 = vsel %vm3280_vm0, %v8700_v59, -inf }
 0x40f   :  { %v8704_v19 = vpop.f32.mrf.mxu0  ;;  %3345 = vmax.xlane.f32.xlu0 %v3344_v18 }
 0x410   :  { %v3341_v27 = vsel %vm3280_vm0, %v8704_v19, -inf }
 0x411   :  { %3342 = vmax.xlane.f32.xlu1 %v3341_v27 }
 0x431   :  { %v8708_v10 = vpop.f32.mrf.mxu1 }
 0x432   :  { %v3350_v38 = vsel %vm3280_vm0, %v8708_v10, -inf }
 0x433   :  { %3351 = vmax.xlane.f32.xlu0 %v3350_v38  ;;  %v8712_v22 = vpop.f32.mrf.mxu1 }
 0x434   :  { %v3347_v44 = vsel %vm3280_vm0, %v8712_v22, -inf }
 0x435   :  { %3348 = vmax.xlane.f32.xlu1 %v3347_v44 }
 0x44a   :  { %v8716_v61 = vpop.f32.mrf.mxu0 }
 0x44b   :  { %v3356_v18 = vsel %vm3280_vm0, %v8716_v61, -inf }
 0x44c   :  { %v8720_v21 = vpop.f32.mrf.mxu0  ;;  %3357 = vmax.xlane.f32.xlu0 %v3356_v18 }
 0x44d   :  { %v3353_v27 = vsel %vm3280_vm0, %v8720_v21, -inf }
 0x44e   :  { %3354 = vmax.xlane.f32.xlu1 %v3353_v27 }
 0x45b   :  { %v3286_v13 = vpop.xlane.xlu1 %3285 }
 0x45c   :  { %v3378_v42 = vsub.f32 %v8614_v14, %v3286_v13 }
 0x45d   :  { %v8724_v53 = vpop.f32.mrf.mxu1  ;;  %v3283_v9 = vpop.xlane.xlu0 %3282 }
 0x45e   :  { %v3362_v38 = vsel %vm3280_vm0, %v8724_v53, -inf  ;;  %v3377_v33 = vsub.f32 %v8618_v23, %v3283_v9  ;;  %v3411_v17 = vmul.f32 1.442695, %v3378_v42 }
 0x45f   :  { %3363 = vmax.xlane.f32.xlu0 %v3362_v38  ;;  %v8728_v50 = vpop.f32.mrf.mxu1 }
 0x460   :  { %v3359_v44 = vsel %vm3280_vm0, %v8728_v50, -inf  ;;  %v3409_v58 = vmul.f32 1.442695, %v3377_v33  ;;  %6603 = vpow2.f32 %v3411_v17 }
 0x461   :  { %3360 = vmax.xlane.f32.xlu1 %v3359_v44 }
 0x462   :  { %6605 = vpow2.f32 %v3409_v58 }
 0x463   :  { %v3292_v40 = vpop.xlane.xlu1 %3291 }
 0x464   :  { %v3380_v13 = vsub.f32 %v8626_v60, %v3292_v40 }
 0x465   :  { %v3289_v57 = vpop.xlane.xlu0 %3288 }
 0x466   :  { %v3415_v9 = vmul.f32 1.442695, %v3380_v13  ;;  %v3379_v23 = vsub.f32 %v8632_v54, %v3289_v57 }
 0x46b   :  { %v3298_v31 = vpop.xlane.xlu0 %3297 }
 0x46c   :  { %v3382_v43 = vsub.f32 %v8636_v26, %v3298_v31  ;;  %v3413_v31 = vmul.f32 1.442695, %v3379_v23 }
 0x46e   :  { %v3419_v0 = vmul.f32 1.442695, %v3382_v43 }
 0x46f   :  { %v3295_v18 = vpop.xlane.xlu0 %3294 }
 0x470   :  { %6607 = vpow2.f32 %v3419_v0 }
 0x471   :  { %6609 = vpow2.f32 %v3415_v9 }
 0x473   :  { %v3310_v7 = vpop.xlane.xlu0 %3309  ;;  %v3304_v24 = vpop.xlane.xlu1 %3303 }
 0x474   :  { %v3386_v42 = vsub.f32 %v8644_v25, %v3310_v7 }
 0x476   :  { %v3427_v17 = vmul.f32 1.442695, %v3386_v42 }
 0x477   :  { %v3307_v44 = vpop.xlane.xlu0 %3306  ;;  %v3301_v14 = vpop.xlane.xlu1 %3300 }
 0x478   :  { %v3385_v43 = vsub.f32 %v8652_v16, %v3307_v44  ;;  %v3383_v58 = vsub.f32 %v8654_v1, %v3301_v14 }
 0x47a   :  { %v3425_v0 = vmul.f32 1.442695, %v3385_v43  ;;  %v3421_v16 = vmul.f32 1.442695, %v3383_v58 }
 0x47b   :  { %v3322_v49 = vpop.xlane.xlu0 %3321  ;;  %v3316_v63 = vpop.xlane.xlu1 %3315 }
 0x47c   :  { %v3390_v7 = vsub.f32 %v8656_v5, %v3322_v49  ;;  %v3388_v60 = vsub.f32 %v8664_v36, %v3316_v63 }
 0x47e   :  { %v3435_v5 = vmul.f32 1.442695, %v3390_v7  ;;  %v3431_v13 = vmul.f32 1.442695, %v3388_v60 }
 0x47f   :  { %v3319_v33 = vpop.xlane.xlu0 %3318 }
 0x480   :  { %v3389_v49 = vsub.f32 %v8662_v20, %v3319_v33 }
 0x481   :  { %v8732_v27 = vpop.f32.mrf.mxu0 }
 0x482   :  { %v3368_v38 = vsel %vm3280_vm0, %v8732_v27, -inf  ;;  %v3433_v20 = vmul.f32 1.442695, %v3389_v49 }
 0x483   :  { %3369 = vmax.xlane.f32.xlu0 %v3368_v38  ;;  %v8738_v45 = vpop.f32.mrf.mxu0  ;;  %v3381_v38 = vsub.f32 %v8640_v47, %v3295_v18  ;;  %v3313_v47 = vpop.xlane.xlu1 %3312 }
 0x484   :  { %v3365_v32 = vsel %vm3280_vm0, %v8738_v45, -inf  ;;  %v3387_v36 = vsub.f32 %v8672_v8, %v3313_v47 }
 0x485   :  { %3366 = vmax.xlane.f32.xlu1 %v3365_v32  ;;  %v3417_v37 = vmul.f32 1.442695, %v3381_v38  ;;  %v3384_v32 = vsub.f32 %v8646_v35, %v3304_v24  ;;  %v8755_v24 = vpop.eup %6603 }
 0x486   :  { %v8762_v35 = vpop.eup %6605  ;;  %v3476_v1 = vsel %vm3280_vm0, %v8755_v24, 0.0 }
 0x487   :  { %6611 = vpow2.f32 %v3417_v37  ;;  %v3423_v40 = vmul.f32 1.442695, %v3384_v32  ;;  %v3331_v37 = vpop.xlane.xlu0 %3330  ;;  %v8767_v18 = vpop.eup %6607  ;;  %v3473_v63 = vsel %vm3280_vm0, %v8762_v35, 0.0 }
 0x488   :  { %6613 = vpow2.f32 %v3413_v31  ;;  %v3328_v44 = vpop.xlane.xlu1 %3327  ;;  %v8772_v14 = vpop.eup %6609  ;;  %v3393_v9 = vsub.f32 %v8678_v34, %v3331_v37  ;;  %v3488_v23 = vsel %vm3280_vm0, %v8767_v18, 0.0  ;;  %v3429_v31 = vmul.f32 1.442695, %v3387_v36 }
 0x489   :  { %6615 = vpow2.f32 %v3427_v17  ;;  %v3392_v8 = vsub.f32 %v8680_v55, %v3328_v44  ;;  %v3482_v32 = vsel %vm3280_vm0, %v8772_v14, 0.0 }
 0x48a   :  { %6617 = vpow2.f32 %v3423_v40  ;;  %v3441_v43 = vmul.f32 1.442695, %v3393_v9 }
 0x48b   :  { %6619 = vpow2.f32 %v3425_v0  ;;  %v3334_v38 = vpop.xlane.xlu0 %3333  ;;  %v3439_v55 = vmul.f32 1.442695, %v3392_v8 }
 0x48c   :  { %6621 = vpow2.f32 %v3421_v16  ;;  %v3325_v17 = vpop.xlane.xlu1 %3324  ;;  %v3394_v34 = vsub.f32 %v8670_v3, %v3334_v38 }
 0x48d   :  { %6623 = vpow2.f32 %v3435_v5  ;;  %v3391_v0 = vsub.f32 %v8686_v15, %v3325_v17 }
 0x48e   :  { %6625 = vpow2.f32 %v3431_v13  ;;  %v3443_v3 = vmul.f32 1.442695, %v3394_v34 }
 0x48f   :  { %6627 = vpow2.f32 %v3433_v20  ;;  %v3340_v47 = vpop.xlane.xlu0 %3339  ;;  %v3437_v15 = vmul.f32 1.442695, %v3391_v0 }
 0x490   :  { %6629 = vpow2.f32 %v3429_v31  ;;  %v3337_v37 = vpop.xlane.xlu1 %3336  ;;  %v3396_v16 = vsub.f32 %v8692_v11, %v3340_v47 }
 0x491   :  { %6631 = vpow2.f32 %v3441_v43  ;;  %v3395_v49 = vsub.f32 %v8696_v41, %v3337_v37 }
 0x492   :  { %6633 = vpow2.f32 %v3439_v55  ;;  %v3447_v11 = vmul.f32 1.442695, %v3396_v16 }
 0x493   :  { %6635 = vpow2.f32 %v3443_v3  ;;  %v3445_v20 = vmul.f32 1.442695, %v3395_v49 }
 0x494   :  { %v8777_v42 = vpop.eup %6611  ;;  %6637 = vpow2.f32 %v3437_v15 }
 0x495   :  { %v8750_v57 = vpop.f32.mrf.mxu1  ;;  %v8782_v33 = vpop.eup %6613  ;;  %v3485_v40 = vsel %vm3280_vm0, %v8777_v42, 0.0  ;;  %6639 = vpow2.f32 %v3447_v11 }
 0x496   :  { %v3374_v25 = vsel %vm3280_vm0, %v8750_v57, -inf  ;;  %v8787_v58 = vpop.eup %6615  ;;  %v3479_v7 = vsel %vm3280_vm0, %v8782_v33, 0.0  ;;  %6641 = vpow2.f32 %v3445_v20 }
 0x497   :  { %3375 = vmax.xlane.f32.xlu0 %v3374_v25  ;;  %v8757_v26 = vpop.f32.mrf.mxu1  ;;  %v8792_v25 = vpop.eup %6617  ;;  %v3500_v60 = vsel %vm3280_vm0, %v8787_v58, 0.0 }
 0x498   :  { %v3371_v54 = vsel %vm3280_vm0, %v8757_v26, -inf  ;;  %v3346_v5 = vpop.xlane.xlu0 %3345 }
 0x499   :  { %3372 = vmax.xlane.f32.xlu1 %v3371_v54  ;;  %v8797_v54 = vpop.eup %6619  ;;  %v3398_v36 = vsub.f32 %v8700_v59, %v3346_v5 }
 0x49a   :  { %v8802_v44 = vpop.eup %6621  ;;  %v3343_v13 = vpop.xlane.xlu1 %3342 }
 0x49b   :  { %3477 = vadd.xlane.f32.xlu0 %v3476_v1  ;;  %v3494_v1 = vsel %vm3280_vm0, %v8792_v25, 0.0  ;;  %v8807_v38 = vpop.eup %6623  ;;  %v3397_v41 = vsub.f32 %v8704_v19, %v3343_v13  ;;  %v3491_v9 = vsel %vm3280_vm0, %v8802_v44, 0.0  ;;  %v3451_v31 = vmul.f32 1.442695, %v3398_v36 }
 0x49c   :  { %v3512_v59 = vsel %vm3280_vm0, %v8807_v38, 0.0 }
 0x49d   :  { %3474 = vadd.xlane.f32.xlu1 %v3473_v63  ;;  %v3497_v63 = vsel %vm3280_vm0, %v8797_v54, 0.0  ;;  %6643 = vpow2.f32 %v3451_v31 }
 0x49f   :  { %3489 = vadd.xlane.f32.xlu0 %v3488_v23  ;;  %v8812_v23 = vpop.eup %6625 }
 0x4a0   :  { %v8816_v8 = vpop.eup %6627  ;;  %v3506_v17 = vsel %vm3280_vm0, %v8812_v23, 0.0 }
 0x4a1   :  { %3483 = vadd.xlane.f32.xlu1 %v3482_v32  ;;  %v3449_v32 = vmul.f32 1.442695, %v3397_v41  ;;  %v8820_v19 = vpop.eup %6629  ;;  %v3509_v43 = vsel %vm3280_vm0, %v8816_v8, 0.0 }
 0x4a2   :  { %v8824_v34 = vpop.eup %6631 }
 0x4a3   :  { %3486 = vadd.xlane.f32.xlu0 %v3485_v40  ;;  %6645 = vpow2.f32 %v3449_v32  ;;  %v3503_v40 = vsel %vm3280_vm0, %v8820_v19, 0.0  ;;  %v8828_v47 = vpop.eup %6633  ;;  %v3521_v55 = vsel %vm3280_vm0, %v8824_v34, 0.0 }
 0x4a4   :  { %v8832_v0 = vpop.eup %6635 }
 0x4a5   :  { %3480 = vadd.xlane.f32.xlu1 %v3479_v7  ;;  %v3518_v7 = vsel %vm3280_vm0, %v8828_v47, 0.0  ;;  %v8836_v37 = vpop.eup %6637  ;;  %v3524_v3 = vsel %vm3280_vm0, %v8832_v0, 0.0 }
 0x4a6   :  { %v8840_v16 = vpop.eup %6639  ;;  %v3515_v5 = vsel %vm3280_vm0, %v8836_v37, 0.0 }
 0x4a7   :  { %3501 = vadd.xlane.f32.xlu0 %v3500_v60  ;;  %v8844_v15 = vpop.eup %6641  ;;  %v3530_v13 = vsel %vm3280_vm0, %v8840_v16, 0.0 }
 0x4a8   :  { %v3527_v20 = vsel %vm3280_vm0, %v8844_v15, 0.0 }
 0x4a9   :  { %3495 = vadd.xlane.f32.xlu1 %v3494_v1 }
 0x4aa   :  { %v8849_v11 = vpop.eup %6643 }
 0x4ab   :  { %3498 = vadd.xlane.f32.xlu0 %v3497_v63 }
 0x4ad   :  { %3492 = vadd.xlane.f32.xlu1 %v3491_v9 }
 0x4af   :  { %3513 = vadd.xlane.f32.xlu0 %v3512_v59 }
 0x4b0   :  { %v8854_v41 = vpop.eup %6645 }
 0x4b1   :  { %3507 = vadd.xlane.f32.xlu1 %v3506_v17  ;;  %v3533_v31 = vsel %vm3280_vm0, %v8854_v41, 0.0 }
 0x4b3   :  { %3510 = vadd.xlane.f32.xlu0 %v3509_v43 }
 0x4b5   :  { %3504 = vadd.xlane.f32.xlu1 %v3503_v40 }
 0x4b7   :  { %3522 = vadd.xlane.f32.xlu0 %v3521_v55 }
 0x4b9   :  { %3519 = vadd.xlane.f32.xlu1 %v3518_v7 }
 0x4bb   :  { %3525 = vadd.xlane.f32.xlu0 %v3524_v3 }
 0x4bc   :  { %v3352_v60 = vpop.xlane.xlu0 %3351 }
 0x4bd   :  { %v3400_v49 = vsub.f32 %v8708_v10, %v3352_v60  ;;  %3516 = vadd.xlane.f32.xlu1 %v3515_v5  ;;  %v3536_v10 = vsel %vm3280_vm0, %v8849_v11, 0.0 }
 0x4be   :  { %v3349_v1 = vpop.xlane.xlu1 %3348 }
 0x4bf   :  { %v3455_v36 = vmul.f32 1.442695, %v3400_v49  ;;  %v3399_v63 = vsub.f32 %v8712_v22, %v3349_v1  ;;  %3531 = vadd.xlane.f32.xlu0 %v3530_v13 }
 0x4c1   :  { %6647 = vpow2.f32 %v3455_v36  ;;  %v3453_v9 = vmul.f32 1.442695, %v3399_v63  ;;  %3528 = vadd.xlane.f32.xlu1 %v3527_v20 }
 0x4c3   :  { %6649 = vpow2.f32 %v3453_v9  ;;  %3537 = vadd.xlane.f32.xlu0 %v3536_v10 }
 0x4c5   :  { %3534 = vadd.xlane.f32.xlu1 %v3533_v31 }
 0x4ce   :  { %v8860_v59 = vpop.eup %6647 }
 0x4cf   :  { %v3542_v22 = vsel %vm3280_vm0, %v8860_v59, 0.0 }
 0x4d0   :  { %v8864_v32 = vpop.eup %6649  ;;  %3543 = vadd.xlane.f32.xlu0 %v3542_v22 }
 0x4d1   :  { %v3539_v17 = vsel %vm3280_vm0, %v8864_v32, 0.0 }
 0x4d2   :  { %3540 = vadd.xlane.f32.xlu1 %v3539_v17 }
 0x4d5   :  { %v3358_v43 = vpop.xlane.xlu0 %3357 }
 0x4d6   :  { %v3402_v40 = vsub.f32 %v8716_v61, %v3358_v43 }
 0x4d7   :  { %v3355_v55 = vpop.xlane.xlu1 %3354 }
 0x4d8   :  { %v3459_v7 = vmul.f32 1.442695, %v3402_v40  ;;  %v3401_v3 = vsub.f32 %v8720_v21, %v3355_v55 }
 0x4da   :  { %6651 = vpow2.f32 %v3459_v7  ;;  %v3457_v60 = vmul.f32 1.442695, %v3401_v3 }
 0x4dc   :  { %6653 = vpow2.f32 %v3457_v60 }
 0x4e7   :  { %v8870_v5 = vpop.eup %6651 }
 0x4e8   :  { %v3364_v49 = vpop.xlane.xlu0 %3363  ;;  %v3548_v1 = vsel %vm3280_vm0, %v8870_v5, 0.0 }
 0x4e9   :  { %v8874_v13 = vpop.eup %6653  ;;  %v3404_v36 = vsub.f32 %v8724_v53, %v3364_v49  ;;  %3549 = vadd.xlane.f32.xlu0 %v3548_v1 }
 0x4ea   :  { %v3361_v63 = vpop.xlane.xlu1 %3360  ;;  %v3545_v61 = vsel %vm3280_vm0, %v8874_v13, 0.0 }
 0x4eb   :  { %v3463_v20 = vmul.f32 1.442695, %v3404_v36  ;;  %v3403_v21 = vsub.f32 %v8728_v50, %v3361_v63  ;;  %3546 = vadd.xlane.f32.xlu1 %v3545_v61 }
 0x4ed   :  { %6655 = vpow2.f32 %v3463_v20  ;;  %v3461_v9 = vmul.f32 1.442695, %v3403_v21 }
 0x4ef   :  { %6657 = vpow2.f32 %v3461_v9 }
 0x4fa   :  { %v8880_v10 = vpop.eup %6655 }
 0x4fb   :  { %v3554_v31 = vsel %vm3280_vm0, %v8880_v10, 0.0 }
 0x4fc   :  { %v8884_v22 = vpop.eup %6657  ;;  %3555 = vadd.xlane.f32.xlu0 %v3554_v31 }
 0x4fd   :  { %v3551_v53 = vsel %vm3280_vm0, %v8884_v22, 0.0 }
 0x4fe   :  { %3552 = vadd.xlane.f32.xlu1 %v3551_v53 }
 0x50c   :  { %v3370_v17 = vpop.xlane.xlu0 %3369 }
 0x50d   :  { %v3406_v43 = vsub.f32 %v8732_v27, %v3370_v17 }
 0x50e   :  { %v3367_v40 = vpop.xlane.xlu1 %3366 }
 0x50f   :  { %v3467_v50 = vmul.f32 1.442695, %v3406_v43  ;;  %v3405_v55 = vsub.f32 %v8738_v45, %v3367_v40 }
 0x511   :  { %6659 = vpow2.f32 %v3467_v50  ;;  %v3465_v7 = vmul.f32 1.442695, %v3405_v55 }
 0x513   :  { %6661 = vpow2.f32 %v3465_v7 }
 0x51e   :  { %v8890_v3 = vpop.eup %6659 }
 0x51f   :  { %v3560_v60 = vsel %vm3280_vm0, %v8890_v3, 0.0 }
 0x520   :  { %3561 = vadd.xlane.f32.xlu0 %v3560_v60  ;;  %v3376_v49 = vpop.xlane.xlu0 %3375  ;;  %v8894_v1 = vpop.eup %6661 }
 0x521   :  { %v3408_v36 = vsub.f32 %v8750_v57, %v3376_v49  ;;  %v3557_v27 = vsel %vm3280_vm0, %v8894_v1, 0.0 }
 0x522   :  { %v3373_v63 = vpop.xlane.xlu1 %3372  ;;  %3558 = vadd.xlane.f32.xlu1 %v3557_v27 }
 0x523   :  { %v3471_v61 = vmul.f32 1.442695, %v3408_v36  ;;  %v3407_v45 = vsub.f32 %v8757_v26, %v3373_v63 }
 0x524   :  { %v3478_v20 = vpop.xlane.xlu0 %3477 }
 0x525   :  { %6663 = vpow2.f32 %v3471_v61  ;;  %v3469_v21 = vmul.f32 1.442695, %v3407_v45 }
 0x526   :  { %6665 = vrcp.f32 %v3478_v20  ;;  %v3475_v9 = vpop.xlane.xlu1 %3474 }
 0x527   :  { %6667 = vpow2.f32 %v3469_v21 }
 0x528   :  { %6669 = vrcp.f32 %v3475_v9  ;;  %v3490_v31 = vpop.xlane.xlu0 %3489 }
 0x529   :  { %6671 = vrcp.f32 %v3490_v31 }
 0x52a   :  { %v3484_v53 = vpop.xlane.xlu1 %3483 }
 0x52c   :  { %v3487_v17 = vpop.xlane.xlu0 %3486 }
 0x52d   :  { %6673 = vrcp.f32 %v3487_v17 }
 0x52e   :  { %6675 = vrcp.f32 %v3484_v53  ;;  %v3481_v57 = vpop.xlane.xlu1 %3480 }
 0x52f   :  { %6677 = vrcp.f32 %v3481_v57 }
 0x530   :  { %v3502_v43 = vpop.xlane.xlu0 %3501 }
 0x531   :  { %6679 = vrcp.f32 %v3502_v43 }
 0x532   :  { %v8900_v50 = vpop.eup %6663  ;;  %v3496_v40 = vpop.xlane.xlu1 %3495 }
 0x533   :  { %v6666_v26 = vpop.eup %6665  ;;  %v3566_v55 = vsel %vm3280_vm0, %v8900_v50, 0.0 }
 0x534   :  { %v8904_v7 = vpop.eup %6667  ;;  %3567 = vadd.xlane.f32.xlu0 %v3566_v55  ;;  %v3499_v60 = vpop.xlane.xlu0 %3498  ;;  %v3602_v61 = vmul.f32 %v6666_v26, %v8755_v24 }
 0x535   :  { %v6670_v49 = vpop.eup %6669  ;;  %6681 = vrcp.f32 %v3499_v60  ;;  %v3563_v36 = vsel %vm3280_vm0, %v8904_v7, 0.0 }
 0x536   :  { %6683 = vrcp.f32 %v3496_v40  ;;  %3564 = vadd.xlane.f32.xlu1 %v3563_v36  ;;  %v3493_v27 = vpop.xlane.xlu1 %3492  ;;  %v3601_v63 = vmul.f32 %v6670_v49, %v8762_v35  ;;  %v6672_v20 = vpop.eup %6671 }
 0x537   :  { %6685 = vrcp.f32 %v3493_v27  ;;  %v3606_v35 = vmul.f32 %v6672_v20, %v8767_v18 }
 0x538   :  { %6275 = vmatprep.mubr.msk.f32.mxu0 %vm3280_vm0, %v3601_v63  ;;  %v3514_v45 = vpop.xlane.xlu0 %3513 }
 0x539   :  { %6276 = vmatmul.mubr.msk.f32.vlgmr.msra.gmra.mxu0 %vm3280_vm0, %v3602_v61  ;;  %6687 = vrcp.f32 %v3514_v45 }
 0x53a   :  { %v6674_v21 = vpop.eup %6673  ;;  %6286 = vmatpush3.msra.mxu0 %v8156_v52  ;;  %v3508_v9 = vpop.xlane.xlu1 %3507 }
 0x53b   :  { %v6676_v31 = vpop.eup %6675  ;;  %6287 = vmatprep.subr.mxu0 %v8151_v39  ;;  %v3605_v53 = vmul.f32 %v6674_v21, %v8777_v42 }
 0x53c   :  { %v6678_v17 = vpop.eup %6677  ;;  %6288 = vmatpush3.msra.mxu0 %v8151_v39  ;;  %v3511_v24 = vpop.xlane.xlu0 %3510  ;;  %v3604_v42 = vmul.f32 %v6676_v31, %v8772_v14 }
 0x53d   :  { %6299 = vmatprep.subr.mxu0 %v8241_v62  ;;  %6689 = vrcp.f32 %v3511_v24  ;;  %6289 = vmatprep.mubr.msk.f32.mxu0 %vm3280_vm0, %v3605_v53  ;;  %v3603_v57 = vmul.f32 %v6678_v17, %v8782_v33 }
 0x53e   :  { %6691 = vrcp.f32 %v3508_v9  ;;  %6290 = vmatmul.mubr.msk.f32.vlgmr.msra.gmra.mxu0 %vm3280_vm0, %v3606_v35  ;;  %v3505_v43 = vpop.xlane.xlu1 %3504  ;;  %v6680_v40 = vpop.eup %6679 }
 0x53f   :  { %6300 = vmatpush3.msra.mxu0 %v8241_v62  ;;  %6693 = vrcp.f32 %v3505_v43  ;;  %6282 = vmatprep.mubr.msk.f32.mxu1 %vm3280_vm0, %v3603_v57  ;;  %v3610_v36 = vmul.f32 %v6680_v40, %v8787_v58  ;;  %v9215_v43 = vld [vmem:[#allocation20_spill] sm:$0xff] }
 0x540   :  { %6301 = vmatprep.subr.mxu0 %v8235_v30  ;;  %v3523_v18 = vpop.xlane.xlu0 %3522  ;;  %6283 = vmatmul.mubr.msk.f32.vlgmr.msra.gmra.mxu1 %vm3280_vm0, %v3604_v42 }
 0x541   :  { %6695 = vrcp.f32 %v3523_v18  ;;  %6293 = vmatpush3.msra.mxu1 %v8190_v51  ;;  %6302 = vmatpush3.msra.mxu0 %v8235_v30 }
 0x542   :  { %v6682_v33 = vpop.eup %6681  ;;  %6294 = vmatprep.subr.mxu1 %v8163_v56  ;;  %6313 = vmatprep.subr.mxu0 %v8334_v48  ;;  %v3520_v14 = vpop.xlane.xlu1 %3519 }
 0x543   :  { %v6684_v26 = vpop.eup %6683  ;;  %6295 = vmatpush3.msra.mxu1 %v8163_v56  ;;  %v3609_v55 = vmul.f32 %v6682_v33, %v8797_v54  ;;  %v9216_v33 = vld [vmem:[#allocation24_spill] sm:$0xff] }
 0x544   :  { %v6686_v60 = vpop.eup %6685  ;;  %6306 = vmatprep.subr.mxu1 %v8301_v2  ;;  %v3526_v49 = vpop.xlane.xlu0 %3525  ;;  %v3608_v61 = vmul.f32 %v6684_v26, %v8792_v25 }
 0x545   :  { %6697 = vrcp.f32 %v3526_v49  ;;  %6303 = vmatprep.mubr.msk.f32.mxu0 %vm3280_vm0, %v3609_v55  ;;  %v3607_v27 = vmul.f32 %v6686_v60, %v8802_v44  ;;  %v9218_v55 = vld [vmem:[#allocation18_spill] sm:$0xff] }
 0x546   :  { %6699 = vrcp.f32 %v3520_v14  ;;  %6304 = vmatmul.mubr.msk.f32.vlgmr.msra.gmra.mxu0 %vm3280_vm0, %v3610_v36  ;;  %v3517_v63 = vpop.xlane.xlu1 %3516  ;;  %v6688_v58 = vpop.eup %6687 }
 0x547   :  { %6314 = vmatpush3.msra.mxu0 %v8334_v48  ;;  %6701 = vrcp.f32 %v3517_v63  ;;  %6296 = vmatprep.mubr.msk.f32.mxu1 %vm3280_vm0, %v3607_v27  ;;  %v3614_v31 = vmul.f32 %v6688_v58, %v8807_v38  ;;  %v9219_v27 = vld [vmem:[#allocation32_spill] sm:$0xff]  ;;  %v9220_v63 = vld [vmem:[#allocation29_spill] sm:$0xff]  ;;  %v9223_v58 = vld [vmem:[#allocation42_spill] sm:$0xff] }
 0x548   :  { %6315 = vmatprep.subr.mxu0 %v8313_v6  ;;  %v3532_v54 = vpop.xlane.xlu0 %3531  ;;  %6297 = vmatmul.mubr.msk.f32.vlgmr.msra.gmra.mxu1 %vm3280_vm0, %v3608_v61  ;;  %v9221_v61 = vld [vmem:[#allocation38_spill] sm:$0xff] }
 0x549   :  { %6307 = vmatpush3.msra.mxu1 %v8301_v2  ;;  %6316 = vmatpush3.msra.mxu0 %v8313_v6  ;;  %6703 = vrcp.f32 %v3532_v54  ;;  %v9222_v54 = vld [vmem:[#allocation33_spill] sm:$0xff] }
 0x54a   :  { %v6690_v44 = vpop.eup %6689  ;;  %6308 = vmatprep.subr.mxu1 %v8264_v4  ;;  %6327 = vmatprep.subr.mxu0 %v8405_v28  ;;  %v3529_v25 = vpop.xlane.xlu1 %3528 }
 0x54b   :  { %v6692_v45 = vpop.eup %6691  ;;  %6309 = vmatpush3.msra.mxu1 %v8264_v4  ;;  %6705 = vrcp.f32 %v3529_v25  ;;  %v3613_v20 = vmul.f32 %v6690_v44, %v8816_v8 }
 0x54c   :  { %v6694_v21 = vpop.eup %6693  ;;  %6320 = vmatprep.subr.mxu1 %v8378_v12  ;;  %v3538_v9 = vpop.xlane.xlu0 %3537  ;;  %v3612_v35 = vmul.f32 %v6692_v45, %v8812_v23  ;;  %v9224_v45 = vld [vmem:[#allocation36_spill] sm:$0xff] }
 0x54d   :  { %6317 = vmatprep.mubr.msk.f32.mxu0 %vm3280_vm0, %v3613_v20  ;;  %v3611_v53 = vmul.f32 %v6694_v21, %v8820_v19  ;;  %6707 = vrcp.f32 %v3538_v9  ;;  %v9214_v19 = vld [vmem:[#allocation25_spill] sm:$0xff]  ;;  %v9225_v20 = vld [vmem:[#allocation46_spill] sm:$0xff] }
 0x54e   :  { %v6696_v17 = vpop.eup %6695  ;;  %6318 = vmatmul.mubr.msk.f32.vlgmr.msra.gmra.mxu0 %vm3280_vm0, %v3614_v31  ;;  %v3535_v24 = vpop.xlane.xlu1 %3534 }
 0x54f   :  { %6328 = vmatpush3.msra.mxu0 %v8405_v28  ;;  %6709 = vrcp.f32 %v3535_v24  ;;  %6310 = vmatprep.mubr.msk.f32.mxu1 %vm3280_vm0, %v3611_v53  ;;  %v3617_v8 = vmul.f32 %v6696_v17, %v8824_v34 }
 0x550   :  { %6329 = vmatprep.subr.mxu0 %v8400_v29  ;;  %6311 = vmatmul.mubr.msk.f32.vlgmr.msra.gmra.mxu1 %vm3280_vm0, %v3612_v35  ;;  %v9009_v35 = vld [vmem:[#allocation5 + $0x78] sm:$0xff] }
 0x551   :  { %6321 = vmatpush3.msra.mxu1 %v8378_v12  ;;  %6330 = vmatpush3.msra.mxu0 %v8400_v29 }
 0x552   :  { %v6698_v38 = vpop.eup %6697  ;;  %6322 = vmatprep.subr.mxu1 %v8372_v46  ;;  %6331 = vmatprep.mubr.msk.f32.mxu0 %vm3280_vm0, %v3617_v8  ;;  %v9226_v8 = vld [vmem:[#allocation41_spill] sm:$0xff] }
 0x553   :  { %v6700_v23 = vpop.eup %6699  ;;  %6341 = vmatprep.subr.mxu0 %v9214_v19  ;;  %6323 = vmatpush3.msra.mxu1 %v8372_v46  ;;  %v3618_v34 = vmul.f32 %v6698_v38, %v8832_v0  ;;  %v9217_v0 = vld [vmem:[#allocation34_spill] sm:$0xff] }
 0x554   :  { %v6702_v57 = vpop.eup %6701  ;;  %6334 = vmatprep.subr.mxu1 %v9215_v43  ;;  %v3616_v18 = vmul.f32 %v6700_v23, %v8828_v47 }
 0x555   :  { %6332 = vmatmul.mubr.msk.f32.vlgmr.msra.gmra.mxu0 %vm3280_vm0, %v3618_v34  ;;  %v3615_v42 = vmul.f32 %v6702_v57, %v8836_v37  ;;  %v9227_v34 = vld [vmem:[#allocation43_spill] sm:$0xff] }
 0x556   :  { %6342 = vmatpush3.msra.mxu0 %v9214_v19  ;;  %v6704_v40 = vpop.eup %6703 }
 0x557   :  { %6343 = vmatprep.subr.mxu0 %v9216_v33  ;;  %6324 = vmatprep.mubr.msk.f32.mxu1 %vm3280_vm0, %v3615_v42  ;;  %v3620_v47 = vmul.f32 %v6704_v40, %v8840_v16 }
 0x558   :  { %v6706_v14 = vpop.eup %6705  ;;  %6344 = vmatpush3.msra.mxu0 %v9216_v33  ;;  %6325 = vmatmul.mubr.msk.f32.vlgmr.msra.gmra.mxu1 %vm3280_vm0, %v3616_v18 }
 0x559   :  { %6335 = vmatpush3.msra.mxu1 %v9215_v43  ;;  %6355 = vmatprep.subr.mxu0 %v9217_v0  ;;  %v3544_v26 = vpop.xlane.xlu0 %3543  ;;  %v3619_v37 = vmul.f32 %v6706_v14, %v8844_v15 }
 0x55a   :  { %6336 = vmatprep.subr.mxu1 %v9218_v55  ;;  %v6708_v60 = vpop.eup %6707  ;;  %6711 = vrcp.f32 %v3544_v26  ;;  %v4943_v26 = vld [vmem:[#allocation5 + $0x70] sm:$0xff] }
 0x55b   :  { %6337 = vmatpush3.msra.mxu1 %v9218_v55  ;;  %6338 = vmatprep.mubr.msk.f32.mxu1 %vm3280_vm0, %v3619_v37  ;;  %v3541_v49 = vpop.xlane.xlu1 %3540  ;;  %v3622_v16 = vmul.f32 %v6708_v60, %v8849_v11  ;;  %v4941_v60 = vld [vmem:[#allocation5 + $0x60] sm:$0xff] }
 0x55c   :  { %v6710_v36 = vpop.eup %6709  ;;  %6348 = vmatprep.subr.mxu1 %v9219_v27  ;;  %6713 = vrcp.f32 %v3541_v49  ;;  %6339 = vmatmul.mubr.msk.f32.vlgmr.msra.gmra.mxu1 %vm3280_vm0, %v3620_v47  ;;  %v4942_v47 = vld [vmem:[#allocation5 + $0x68] sm:$0xff] }
 0x55d   :  { %6349 = vmatpush3.msra.mxu1 %v9219_v27  ;;  %v3621_v15 = vmul.f32 %v6710_v36, %v8854_v41  ;;  %v4938_v49 = vld [vmem:[#allocation5 + $0x48] sm:$0xff]  ;;  %v4937_v36 = vld [vmem:[#allocation5 + $0x40] sm:$0xff] }
 0x55e   :  { %6350 = vmatprep.subr.mxu1 %v9220_v63 }
 0x55f   :  { %6351 = vmatpush3.msra.mxu1 %v9220_v63  ;;  %6345 = vmatprep.mubr.msk.f32.mxu0 %vm3280_vm0, %v3621_v15  ;;  %v4936_v15 = vld [vmem:[#allocation5 + $0x38] sm:$0xff] }
 0x560   :  { %6362 = vmatprep.subr.mxu1 %v9221_v61  ;;  %6346 = vmatmul.mubr.msk.f32.vlgmr.msra.gmra.mxu0 %vm3280_vm0, %v3622_v16 }
 0x561   :  { %6356 = vmatpush3.msra.mxu0 %v9217_v0 }
 0x562   :  { %6357 = vmatprep.subr.mxu0 %v9222_v54 }
 0x563   :  { %6358 = vmatpush3.msra.mxu0 %v9222_v54 }
 0x564   :  { %6369 = vmatprep.subr.mxu0 %v9223_v58 }
 0x567   :  { %v6712_v41 = vpop.eup %6711 }
 0x568   :  { %v3624_v25 = vmul.f32 %v6712_v41, %v8860_v59 }
 0x569   :  { %v6714_v44 = vpop.eup %6713 }
 0x56a   :  { %v3623_v11 = vmul.f32 %v6714_v44, %v8864_v32  ;;  %v4935_v44 = vld [vmem:[#allocation5 + $0x30] sm:$0xff] }
 0x56c   :  { %6352 = vmatprep.mubr.msk.f32.mxu1 %vm3280_vm0, %v3623_v11 }
 0x56d   :  { %6353 = vmatmul.mubr.msk.f32.vlgmr.msra.gmra.mxu1 %vm3280_vm0, %v3624_v25 }
 0x56e   :  { %6363 = vmatpush3.msra.mxu1 %v9221_v61 }
 0x56f   :  { %6364 = vmatprep.subr.mxu1 %v9224_v45 }
 0x570   :  { %6365 = vmatpush3.msra.mxu1 %v9224_v45 }
 0x571   :  { %6376 = vmatprep.subr.mxu1 %v9225_v20 }
 0x572   :  { %v3550_v21 = vpop.xlane.xlu0 %3549 }
 0x573   :  { %6715 = vrcp.f32 %v3550_v21  ;;  %v4934_v21 = vld [vmem:[#allocation5 + $0x28] sm:$0xff] }
 0x574   :  { %v3547_v9 = vpop.xlane.xlu1 %3546 }
 0x575   :  { %6717 = vrcp.f32 %v3547_v9  ;;  %v4933_v9 = vld [vmem:[#allocation5 + $0x20] sm:$0xff] }
 0x580   :  { %v6716_v31 = vpop.eup %6715 }
 0x581   :  { %v3626_v53 = vmul.f32 %v6716_v31, %v8870_v5  ;;  %v4932_v31 = vld [vmem:[#allocation5 + $0x18] sm:$0xff] }
 0x582   :  { %v6718_v32 = vpop.eup %6717 }
 0x583   :  { %v3625_v59 = vmul.f32 %v6718_v32, %v8874_v13  ;;  %v4929_v32 = vld [vmem:[#allocation5] sm:$0xff] }
 0x585   :  { %v3556_v17 = vpop.xlane.xlu0 %3555  ;;  %6359 = vmatprep.mubr.msk.f32.mxu0 %vm3280_vm0, %v3625_v59 }
 0x586   :  { %6360 = vmatmul.mubr.msk.f32.vlgmr.msra.gmra.mxu0 %vm3280_vm0, %v3626_v53  ;;  %6719 = vrcp.f32 %v3556_v17 }
 0x587   :  { %6370 = vmatpush3.msra.mxu0 %v9223_v58  ;;  %v3553_v24 = vpop.xlane.xlu1 %3552 }
 0x588   :  { %6371 = vmatprep.subr.mxu0 %v9226_v8  ;;  %6721 = vrcp.f32 %v3553_v24 }
 0x589   :  { %6372 = vmatpush3.msra.mxu0 %v9226_v8 }
 0x58a   :  { %6383 = vmatprep.subr.mxu0 %v9009_v35 }
 0x593   :  { %v6720_v13 = vpop.eup %6719 }
 0x594   :  { %v3628_v23 = vmul.f32 %v6720_v13, %v8880_v10 }
 0x595   :  { %v6722_v5 = vpop.eup %6721 }
 0x596   :  { %v3627_v38 = vmul.f32 %v6722_v5, %v8884_v22 }
 0x598   :  { %6366 = vmatprep.mubr.msk.f32.mxu1 %vm3280_vm0, %v3627_v38 }
 0x599   :  { %6367 = vmatmul.mubr.msk.f32.vlgmr.msra.gmra.mxu1 %vm3280_vm0, %v3628_v23 }
 0x59a   :  { %6377 = vmatpush3.msra.mxu1 %v9225_v20 }
 0x59b   :  { %6378 = vmatprep.subr.mxu1 %v9227_v34 }
 0x59c   :  { %6379 = vmatpush3.msra.mxu1 %v9227_v34 }
 0x59d   :  { %6463 = vmatprep.subr.mxu1 %v9009_v35 }
 0x5a9   :  { %v3562_v57 = vpop.xlane.xlu0 %3561 }
 0x5aa   :  { %6723 = vrcp.f32 %v3562_v57 }
 0x5ab   :  { %v3559_v42 = vpop.xlane.xlu1 %3558 }
 0x5ac   :  { %6725 = vrcp.f32 %v3559_v42 }
 0x5b7   :  { %v6724_v18 = vpop.eup %6723 }
 0x5b8   :  { %v3630_v40 = vmul.f32 %v6724_v18, %v8890_v3  ;;  %v4939_v3 = vld [vmem:[#allocation5 + $0x50] sm:$0xff] }
 0x5b9   :  { %v6726_v22 = vpop.eup %6725 }
 0x5ba   :  { %v3629_v10 = vmul.f32 %v6726_v22, %v8894_v1  ;;  %v4940_v1 = vld [vmem:[#allocation5 + $0x58] sm:$0xff] }
 0x5bc   :  { %6373 = vmatprep.mubr.msk.f32.mxu0 %vm3280_vm0, %v3629_v10 }
 0x5bd   :  { %v3568_v14 = vpop.xlane.xlu0 %3567  ;;  %6374 = vmatmul.mubr.msk.f32.vlgmr.msra.gmra.mxu0 %vm3280_vm0, %v3630_v40 }
 0x5be   :  { %6727 = vrcp.f32 %v3568_v14  ;;  %6384 = vmatpush3.msra.mxu0 %v9009_v35 }
 0x5bf   :  { %v3565_v37 = vpop.xlane.xlu1 %3564  ;;  %6385 = vmatprep.subr.mxu0 %v4943_v26 }
 0x5c0   :  { %6729 = vrcp.f32 %v3565_v37  ;;  %6386 = vmatpush3.msra.mxu0 %v4943_v26 }
 0x5c1   :  { %6387 = vmatprep.subr.mxu0 %v4942_v47 }
 0x5c2   :  { %6388 = vmatpush3.msra.mxu0 %v4942_v47 }
 0x5c3   :  { %6389 = vmatprep.subr.mxu0 %v4941_v60 }
 0x5c4   :  { %6390 = vmatpush3.msra.mxu0 %v4941_v60 }
 0x5c5   :  { %6391 = vmatprep.subr.mxu0 %v4940_v1 }
 0x5c6   :  { %6392 = vmatpush3.msra.mxu0 %v4940_v1 }
 0x5c7   :  { %6393 = vmatprep.subr.mxu0 %v4939_v3 }
 0x5c8   :  { %6394 = vmatpush3.msra.mxu0 %v4939_v3 }
 0x5c9   :  { %6395 = vmatprep.subr.mxu0 %v4938_v49 }
 0x5ca   :  { %6396 = vmatpush3.msra.mxu0 %v4938_v49 }
 0x5cb   :  { %v6728_v16 = vpop.eup %6727  ;;  %6397 = vmatprep.subr.mxu0 %v4937_v36 }
 0x5cc   :  { %6398 = vmatpush3.msra.mxu0 %v4937_v36  ;;  %v3632_v25 = vmul.f32 %v6728_v16, %v8900_v50  ;;  %v4930_v50 = vld [vmem:[#allocation5 + $0x8] sm:$0xff] }
 0x5cd   :  { %v6730_v41 = vpop.eup %6729  ;;  %6399 = vmatprep.subr.mxu0 %v4936_v15 }
 0x5ce   :  { %v3631_v11 = vmul.f32 %v6730_v41, %v8904_v7  ;;  %6400 = vmatpush3.msra.mxu0 %v4936_v15  ;;  %v4931_v7 = vld [vmem:[#allocation5 + $0x10] sm:$0xff] }
 0x5cf   :  { %6401 = vmatprep.subr.mxu0 %v4935_v44 }
 0x5d0   :  { %6380 = vmatprep.mubr.msk.f32.mxu1 %vm3280_vm0, %v3631_v11  ;;  %6402 = vmatpush3.msra.mxu0 %v4935_v44 }
 0x5d1   :  { %6381 = vmatmul.mubr.msk.f32.vlgmr.msra.gmra.mxu1 %vm3280_vm0, %v3632_v25  ;;  %6403 = vmatprep.subr.mxu0 %v4934_v21 }
 0x5d2   :  { %6479 = vmatpush3.msra.mxu1 %v9009_v35  ;;  %6404 = vmatpush3.msra.mxu0 %v4934_v21 }
 0x5d3   :  { %6464 = vmatprep.subr.mxu1 %v4943_v26  ;;  %6405 = vmatprep.subr.mxu0 %v4933_v9 }
 0x5d4   :  { %6480 = vmatpush3.msra.mxu1 %v4943_v26  ;;  %6406 = vmatpush3.msra.mxu0 %v4933_v9 }
 0x5d5   :  { %6465 = vmatprep.subr.mxu1 %v4942_v47  ;;  %6407 = vmatprep.subr.mxu0 %v4932_v31 }
 0x5d6   :  { %6481 = vmatpush3.msra.mxu1 %v4942_v47  ;;  %6408 = vmatpush3.msra.mxu0 %v4932_v31 }
 0x5d7   :  { %6466 = vmatprep.subr.mxu1 %v4941_v60  ;;  %6409 = vmatprep.subr.mxu0 %v4931_v7 }
 0x5d8   :  { %6482 = vmatpush3.msra.mxu1 %v4941_v60  ;;  %6410 = vmatpush3.msra.mxu0 %v4931_v7 }
 0x5d9   :  { %6467 = vmatprep.subr.mxu1 %v4940_v1  ;;  %6411 = vmatprep.subr.mxu0 %v4930_v50 }
 0x5da   :  { %6483 = vmatpush3.msra.mxu1 %v4940_v1  ;;  %6412 = vmatpush3.msra.mxu0 %v4930_v50 }
 0x5db   :  { %6468 = vmatprep.subr.mxu1 %v4939_v3  ;;  %6413 = vmatprep.subr.mxu0 %v4929_v32 }
 0x5dc   :  { %6484 = vmatpush3.msra.mxu1 %v4939_v3  ;;  %6414 = vmatpush3.msra.mxu0 %v4929_v32 }
 0x5dd   :  { %6469 = vmatprep.subr.mxu1 %v4938_v49 }
 0x5de   :  { %6485 = vmatpush3.msra.mxu1 %v4938_v49 }
 0x5df   :  { %6470 = vmatprep.subr.mxu1 %v4937_v36 }
 0x5e0   :  { %6486 = vmatpush3.msra.mxu1 %v4937_v36 }
 0x5e1   :  { %6471 = vmatprep.subr.mxu1 %v4936_v15 }
 0x5e2   :  { %6487 = vmatpush3.msra.mxu1 %v4936_v15 }
 0x5e3   :  { %6472 = vmatprep.subr.mxu1 %v4935_v44 }
 0x5e4   :  { %6488 = vmatpush3.msra.mxu1 %v4935_v44 }
 0x5e5   :  { %6473 = vmatprep.subr.mxu1 %v4934_v21 }
 0x5e6   :  { %6489 = vmatpush3.msra.mxu1 %v4934_v21 }
 0x5e7   :  { %6474 = vmatprep.subr.mxu1 %v4933_v9 }
 0x5e8   :  { %6490 = vmatpush3.msra.mxu1 %v4933_v9 }
 0x5e9   :  { %6475 = vmatprep.subr.mxu1 %v4932_v31 }
 0x5ea   :  { %6491 = vmatpush3.msra.mxu1 %v4932_v31 }
 0x5eb   :  { %6476 = vmatprep.subr.mxu1 %v4931_v7 }
 0x5ec   :  { %6492 = vmatpush3.msra.mxu1 %v4931_v7  ;;  %v9228_v7 = vld [vmem:[#allocation21_spill] sm:$0xff] }
 0x5ed   :  { %6477 = vmatprep.subr.mxu1 %v4930_v50 }
 0x5ee   :  { %6493 = vmatpush3.msra.mxu1 %v4930_v50 }
 0x5ef   :  { %6478 = vmatprep.subr.mxu1 %v4929_v32 }
 0x5f0   :  { %6494 = vmatpush3.msra.mxu1 %v4929_v32 }
 0x5f9   :  { %v6277_v59 = vpop.f32.mrf.mxu0 }
 0x5fb   :  { %v3705_v53 = vpop.f32.mrf.mxu0 }
 0x5fc   :  { %6415 = vmatprep.mubr.f32.mxu0 %v3705_v53  ;;  %v9229_v53 = vld [vmem:[#allocation19_spill] sm:$0xff] }
 0x5fd   :  { %6416 = vmatmul.mubr.f32.vlgmr.msra.gmra.mxu0 %v6277_v59 }
 0x5fe   :  { %v6291_v17 = vpop.f32.mrf.mxu0 }
 0x600   :  { %v6284_v24 = vpop.f32.mrf.mxu1  ;;  %v3867_v13 = vpop.f32.mrf.mxu0 }
 0x602   :  { %v3786_v35 = vpop.f32.mrf.mxu1 }
 0x603   :  { %6418 = vmatprep.mubr.f32.mxu0 %v3786_v35 }
 0x604   :  { %6419 = vmatmul.mubr.f32.gmra.mxu0 %v6284_v24 }
 0x605   :  { %6421 = vmatprep.mubr.f32.mxu0 %v3867_v13  ;;  %v9230_v13 = vld [vmem:[#allocation23_spill] sm:$0xff] }
 0x606   :  { %v6305_v5 = vpop.f32.mrf.mxu0 }
 0x608   :  { %v6298_v38 = vpop.f32.mrf.mxu1  ;;  %6422 = vmatmul.mubr.f32.gmra.mxu0 %v6291_v17  ;;  %v4029_v57 = vpop.f32.mrf.mxu0 }
 0x60a   :  { %v3948_v23 = vpop.f32.mrf.mxu1 }
 0x60b   :  { %6424 = vmatprep.mubr.f32.mxu0 %v3948_v23 }
 0x60c   :  { %6425 = vmatmul.mubr.f32.gmra.mxu0 %v6298_v38 }
 0x60d   :  { %6427 = vmatprep.mubr.f32.mxu0 %v4029_v57  ;;  %v9231_v57 = vld [vmem:[#allocation22_spill] sm:$0xff] }
 0x60e   :  { %v6319_v42 = vpop.f32.mrf.mxu0 }
 0x610   :  { %v6312_v18 = vpop.f32.mrf.mxu1  ;;  %6428 = vmatmul.mubr.f32.gmra.mxu0 %v6305_v5  ;;  %v4191_v10 = vpop.f32.mrf.mxu0 }
 0x612   :  { %v4110_v22 = vpop.f32.mrf.mxu1 }
 0x613   :  { %6430 = vmatprep.mubr.f32.mxu0 %v4110_v22 }
 0x614   :  { %6431 = vmatmul.mubr.f32.gmra.mxu0 %v6312_v18 }
 0x615   :  { %v6333_v40 = vpop.f32.mrf.mxu0  ;;  %6433 = vmatprep.mubr.f32.mxu0 %v4191_v10  ;;  %v9232_v10 = vld [vmem:[#allocation27_spill] sm:$0xff] }
 0x617   :  { %v4353_v14 = vpop.f32.mrf.mxu0 }
 0x618   :  { %v6326_v26 = vpop.f32.mrf.mxu1  ;;  %6434 = vmatmul.mubr.f32.gmra.mxu0 %v6319_v42  ;;  %6439 = vmatprep.mubr.f32.mxu1 %v4353_v14 }
 0x619   :  { %6440 = vmatmul.mubr.f32.vlgmr.msra.gmra.mxu1 %v6333_v40 }
 0x61a   :  { %v4272_v37 = vpop.f32.mrf.mxu1 }
 0x61b   :  { %6436 = vmatprep.mubr.f32.mxu0 %v4272_v37  ;;  %v9233_v37 = vld [vmem:[#allocation26_spill] sm:$0xff] }
 0x61c   :  { %v6340_v47 = vpop.f32.mrf.mxu1  ;;  %6437 = vmatmul.mubr.f32.gmra.mxu0 %v6326_v26 }
 0x61e   :  { %v4434_v60 = vpop.f32.mrf.mxu1 }
 0x61f   :  { %6442 = vmatprep.mubr.f32.mxu1 %v4434_v60 }
 0x620   :  { %v6347_v1 = vpop.f32.mrf.mxu0  ;;  %6443 = vmatmul.mubr.f32.gmra.mxu1 %v6340_v47 }
 0x622   :  { %v4515_v3 = vpop.f32.mrf.mxu0 }
 0x623   :  { %6445 = vmatprep.mubr.f32.mxu1 %v4515_v3  ;;  %v9234_v3 = vld [vmem:[#allocation30_spill] sm:$0xff] }
 0x624   :  { %6446 = vmatmul.mubr.f32.gmra.mxu1 %v6347_v1 }
 0x62d   :  { %v6354_v49 = vpop.f32.mrf.mxu1 }
 0x62f   :  { %v4596_v36 = vpop.f32.mrf.mxu1 }
 0x630   :  { %6448 = vmatprep.mubr.f32.mxu1 %v4596_v36 }
 0x631   :  { %6449 = vmatmul.mubr.f32.gmra.mxu1 %v6354_v49 }
 0x646   :  { %v6361_v15 = vpop.f32.mrf.mxu0 }
 0x648   :  { %v4677_v16 = vpop.f32.mrf.mxu0 }
 0x649   :  { %6451 = vmatprep.mubr.f32.mxu1 %v4677_v16 }
 0x64a   :  { %6452 = vmatmul.mubr.f32.gmra.mxu1 %v6361_v15 }
 0x659   :  { %v6368_v41 = vpop.f32.mrf.mxu1 }
 0x65b   :  { %v4758_v44 = vpop.f32.mrf.mxu1 }
 0x65c   :  { %6454 = vmatprep.mubr.f32.mxu1 %v4758_v44 }
 0x65d   :  { %6455 = vmatmul.mubr.f32.gmra.mxu1 %v6368_v41  ;;  %v9235_v41 = vld [vmem:[#allocation28_spill] sm:$0xff] }
 0x67d   :  { %v6375_v11 = vpop.f32.mrf.mxu0 }
 0x67f   :  { %v4839_v25 = vpop.f32.mrf.mxu0 }
 0x680   :  { %6457 = vmatprep.mubr.f32.mxu1 %v4839_v25 }
 0x681   :  { %6458 = vmatmul.mubr.f32.gmra.mxu1 %v6375_v11 }
 0x691   :  { %v6382_v21 = vpop.f32.mrf.mxu1 }
 0x693   :  { %v4920_v9 = vpop.f32.mrf.mxu1 }
 0x694   :  { %6460 = vmatprep.mubr.f32.mxu1 %v4920_v9 }
 0x695   :  { %6461 = vmatmul.mubr.f32.gmra.mxu1 %v6382_v21 }
 0x6bd   :  { %v6417_v31 = vpop.f32.mrf.mxu0 }
 0x6be   :  { %v5171_v50 = vadd.f32 %v6417_v31, %v9228_v7  ;;  %v9236_v31 = vld [vmem:[#allocation35_spill] sm:$0xff] }
 0x6bf   :  { %v5011_v32 = vpop.f32.mrf.mxu0 }
 0x6c0   :  { %v5952_v59 = vmul.f32 -1.442695, %v5171_v50  ;;  %v5170_v17 = vadd.f32 %v5011_v32, %v9229_v53  ;;  %v9237_v53 = vld [vmem:[#allocation31_spill] sm:$0xff] }
 0x6c2   :  { %6731 = vpow2.f32 %v5952_v59  ;;  %v5951_v24 = vmul.f32 -1.442695, %v5170_v17 }
 0x6c4   :  { %6733 = vpow2.f32 %v5951_v24  ;;  %v6420_v35 = vpop.f32.mrf.mxu0 }
 0x6c5   :  { %v5173_v5 = vadd.f32 %v6420_v35, %v9230_v13  ;;  %v9238_v13 = vld [vmem:[#allocation39_spill] sm:$0xff] }
 0x6c6   :  { %v5021_v38 = vpop.f32.mrf.mxu0 }
 0x6c7   :  { %v5954_v23 = vmul.f32 -1.442695, %v5173_v5  ;;  %v5172_v42 = vadd.f32 %v5021_v38, %v9231_v57 }
 0x6c8   :  { %v6423_v18 = vpop.f32.mrf.mxu0 }
 0x6c9   :  { %6735 = vpow2.f32 %v5954_v23  ;;  %v5953_v22 = vmul.f32 -1.442695, %v5172_v42  ;;  %v5175_v40 = vadd.f32 %v6423_v18, %v9232_v10  ;;  %v9239_v18 = vld [vmem:[#allocation37_spill] sm:$0xff] }
 0x6ca   :  { %v5031_v14 = vpop.f32.mrf.mxu0 }
 0x6cb   :  { %6737 = vpow2.f32 %v5953_v22  ;;  %v5956_v26 = vmul.f32 -1.442695, %v5175_v40  ;;  %v5174_v47 = vadd.f32 %v5031_v14, %v9233_v37  ;;  %v9240_v37 = vld [vmem:[#allocation44_spill] sm:$0xff] }
 0x6cc   :  { %v6426_v60 = vpop.f32.mrf.mxu0 }
 0x6cd   :  { %6739 = vpow2.f32 %v5956_v26  ;;  %v5955_v1 = vmul.f32 -1.442695, %v5174_v47  ;;  %v5177_v49 = vadd.f32 %v6426_v60, %v9234_v3  ;;  %v9241_v3 = vld [vmem:[#allocation49_spill] sm:$0xff] }
 0x6ce   :  { %v5041_v36 = vpop.f32.mrf.mxu0 }
 0x6cf   :  { %v6732_v15 = vpop.eup %6731  ;;  %6741 = vpow2.f32 %v5955_v1  ;;  %v5958_v16 = vmul.f32 -1.442695, %v5177_v49  ;;  %v5176_v44 = vadd.f32 %v5041_v36, %v9235_v41  ;;  %v9242_v41 = vld [vmem:[#allocation40_spill] sm:$0xff] }
 0x6d0   :  { %v5299_v11 = vadd.f32 1.0, %v6732_v15  ;;  %v6429_v25 = vpop.f32.mrf.mxu0 }
 0x6d1   :  { %v6734_v21 = vpop.eup %6733  ;;  %6743 = vpow2.f32 %v5958_v16  ;;  %v5957_v9 = vmul.f32 -1.442695, %v5176_v44  ;;  %v5179_v7 = vadd.f32 %v6429_v25, %v9236_v31 }
 0x6d2   :  { %6745 = vrcp.f32 %v5299_v11  ;;  %v5298_v50 = vadd.f32 1.0, %v6734_v21  ;;  %v5051_v32 = vpop.f32.mrf.mxu0 }
 0x6d3   :  { %6747 = vpow2.f32 %v5957_v9  ;;  %v5960_v59 = vmul.f32 -1.442695, %v5179_v7  ;;  %v5178_v17 = vadd.f32 %v5051_v32, %v9237_v53  ;;  %v9243_v9 = vld [vmem:[#allocation48_spill] sm:$0xff]  ;;  %v9244_v53 = vld [vmem:[#allocation47_spill] sm:$0xff] }
 0x6d4   :  { %6749 = vrcp.f32 %v5298_v50  ;;  %v6432_v24 = vpop.f32.mrf.mxu0 }
 0x6d5   :  { %6751 = vpow2.f32 %v5960_v59  ;;  %v5959_v35 = vmul.f32 -1.442695, %v5178_v17  ;;  %v5181_v5 = vadd.f32 %v6432_v24, %v9238_v13 }
 0x6d6   :  { %v6736_v38 = vpop.eup %6735  ;;  %v5061_v23 = vpop.f32.mrf.mxu0 }
 0x6d7   :  { %v5301_v57 = vadd.f32 1.0, %v6736_v38  ;;  %6753 = vpow2.f32 %v5959_v35  ;;  %v5962_v42 = vmul.f32 -1.442695, %v5181_v5  ;;  %v5180_v22 = vadd.f32 %v5061_v23, %v9239_v18  ;;  %v9245_v38 = vld [vmem:[#allocation15_spill] sm:$0xff] }
 0x6d8   :  { %v6738_v10 = vpop.eup %6737  ;;  %v6435_v40 = vpop.f32.mrf.mxu0 }
 0x6d9   :  { %6755 = vrcp.f32 %v5301_v57  ;;  %v5300_v14 = vadd.f32 1.0, %v6738_v10  ;;  %v5961_v26 = vmul.f32 -1.442695, %v5180_v22  ;;  %v5183_v47 = vadd.f32 %v6435_v40, %v9240_v37  ;;  %v6441_v60 = vpop.f32.mrf.mxu1 }
 0x6da   :  { %v6740_v1 = vpop.eup %6739  ;;  %6757 = vpow2.f32 %v5962_v42  ;;  %v5187_v49 = vadd.f32 %v6441_v60, %v9241_v3  ;;  %v5071_v36 = vpop.f32.mrf.mxu0  ;;  %v9246_v42 = vld [vmem:[#allocation45_spill] sm:$0xff] }
 0x6db   :  { %6759 = vrcp.f32 %v5300_v14  ;;  %v5303_v15 = vadd.f32 1.0, %v6740_v1  ;;  %v5964_v16 = vmul.f32 -1.442695, %v5183_v47  ;;  %v5182_v44 = vadd.f32 %v5071_v36, %v9242_v41  ;;  %v5091_v11 = vpop.f32.mrf.mxu1  ;;  %v9247_v14 = vld [vmem:[#allocation51_spill] sm:$0xff]  ;;  %v9248_v47 = vld [vmem:[#allocation14_spill] sm:$0xff] }
 0x6dc   :  { %v6742_v25 = vpop.eup %6741  ;;  %6761 = vpow2.f32 %v5961_v26  ;;  %v5968_v21 = vmul.f32 -1.442695, %v5187_v49  ;;  %v5186_v31 = vadd.f32 %v5091_v11, %v9243_v9  ;;  %v6438_v7 = vpop.f32.mrf.mxu0  ;;  %v9249_v36 = vld [vmem:[#allocation50_spill] sm:$0xff] }
 0x6dd   :  { %6763 = vrcp.f32 %v5303_v15  ;;  %v5302_v50 = vadd.f32 1.0, %v6742_v25  ;;  %v5963_v59 = vmul.f32 -1.442695, %v5182_v44  ;;  %v5185_v17 = vadd.f32 %v6438_v7, %v9244_v53 }
 0x6de   :  { %v6744_v32 = vpop.eup %6743  ;;  %6765 = vpow2.f32 %v5964_v16  ;;  %v5081_v24 = vpop.f32.mrf.mxu0  ;;  %v5967_v57 = vmul.f32 -1.442695, %v5186_v31 }
 0x6df   :  { %v6746_v35 = vpop.eup %6745  ;;  %6767 = vrcp.f32 %v5302_v50  ;;  %v5305_v13 = vadd.f32 1.0, %v6744_v32  ;;  %v5184_v18 = vadd.f32 %v5081_v24, %v9246_v42  ;;  %v5966_v1 = vmul.f32 -1.442695, %v5185_v17  ;;  %v9251_v32 = vld [vmem:[#allocation17_spill] sm:$0xff]  ;;  %v9252_v17 = vld [vmem:[#allocation52_spill] sm:$0xff] }
 0x6e0   :  { %v6748_v5 = vpop.eup %6747  ;;  %v5395_v23 = vmul.f32 %v6746_v35, %v9245_v38  ;;  %6769 = vpow2.f32 %v5968_v21  ;;  %v6444_v22 = vpop.f32.mrf.mxu1  ;;  %v9250_v21 = vld [vmem:[#allocation53_spill] sm:$0xff]  ;;  %v9253_v38 = vld [vmem:[#allocation16_spill] sm:$0xff] }
 0x6e1   :  { %v6750_v10 = vpop.eup %6749  ;;  %6771 = vrcp.f32 %v5305_v13  ;;  %v5304_v40 = vadd.f32 1.0, %v6748_v5  ;;  %v5189_v26 = vadd.f32 %v6444_v22, %v9247_v14  ;;  %v5965_v41 = vmul.f32 -1.442695, %v5184_v18 }
 0x6e2   :  { %v6752_v37 = vpop.eup %6751  ;;  %5427 = vst [vmem:[#allocation7 + $0x8] sm:$0xff] %v5395_v23  ;;  %v5394_v60 = vmul.f32 %v6750_v10, %v9248_v47  ;;  %6773 = vpow2.f32 %v5963_v59  ;;  %v5101_v3 = vpop.f32.mrf.mxu1 }
 0x6e3   :  { %6775 = vrcp.f32 %v5304_v40  ;;  %v5307_v49 = vadd.f32 1.0, %v6752_v37  ;;  %v5188_v15 = vadd.f32 %v5101_v3, %v9249_v36  ;;  %v5970_v25 = vmul.f32 -1.442695, %v5189_v26 }
 0x6e4   :  { %v6754_v16 = vpop.eup %6753  ;;  %5426 = vst [vmem:[#allocation7] sm:$0xff] %v5394_v60  ;;  %6777 = vpow2.f32 %v5967_v57  ;;  %v6447_v44 = vpop.f32.mrf.mxu1  ;;  %v5458_v22 = vadd.f32 %v5395_v23, %v5394_v60 }
 0x6e5   :  { %6779 = vrcp.f32 %v5307_v49  ;;  %v5306_v11 = vadd.f32 1.0, %v6754_v16  ;;  %v5191_v9 = vadd.f32 %v6447_v44, %v9250_v21  ;;  %v5969_v53 = vmul.f32 -1.442695, %v5188_v15 }
 0x6e6   :  { %v6756_v31 = vpop.eup %6755  ;;  %6781 = vpow2.f32 %v5966_v1  ;;  %v5111_v7 = vpop.f32.mrf.mxu1  ;;  %v5459_v36 = vrot.slane %v5458_v22, 4 }
 0x6e7   :  { %v6758_v50 = vpop.eup %6757  ;;  %v5397_v59 = vmul.f32 %v6756_v31, %v9251_v32  ;;  %6783 = vrcp.f32 %v5306_v11  ;;  %v5190_v24 = vadd.f32 %v5111_v7, %v9252_v17  ;;  %v5972_v42 = vmul.f32 -1.442695, %v5191_v9  ;;  %v9254_v31 = vld [vmem:[#allocation55_spill] sm:$0xff] }
 0x6e8   :  { %v6760_v35 = vpop.eup %6759  ;;  %v5309_v13 = vadd.f32 1.0, %v6758_v50  ;;  %6785 = vpow2.f32 %v5965_v41  ;;  %v5460_v21 = vadd.f32 %v5459_v36, %v5458_v22 }
 0x6e9   :  { %v6762_v5 = vpop.eup %6761  ;;  %5429 = vst [vmem:[#allocation7 + $0x18] sm:$0xff] %v5397_v59  ;;  %v5396_v57 = vmul.f32 %v6760_v35, %v9253_v38  ;;  %6787 = vpow2.f32 %v5970_v25  ;;  %v5971_v26 = vmul.f32 -1.442695, %v5190_v24  ;;  %v9255_v35 = vld [vmem:[#allocation54_spill] sm:$0xff] }
 0x6ea   :  { %v6764_v18 = vpop.eup %6763  ;;  %6789 = vrcp.f32 %v5309_v13  ;;  %v5308_v10 = vadd.f32 1.0, %v6762_v5 }
 0x6eb   :  { %v6766_v40 = vpop.eup %6765  ;;  %5428 = vst [vmem:[#allocation7 + $0x10] sm:$0xff] %v5396_v57  ;;  %v5399_v14 = vmul.f32 %v6764_v18, %v8156_v52  ;;  %6791 = vpow2.f32 %v5969_v53  ;;  %v5465_v44 = vadd.f32 %v5397_v59, %v5396_v57  ;;  %v5461_v18 = vrot.slane %v5460_v21, 2 }
 0x6ec   :  { %v6768_v37 = vpop.eup %6767  ;;  %6793 = vrcp.f32 %v5308_v10  ;;  %v5311_v47 = vadd.f32 1.0, %v6766_v40 }
 0x6ed   :  { %v6770_v1 = vpop.eup %6769  ;;  %5431 = vst [vmem:[#allocation7 + $0x28] sm:$0xff] %v5399_v14  ;;  %v5398_v3 = vmul.f32 %v6768_v37, %v8151_v39  ;;  %6795 = vpow2.f32 %v5972_v42  ;;  %v5466_v5 = vrot.slane %v5465_v44, 4 }
 0x6ee   :  { %v6772_v49 = vpop.eup %6771  ;;  %6797 = vrcp.f32 %v5311_v47  ;;  %v5315_v23 = vadd.f32 1.0, %v6770_v1 }
 0x6ef   :  { %v6774_v60 = vpop.eup %6773  ;;  %5430 = vst [vmem:[#allocation7 + $0x20] sm:$0xff] %v5398_v3  ;;  %v5401_v15 = vmul.f32 %v6772_v49, %v8190_v51  ;;  %6799 = vpow2.f32 %v5971_v26  ;;  %v5472_v32 = vadd.f32 %v5399_v14, %v5398_v3  ;;  %v5467_v3 = vadd.f32 %v5466_v5, %v5465_v44 }
 0x6f0   :  { %v6776_v52 = vpop.eup %6775  ;;  %6801 = vrcp.f32 %v5315_v23  ;;  %v5310_v16 = vadd.f32 1.0, %v6774_v60 }
 0x6f1   :  { %v6778_v41 = vpop.eup %6777  ;;  %5433 = vst [vmem:[#allocation7 + $0x38] sm:$0xff] %v5401_v15  ;;  %v5400_v11 = vmul.f32 %v6776_v52, %v8163_v56  ;;  %v6450_v25 = vpop.f32.mrf.mxu1 }
 0x6f2   :  { %v6780_v39 = vpop.eup %6779  ;;  %6803 = vrcp.f32 %v5310_v16  ;;  %v5314_v9 = vadd.f32 1.0, %v6778_v41  ;;  %v5193_v7 = vadd.f32 %v6450_v25, %v9254_v31  ;;  %v5462_v41 = vadd.f32 %v5461_v18, %v5460_v21 }
 0x6f3   :  { %v6782_v50 = vpop.eup %6781  ;;  %5432 = vst [vmem:[#allocation7 + $0x30] sm:$0xff] %v5400_v11  ;;  %v5403_v51 = vmul.f32 %v6780_v39, %v8241_v62  ;;  %v5121_v53 = vpop.f32.mrf.mxu1  ;;  %v5479_v38 = vadd.f32 %v5401_v15, %v5400_v11  ;;  %v5473_v62 = vrot.slane %v5472_v32, 4  ;;  %v5468_v39 = vrot.slane %v5467_v3, 2 }
 0x6f4   :  { %v6784_v17 = vpop.eup %6783  ;;  %6805 = vrcp.f32 %v5314_v9  ;;  %v5313_v24 = vadd.f32 1.0, %v6782_v50  ;;  %v5974_v59 = vmul.f32 -1.442695, %v5193_v7  ;;  %v5192_v13 = vadd.f32 %v5121_v53, %v9255_v35 }
 0x6f5   :  { %v6786_v56 = vpop.eup %6785  ;;  %5435 = vst [vmem:[#allocation7 + $0x48] sm:$0xff] %v5403_v51  ;;  %v5402_v57 = vmul.f32 %v6784_v17, %v8235_v30  ;;  %v5480_v49 = vrot.slane %v5479_v38, 4  ;;  %v5474_v52 = vadd.f32 %v5473_v62, %v5472_v32  ;;  %v5463_v32 = vrot.slane %v5462_v41, 1 }
 0x6f6   :  { %v6788_v42 = vpop.eup %6787  ;;  %6807 = vrcp.f32 %v5313_v24  ;;  %v5312_v22 = vadd.f32 1.0, %v6786_v56  ;;  %v5973_v10 = vmul.f32 -1.442695, %v5192_v13  ;;  %v5469_v24 = vadd.f32 %v5468_v39, %v5467_v3 }
 0x6f7   :  { %v6790_v40 = vpop.eup %6789  ;;  %5434 = vst [vmem:[#allocation7 + $0x40] sm:$0xff] %v5402_v57  ;;  %v5486_v14 = vadd.f32 %v5403_v51, %v5402_v57  ;;  %v5317_v26 = vadd.f32 1.0, %v6788_v42  ;;  %6809 = vpow2.f32 %v5974_v59  ;;  %v5481_v31 = vadd.f32 %v5480_v49, %v5479_v38 }
 0x6f8   :  { %v6792_v37 = vpop.eup %6791  ;;  %v5405_v47 = vmul.f32 %v6790_v40, %v8301_v2  ;;  %6811 = vrcp.f32 %v5312_v22  ;;  %v5475_v53 = vrot.slane %v5474_v52, 2  ;;  %v5470_v62 = vrot.slane %v5469_v24, 1 }
 0x6f9   :  { %v6794_v1 = vpop.eup %6793  ;;  %6813 = vrcp.f32 %v5317_v26  ;;  %v5316_v30 = vadd.f32 1.0, %v6792_v37  ;;  %v5487_v60 = vrot.slane %v5486_v14, 4  ;;  %v5482_v59 = vrot.slane %v5481_v31, 2 }
 0x6fa   :  { %v6796_v36 = vpop.eup %6795  ;;  %5437 = vst [vmem:[#allocation7 + $0x58] sm:$0xff] %v5405_v47  ;;  %v5404_v23 = vmul.f32 %v6794_v1, %v8264_v4  ;;  %6815 = vpow2.f32 %v5973_v10  ;;  %v5476_v38 = vadd.f32 %v5475_v53, %v5474_v52 }
 0x6fb   :  { %v6798_v15 = vpop.eup %6797  ;;  %6817 = vrcp.f32 %v5316_v30  ;;  %v5319_v16 = vadd.f32 1.0, %v6796_v36  ;;  %v5488_v7 = vadd.f32 %v5487_v60, %v5486_v14  ;;  %v5483_v14 = vadd.f32 %v5482_v59, %v5481_v31 }
 0x6fc   :  { %v6800_v11 = vpop.eup %6799  ;;  %5436 = vst [vmem:[#allocation7 + $0x50] sm:$0xff] %v5404_v23  ;;  %v5407_v2 = vmul.f32 %v6798_v15, %v8334_v48  ;;  %v5493_v25 = vadd.f32 %v5405_v47, %v5404_v23  ;;  %v5477_v30 = vrot.slane %v5476_v38, 1 }
 0x6fd   :  { %v6802_v44 = vpop.eup %6801  ;;  %6819 = vrcp.f32 %v5319_v16  ;;  %v5318_v9 = vadd.f32 1.0, %v6800_v11  ;;  %v5489_v13 = vrot.slane %v5488_v7, 2 }
 0x6fe   :  { %5439 = vst [vmem:[#allocation7 + $0x68] sm:$0xff] %v5407_v2  ;;  %v5411_v4 = vmul.f32 %v6802_v44, %v8405_v28  ;;  %v5494_v50 = vrot.slane %v5493_v25, 4  ;;  %v5464_v28 = vadd.f32 %v5463_v32, %v5462_v41  ;;  %v5471_v41 = vadd.f32 %v5470_v62, %v5469_v24 }
 0x6ff   :  { %v6804_v51 = vpop.eup %6803  ;;  %6821 = vrcp.f32 %v5318_v9  ;;  %v5490_v47 = vadd.f32 %v5489_v13, %v5488_v7  ;;  %v5478_v32 = vadd.f32 %v5477_v30, %v5476_v38 }
 0x700   :  { %5443 = vst [vmem:[#allocation7 + $0x88] sm:$0xff] %v5411_v4  ;;  %v5406_v21 = vmul.f32 %v6804_v51, %v8313_v6  ;;  %v5495_v17 = vadd.f32 %v5494_v50, %v5493_v25  ;;  %v5571_v36 = vmul.f32 0.0625, %v5464_v28  ;;  %v5572_v28 = vmul.f32 0.0625, %v5471_v41 }
 0x701   :  { %v6806_v48 = vpop.eup %6805  ;;  %v5491_v44 = vrot.slane %v5490_v47, 1 }
 0x702   :  { %5438 = vst [vmem:[#allocation7 + $0x60] sm:$0xff] %v5406_v21  ;;  %v5410_v35 = vmul.f32 %v6806_v48, %v8400_v29  ;;  %v5500_v56 = vadd.f32 %v5407_v2, %v5406_v21  ;;  %v5496_v22 = vrot.slane %v5495_v17, 2 }
 0x703   :  { %v6808_v5 = vpop.eup %6807 }
 0x704   :  { %v6810_v57 = vpop.eup %6809  ;;  %5442 = vst [vmem:[#allocation7 + $0x80] sm:$0xff] %v5410_v35  ;;  %v5514_v42 = vadd.f32 %v5411_v4, %v5410_v35  ;;  %v5409_v18 = vmul.f32 %v6808_v5, %v8378_v12  ;;  %v5501_v10 = vrot.slane %v5500_v56, 4  ;;  %v5497_v15 = vadd.f32 %v5496_v22, %v5495_v17  ;;  %v9256_v4 = vld [vmem:[#allocation57_spill] sm:$0xff]  ;;  %v9257_v35 = vld [vmem:[#allocation56_spill] sm:$0xff] }
 0x705   :  { %v6812_v6 = vpop.eup %6811  ;;  %v5321_v40 = vadd.f32 1.0, %v6810_v57  ;;  %v5492_v5 = vadd.f32 %v5491_v44, %v5490_v47 }
 0x706   :  { %v6814_v26 = vpop.eup %6813  ;;  %v5515_v37 = vrot.slane %v5514_v42, 4  ;;  %5441 = vst [vmem:[#allocation7 + $0x78] sm:$0xff] %v5409_v18  ;;  %v5408_v29 = vmul.f32 %v6812_v6, %v8372_v46  ;;  %v5502_v1 = vadd.f32 %v5501_v10, %v5500_v56  ;;  %v5484_v46 = vrot.slane %v5483_v14, 1 }
 0x707   :  { %v6816_v3 = vpop.eup %6815  ;;  %v5413_v49 = vmul.f32 %v6814_v26, %v9215_v43  ;;  %6823 = vrcp.f32 %v5321_v40  ;;  %v5498_v53 = vrot.slane %v5497_v15, 1  ;;  %v5573_v6 = vmul.f32 0.0625, %v5478_v32 }
 0x708   :  { %v6818_v12 = vpop.eup %6817  ;;  %v5516_v23 = vadd.f32 %v5515_v37, %v5514_v42  ;;  %5440 = vst [vmem:[#allocation7 + $0x70] sm:$0xff] %v5408_v29  ;;  %v5320_v60 = vadd.f32 1.0, %v6816_v3  ;;  %v5503_v52 = vrot.slane %v5502_v1, 2  ;;  %v5507_v11 = vadd.f32 %v5409_v18, %v5408_v29 }
 0x709   :  { %5445 = vst [vmem:[#allocation7 + $0x98] sm:$0xff] %v5413_v49  ;;  %v5412_v16 = vmul.f32 %v6818_v12, %v9218_v55  ;;  %v5485_v56 = vadd.f32 %v5484_v46, %v5483_v14  ;;  %v5499_v38 = vadd.f32 %v5498_v53, %v5497_v15  ;;  %v5575_v47 = vmul.f32 0.0625, %v5492_v5 }
 0x70a   :  { %v6820_v2 = vpop.eup %6819  ;;  %v5517_v25 = vrot.slane %v5516_v23, 2  ;;  %6825 = vrcp.f32 %v5320_v60  ;;  %v6453_v43 = vpop.f32.mrf.mxu1  ;;  %v5504_v39 = vadd.f32 %v5503_v52, %v5502_v1  ;;  %v5508_v50 = vrot.slane %v5507_v11, 4 }
 0x70b   :  { %5444 = vst [vmem:[#allocation7 + $0x90] sm:$0xff] %v5412_v16  ;;  %v5521_v9 = vadd.f32 %v5413_v49, %v5412_v16  ;;  %v5415_v31 = vmul.f32 %v6820_v2, %v9214_v19  ;;  %v5195_v7 = vadd.f32 %v6453_v43, %v9256_v4  ;;  %v5574_v37 = vmul.f32 0.0625, %v5485_v56 }
 0x70c   :  { %v6822_v51 = vpop.eup %6821  ;;  %v5131_v55 = vpop.f32.mrf.mxu1  ;;  %v5505_v21 = vrot.slane %v5504_v39, 1  ;;  %v5518_v17 = vadd.f32 %v5517_v25, %v5516_v23  ;;  %v5509_v19 = vadd.f32 %v5508_v50, %v5507_v11  ;;  %v5604_v1 = vsel %vm5603_vm1, %v5572_v28, %v5571_v36  ;;  %v9259_v28 = vld [vmem:[#allocation58_spill] sm:$0xff] }
 0x70d   :  { %v5522_v48 = vrot.slane %v5521_v9, 4  ;;  %5447 = vst [vmem:[#allocation7 + $0xa8] sm:$0xff] %v5415_v31  ;;  %v5414_v24 = vmul.f32 %v6822_v51, %v9216_v33  ;;  %v5976_v59 = vmul.f32 -1.442695, %v5195_v7  ;;  %v5194_v13 = vadd.f32 %v5131_v55, %v9257_v35 }
 0x70e   :  { %v5510_v22 = vrot.slane %v5509_v19, 2  ;;  %v5519_v10 = vrot.slane %v5518_v17, 1  ;;  %v5506_v33 = vadd.f32 %v5505_v21, %v5504_v39  ;;  %v5576_v12 = vmul.f32 0.0625, %v5499_v38 }
 0x70f   :  { %v5523_v57 = vadd.f32 %v5522_v48, %v5521_v9  ;;  %5446 = vst [vmem:[#allocation7 + $0xa0] sm:$0xff] %v5414_v24  ;;  %v5528_v42 = vadd.f32 %v5415_v31, %v5414_v24  ;;  %6827 = vpow2.f32 %v5976_v59  ;;  %v5975_v18 = vmul.f32 -1.442695, %v5194_v13  ;;  %v9258_v24 = vld [vmem:[#allocation59_spill] sm:$0xff] }
 0x710   :  { %v5511_v26 = vadd.f32 %v5510_v22, %v5509_v19  ;;  %v5520_v30 = vadd.f32 %v5519_v10, %v5518_v17  ;;  %v5606_v23 = vsel %vm5605_vm2, %v5573_v6, %v5604_v1  ;;  %v5577_v16 = vmul.f32 0.0625, %v5506_v33 }
 0x711   :  { %v5524_v40 = vrot.slane %v5523_v57, 2  ;;  %v5529_v62 = vrot.slane %v5528_v42, 4  ;;  %6829 = vpow2.f32 %v5975_v18  ;;  %v5608_v46 = vsel %vm5607_vm3, %v5574_v37, %v5606_v23 }
 0x712   :  { %v5512_v49 = vrot.slane %v5511_v26, 1  ;;  %v5610_v36 = vsel %vm5609_vm4, %v5575_v47, %v5608_v46  ;;  %v5579_v9 = vmul.f32 0.0625, %v5520_v30 }
 0x713   :  { %v5530_v14 = vadd.f32 %v5529_v62, %v5528_v42  ;;  %v5525_v29 = vadd.f32 %v5524_v40, %v5523_v57  ;;  %v5612_v39 = vsel %vm5611_vm6, %v5576_v12, %v5610_v36 }
 0x714   :  { %v6824_v3 = vpop.eup %6823  ;;  %v5513_v41 = vadd.f32 %v5512_v49, %v5511_v26  ;;  %v5614_v4 = vsel %vm5613_vm7, %v5577_v16, %v5612_v39 }
 0x715   :  { %v5417_v60 = vmul.f32 %v6824_v3, %v9219_v27  ;;  %v5526_v15 = vrot.slane %v5525_v29, 1  ;;  %v5531_v52 = vrot.slane %v5530_v14, 2 }
 0x716   :  { %v5578_v44 = vmul.f32 0.0625, %v5513_v41 }
 0x717   :  { %v6826_v11 = vpop.eup %6825  ;;  %5449 = vst [vmem:[#allocation7 + $0xb8] sm:$0xff] %v5417_v60  ;;  %v5527_v2 = vadd.f32 %v5526_v15, %v5525_v29  ;;  %v5532_v25 = vadd.f32 %v5531_v52, %v5530_v14 }
 0x718   :  { %v5416_v43 = vmul.f32 %v6826_v11, %v9220_v63  ;;  %v5616_v50 = vsel %vm5615_vm5, %v5578_v44, %v5614_v4  ;;  %v9261_v44 = vld [vmem:[#allocation60_spill] sm:$0xff] }
 0x719   :  { %v5533_v27 = vrot.slane %v5532_v25, 1  ;;  %v5580_v31 = vmul.f32 0.0625, %v5527_v2  ;;  %5626 = vst [vmem:[#allocation8] sm:$0xff] %v5616_v50  ;;  %v9260_v2 = vld [vmem:[#allocation61_spill] sm:$0xff] }
 0x71a   :  { %5448 = vst [vmem:[#allocation7 + $0xb0] sm:$0xff] %v5416_v43  ;;  %v5535_v7 = vadd.f32 %v5417_v60, %v5416_v43 }
 0x71b   :  { %v5534_v51 = vadd.f32 %v5533_v27, %v5532_v25  ;;  %v5617_v55 = vsel %vm5603_vm1, %v5580_v31, %v5579_v9 }
 0x71c   :  { %v6828_v32 = vpop.eup %6827  ;;  %v5536_v53 = vrot.slane %v5535_v7, 4 }
 0x71d   :  { %v5323_v21 = vadd.f32 1.0, %v6828_v32  ;;  %v6456_v63 = vpop.f32.mrf.mxu1  ;;  %v5581_v17 = vmul.f32 0.0625, %v5534_v51  ;;  %v9263_v32 = vld [vmem:[#allocation62_spill] sm:$0xff] }
 0x71e   :  { %v6830_v48 = vpop.eup %6829  ;;  %v5197_v59 = vadd.f32 %v6456_v63, %v9258_v24  ;;  %v5537_v35 = vadd.f32 %v5536_v53, %v5535_v7  ;;  %v9262_v7 = vld [vmem:[#allocation63_spill] sm:$0xff] }
 0x71f   :  { %6831 = vrcp.f32 %v5323_v21  ;;  %v5322_v13 = vadd.f32 1.0, %v6830_v48  ;;  %v5141_v56 = vpop.f32.mrf.mxu1  ;;  %v5618_v5 = vsel %vm5605_vm2, %v5581_v17, %v5617_v55 }
 0x720   :  { %v5978_v19 = vmul.f32 -1.442695, %v5197_v59  ;;  %v5196_v57 = vadd.f32 %v5141_v56, %v9259_v28  ;;  %v5538_v42 = vrot.slane %v5537_v35, 2 }
 0x721   :  { %6833 = vrcp.f32 %v5322_v13 }
 0x722   :  { %6835 = vpow2.f32 %v5978_v19  ;;  %v5977_v18 = vmul.f32 -1.442695, %v5196_v57  ;;  %v5539_v38 = vadd.f32 %v5538_v42, %v5537_v35 }
 0x724   :  { %6837 = vpow2.f32 %v5977_v18  ;;  %v5540_v22 = vrot.slane %v5539_v38, 1 }
 0x726   :  { %v5541_v10 = vadd.f32 %v5540_v22, %v5539_v38 }
 0x728   :  { %v5582_v6 = vmul.f32 0.0625, %v5541_v10 }
 0x72a   :  { %v5619_v40 = vsel %vm5607_vm3, %v5582_v6, %v5618_v5 }
 0x72c   :  { %v6832_v62 = vpop.eup %6831 }
 0x72d   :  { %v5419_v33 = vmul.f32 %v6832_v62, %v9217_v0 }
 0x72e   :  { %v6834_v26 = vpop.eup %6833 }
 0x72f   :  { %v6836_v37 = vpop.eup %6835  ;;  %5451 = vst [vmem:[#allocation7 + $0xc8] sm:$0xff] %v5419_v33  ;;  %v5418_v14 = vmul.f32 %v6834_v26, %v9222_v54 }
 0x730   :  { %v5325_v29 = vadd.f32 1.0, %v6836_v37 }
 0x731   :  { %v6838_v47 = vpop.eup %6837  ;;  %5450 = vst [vmem:[#allocation7 + $0xc0] sm:$0xff] %v5418_v14  ;;  %v5542_v1 = vadd.f32 %v5419_v33, %v5418_v14 }
 0x732   :  { %6839 = vrcp.f32 %v5325_v29  ;;  %v5324_v3 = vadd.f32 1.0, %v6838_v47 }
 0x733   :  { %v5543_v49 = vrot.slane %v5542_v1, 4 }
 0x734   :  { %6841 = vrcp.f32 %v5324_v3 }
 0x735   :  { %v5544_v30 = vadd.f32 %v5543_v49, %v5542_v1 }
 0x737   :  { %v5545_v12 = vrot.slane %v5544_v30, 2 }
 0x739   :  { %v5546_v23 = vadd.f32 %v5545_v12, %v5544_v30 }
 0x73b   :  { %v5547_v60 = vrot.slane %v5546_v23, 1 }
 0x73d   :  { %v5548_v15 = vadd.f32 %v5547_v60, %v5546_v23 }
 0x73f   :  { %v6840_v52 = vpop.eup %6839  ;;  %v5583_v0 = vmul.f32 0.0625, %v5548_v15 }
 0x740   :  { %v5421_v16 = vmul.f32 %v6840_v52, %v9221_v61 }
 0x741   :  { %v6842_v41 = vpop.eup %6841  ;;  %v9098_v54 = vsel %vm5609_vm4, %v5583_v0, %v5619_v40  ;;  %v6459_v11 = vpop.f32.mrf.mxu1 }
 0x742   :  { %5453 = vst [vmem:[#allocation7 + $0xd8] sm:$0xff] %v5421_v16  ;;  %v5420_v46 = vmul.f32 %v6842_v41, %v9224_v45  ;;  %v5199_v25 = vadd.f32 %v6459_v11, %v9260_v2 }
 0x743   :  { %v5151_v36 = vpop.f32.mrf.mxu1 }
 0x744   :  { %5452 = vst [vmem:[#allocation7 + $0xd0] sm:$0xff] %v5420_v46  ;;  %v5980_v43 = vmul.f32 -1.442695, %v5199_v25  ;;  %v5198_v39 = vadd.f32 %v5151_v36, %v9261_v44  ;;  %v5549_v5 = vadd.f32 %v5421_v16, %v5420_v46 }
 0x746   :  { %6843 = vpow2.f32 %v5980_v43  ;;  %v5979_v27 = vmul.f32 -1.442695, %v5198_v39  ;;  %v5550_v28 = vrot.slane %v5549_v5, 4 }
 0x748   :  { %6845 = vpow2.f32 %v5979_v27  ;;  %v5551_v42 = vadd.f32 %v5550_v28, %v5549_v5 }
 0x74a   :  { %v5552_v38 = vrot.slane %v5551_v42, 2 }
 0x74c   :  { %v5553_v40 = vadd.f32 %v5552_v38, %v5551_v42 }
 0x753   :  { %v6844_v9 = vpop.eup %6843 }
 0x754   :  { %v5327_v61 = vadd.f32 1.0, %v6844_v9 }
 0x755   :  { %v6462_v31 = vpop.f32.mrf.mxu1  ;;  %v6846_v4 = vpop.eup %6845 }
 0x756   :  { %v5201_v50 = vadd.f32 %v6462_v31, %v9262_v7  ;;  %6847 = vrcp.f32 %v5327_v61  ;;  %v5326_v51 = vadd.f32 1.0, %v6846_v4 }
 0x757   :  { %v5161_v45 = vpop.f32.mrf.mxu1 }
 0x758   :  { %v5982_v55 = vmul.f32 -1.442695, %v5201_v50  ;;  %v5200_v53 = vadd.f32 %v5161_v45, %v9263_v32  ;;  %6849 = vrcp.f32 %v5326_v51 }
 0x75a   :  { %6851 = vpow2.f32 %v5982_v55  ;;  %v5981_v21 = vmul.f32 -1.442695, %v5200_v53 }
 0x75c   :  { %6853 = vpow2.f32 %v5981_v21 }
 0x763   :  { %v6848_v63 = vpop.eup %6847 }
 0x764   :  { %v5423_v17 = vmul.f32 %v6848_v63, %v9223_v58 }
 0x765   :  { %v6850_v48 = vpop.eup %6849 }
 0x766   :  { %5455 = vst [vmem:[#allocation7 + $0xe8] sm:$0xff] %v5423_v17  ;;  %v5422_v59 = vmul.f32 %v6850_v48, %v9226_v8 }
 0x767   :  { %v6852_v24 = vpop.eup %6851 }
 0x768   :  { %v5329_v35 = vadd.f32 1.0, %v6852_v24  ;;  %5454 = vst [vmem:[#allocation7 + $0xe0] sm:$0xff] %v5422_v59  ;;  %v5556_v19 = vadd.f32 %v5423_v17, %v5422_v59 }
 0x769   :  { %v6854_v13 = vpop.eup %6853 }
 0x76a   :  { %6855 = vrcp.f32 %v5329_v35  ;;  %v5328_v56 = vadd.f32 1.0, %v6854_v13  ;;  %v5557_v57 = vrot.slane %v5556_v19, 4 }
 0x76c   :  { %6857 = vrcp.f32 %v5328_v56  ;;  %v5558_v18 = vadd.f32 %v5557_v57, %v5556_v19 }
 0x76e   :  { %v5559_v58 = vrot.slane %v5558_v18, 2 }
 0x770   :  { %v5560_v62 = vadd.f32 %v5559_v58, %v5558_v18 }
 0x777   :  { %v6856_v22 = vpop.eup %6855 }
 0x778   :  { %v5425_v10 = vmul.f32 %v6856_v22, %v9225_v20 }
 0x779   :  { %v6858_v8 = vpop.eup %6857 }
 0x77a   :  { %5457 = vst [vmem:[#allocation7 + $0xf8] sm:$0xff] %v5425_v10  ;;  %v5424_v6 = vmul.f32 %v6858_v8, %v9227_v34 }
 0x77c   :  { %5456 = vst [vmem:[#allocation7 + $0xf0] sm:$0xff] %v5424_v6  ;;  %v5563_v33 = vadd.f32 %v5425_v10, %v5424_v6 }
 0x77d   :  { %6916 = shalt.err (!%p6913_p0)
}
 0x77e   :  { %5639 = dma.vmem_to_hbm [thread:$0]  %s5634_s28, 4096, %s9130_s5, [#allocation4], %s6957_s7, %s6957_s7, %s6958_s8   ;;  %v5554_v20 = vrot.slane %v5553_v40, 1  ;;  %v5564_v34 = vrot.slane %v5563_v33, 4  ;;  %v5561_v26 = vrot.slane %v5560_v62, 1 }
 0x77f   :  { %s6965_s9 = smov [#allocation8]  }
 0x780   :  { %v5565_v37 = vadd.f32 %v5564_v34, %v5563_v33  ;;  %v5555_v14 = vadd.f32 %v5554_v20, %v5553_v40  ;;  %v5562_v47 = vadd.f32 %v5561_v26, %v5560_v62  ;;  %s5645_s10 = sshll.u32 %s6965_s9, 4  ;;  %s5646_s10 = int_to_ptr.vmem [resolvable:$true] %s5645_s10 }
 0x781   :  { %s6925_s5 = scalar_lea.vmem %s5646_s10, 256  ;;  %p6930_p2 = scmp.lt.s32.totalorder %s5646_s10, %s5646_s10 }
 0x782   :  { %v5566_v29 = vrot.slane %v5565_v37, 2  ;;  %v5584_v49 = vmul.f32 0.0625, %v5555_v14  ;;  %v5585_v30 = vmul.f32 0.0625, %v5562_v47  ;;  %p6926_p1 = scmp.ne.s32.totalorder %s5646_s10, %s6925_s5  ;;  %p6931_p3 = scmp.lt.s32.totalorder %s6925_s5, %s6925_s5 }
 0x784   :  { %v5567_v1 = vadd.f32 %v5566_v29, %v5565_v37  ;;  %v5621_v60 = vsel %vm5611_vm6, %v5584_v49, %v9098_v54  ;;  %p6932_p4 = por %p6931_p3, %p6930_p2 }
 0x785   :  { %v5622_v15 = vsel %vm5613_vm7, %v5585_v30, %v5621_v60 }
 0x786   :  { %v5568_v3 = vrot.slane %v5567_v1, 1  ;;  %p6933_p5 = pnand %p6932_p4, %p6926_p1 }
 0x788   :  { %v5569_v12 = vadd.f32 %v5568_v3, %v5567_v1 }
 0x78a   :  { %v5586_v23 = vmul.f32 0.0625, %v5569_v12 }
 0x78c   :  { %v5623_v52 = vsel %vm5615_vm5, %v5586_v23, %v5622_v15 }
 0x78d   :  { %5627 = vst [vmem:[#allocation8 + $0x8] sm:$0xff] %v5623_v52 }
 0x78e   :  { %6936 = shalt.err (!%p6933_p5)
}
 0x78f   :  { %5651 = dma.vmem_to_hbm [thread:$0]  %s5646_s10, 256, %s9131_s6, [#allocation9], %s6957_s7, %s6957_s7, %s6958_s8  }
 0x790   :  { %6949 = dma.done.wait [#allocation4], 4096  }
 0x791   :  { %6950 = vsyncadd [#allocation4], 4294963200 }
 0x792   :  { %6951 = dma.done.wait [#allocation9], 256  }
 0x793   :  { %6952 = vsyncadd [#allocation9], 4294967040 }
 0x794   :  { %5658 = vsyncpa [#allocation3], 1 }
 0x795   :  { %5659 = vsyncpa [#allocation6], 1 }
 0x796   :  { %5660 = vsyncpa [#allocation4], 1 }
 0x797   :  { %5661 = vsyncpa [#allocation9], 1 }

</bundles_post_ra>
